<compile_context>
chip_gen: v6e
topology: v6e:2x2x1
jax: 0.10.0
libtpu: 0.0.40
codegen_flags: <defaults>
</compile_context>

<pallas_src>
import functools

import jax
import jax.numpy as jnp
from jax.experimental import pallas as pl
from jax.experimental.pallas import tpu as pltpu


def warper3d_kernel(grid_ref, img_ref, flow_ref, out_ref, *, D, H, W, C):
    P = D * H * W

    g = grid_ref[...]                      # (3, P)  base pixel coords (x, y, z)
    fl = flow_ref[0]                       # (3, P)  flow (dx, dy, dz)

    # PyTorch normalizes by 2/(size-1)-1 and grid_sample (align_corners=True)
    # unnormalizes back -> sampling coordinate is simply grid + flow in pixels.
    ix = g[0:1, :] + fl[0:1, :]            # (1, P) along W
    iy = g[1:2, :] + fl[1:2, :]            # (1, P) along H
    iz = g[2:3, :] + fl[2:3, :]            # (1, P) along D

    ix0f = jnp.floor(ix)
    iy0f = jnp.floor(iy)
    iz0f = jnp.floor(iz)
    tx = ix - ix0f
    ty = iy - iy0f
    tz = iz - iz0f
    ix0 = ix0f.astype(jnp.int32)
    iy0 = iy0f.astype(jnp.int32)
    iz0 = iz0f.astype(jnp.int32)

    # Source flat-index column for the one-hot build: (P, 1).
    s_iota = jax.lax.broadcasted_iota(jnp.int32, (P, 1), 0)

    # Sparse trilinear sampling matrix msel[s, p] = weight of source voxel s
    # for output voxel p (8 non-zeros per column), built fully in-register.
    msel = jnp.zeros((P, P), jnp.float32)
    for k in (0, 1):                       # D (z) corner
        z_idx = iz0 + k
        wz = tz if k else (1.0 - tz)
        vz = (z_idx >= 0) & (z_idx <= D - 1)
        for j in (0, 1):                   # H (y) corner
            y_idx = iy0 + j
            wy = ty if j else (1.0 - ty)
            vy = (y_idx >= 0) & (y_idx <= H - 1)
            for i in (0, 1):               # W (x) corner
                x_idx = ix0 + i
                wx = tx if i else (1.0 - tx)
                vx = (x_idx >= 0) & (x_idx <= W - 1)
                # padding_mode='zeros': out-of-range corner contributes 0.
                wgt = jnp.where(vz & vy & vx, wz * wy * wx, 0.0)     # (1, P)
                flat = (z_idx * H + y_idx) * W + x_idx               # (1, P)
                msel = msel + jnp.where(s_iota == flat, wgt, 0.0)    # (P, P)

    # Apply the sampling matrix: (C, P_src) @ (P_src, P_out) -> (C, P_out).
    # Single tiny contraction; HIGHEST keeps the gather numerically exact and
    # its MXU cost is negligible next to the VPU one-hot build above.
    img2d = img_ref[0]                     # (C, P)
    out = jnp.dot(img2d, msel,
                  preferred_element_type=jnp.float32,
                  precision=jax.lax.Precision.HIGHEST)
    out_ref[0] = out                       # lane-dense store (last dim = P)


def warper3d_forward(img, flow):
    """img: (B, C, D, H, W); flow: (B, 3, D, H, W). Returns (B, C, D, H, W)."""
    B, C, D, H, W = img.shape
    assert flow.shape == (B, 3, D, H, W)
    P = D * H * W

    # Base sampling grid, same channel order as the module (x, y, z).
    zz, yy, xx = jnp.meshgrid(jnp.arange(D), jnp.arange(H), jnp.arange(W),
                              indexing="ij")
    grid_base = jnp.stack([xx, yy, zz], 0).reshape(3, P).astype(jnp.float32)

    img_f = img.reshape(B, C, P).astype(jnp.float32)
    flow_f = flow.reshape(B, 3, P).astype(jnp.float32)

    kernel = functools.partial(warper3d_kernel, D=D, H=H, W=W, C=C)
    out_flat = pl.pallas_call(
        kernel,
        out_shape=jax.ShapeDtypeStruct((B, C, P), jnp.float32),
        grid_spec=pltpu.PrefetchScalarGridSpec(
            num_scalar_prefetch=0,
            grid=(B,),
            in_specs=[
                pl.BlockSpec((3, P), lambda b: (0, 0)),        # shared base grid
                pl.BlockSpec((1, C, P), lambda b: (b, 0, 0)),  # img, per batch
                pl.BlockSpec((1, 3, P), lambda b: (b, 0, 0)),  # flow, per batch
            ],
            out_specs=pl.BlockSpec((1, C, P), lambda b: (b, 0, 0)),
        ),
        compiler_params=pltpu.CompilerParams(
            dimension_semantics=("parallel",)),   # batch independent -> both TCs on v7x
    )(grid_base, img_f, flow_f)

    return out_flat.reshape(B, C, D, H, W)


def reference(img, flow):
    """Pure-JAX port of Warper3d.forward (trilinear grid_sample, zeros padding,
    align_corners=True), including the module's normalize round-trip."""
    B, C, D, H, W = img.shape
    zz, yy, xx = jnp.meshgrid(jnp.arange(D), jnp.arange(H), jnp.arange(W),
                              indexing="ij")
    grid = jnp.stack([xx, yy, zz], 0).astype(jnp.float32)       # (3, D, H, W)
    vgrid = grid[None] + flow                                   # (B, 3, D, H, W)

    nx = 2.0 * vgrid[:, 0] / (W - 1) - 1.0
    ny = 2.0 * vgrid[:, 1] / (H - 1) - 1.0
    nz = 2.0 * vgrid[:, 2] / (D - 1) - 1.0

    # grid_sample unnormalization (align_corners=True)
    ix = (nx + 1.0) * 0.5 * (W - 1)
    iy = (ny + 1.0) * 0.5 * (H - 1)
    iz = (nz + 1.0) * 0.5 * (D - 1)
    ix0 = jnp.floor(ix)
    iy0 = jnp.floor(iy)
    iz0 = jnp.floor(iz)
    tx, ty, tz = ix - ix0, iy - iy0, iz - iz0

    img_flat = img.reshape(B, C, D * H * W)
    out = jnp.zeros((B, C, D, H, W), jnp.float32)
    for k in (0, 1):
        zi = iz0 + k
        wz = tz if k else 1.0 - tz
        okz = (zi >= 0) & (zi <= D - 1)
        for j in (0, 1):
            yi = iy0 + j
            wy = ty if j else 1.0 - ty
            oky = (yi >= 0) & (yi <= H - 1)
            for i in (0, 1):
                xi = ix0 + i
                wx = tx if i else 1.0 - tx
                okx = (xi >= 0) & (xi <= W - 1)
                wgt = jnp.where(okz & oky & okx, wz * wy * wx, 0.0)   # (B,D,H,W)
                zc = jnp.clip(zi, 0, D - 1).astype(jnp.int32)
                yc = jnp.clip(yi, 0, H - 1).astype(jnp.int32)
                xc = jnp.clip(xi, 0, W - 1).astype(jnp.int32)
                flat = (zc * H + yc) * W + xc                         # (B,D,H,W)
                flat_b = jnp.broadcast_to(flat.reshape(B, 1, -1),
                                          (B, C, D * H * W))
                vals = jnp.take_along_axis(img_flat, flat_b,
                                           axis=2).reshape(B, C, D, H, W)
                out = out + wgt[:, None] * vals
    return out


if __name__ == "__main__":
    key = jax.random.PRNGKey(0)
    ki, kf = jax.random.split(key, 2)

    B, C, D, H, W = 2, 1, 4, 8, 8          # img [B, 1, D, H, W] per the module
    img = jax.random.normal(ki, (B, C, D, H, W), jnp.float32)
    flow = jax.random.normal(kf, (B, 3, D, H, W), jnp.float32) * 2.0

    out = warper3d_forward(img, flow)
    out = jax.block_until_ready(out)

    ref = reference(img, flow)
    assert out.shape == ref.shape == (B, C, D, H, W), (out.shape, ref.shape)
    err = float(jnp.max(jnp.abs(out - ref)))
    assert err < 1e-3, f"max abs err {err}"
    print("KERNEL_OK")
</pallas_src>

<mosaic_0001>
module attributes {stable_mosaic.version = 11 : i64} {
  func.func @warper3d_kernel(%arg0: i32, %arg1: memref<3x256xf32, #tpu.memory_space<vmem>>, %arg2: memref<1x1x256xf32, #tpu.memory_space<vmem>>, %arg3: memref<1x3x256xf32, #tpu.memory_space<vmem>>, %arg4: memref<1x1x256xf32, #tpu.memory_space<vmem>>) attributes {dimension_semantics = [#tpu.dimension_semantics<parallel>], iteration_bounds = array<i64: 2>, scalar_prefetch = 0 : i64, scratch_operands = 0 : i64, tpu.core_type = #tpu.core_type<tc>, window_params = [{pipeline_mode = #tpu.pipeline_mode<synchronous>, transform_indices = @transform_0, window_bounds = array<i64: 3, 256>}, {transform_indices = @transform_1, window_bounds = array<i64: 1, 1, 256>}, {transform_indices = @transform_2, window_bounds = array<i64: 1, 3, 256>}, {transform_indices = @transform_3, window_bounds = array<i64: 1, 1, 256>}]} {
    %c0 = arith.constant 0 : index
    %c0_0 = arith.constant 0 : index
    %0 = vector.load %arg1[%c0, %c0_0] : memref<3x256xf32, #tpu.memory_space<vmem>>, vector<3x256xf32>
    %c0_1 = arith.constant 0 : index
    %c0_2 = arith.constant 0 : index
    %c0_3 = arith.constant 0 : index
    %1 = vector.load %arg3[%c0_1, %c0_2, %c0_3] : memref<1x3x256xf32, #tpu.memory_space<vmem>>, vector<1x3x256xf32>
    %2 = vector.shape_cast %1 : vector<1x3x256xf32> to vector<3x256xf32>
    %3 = vector.extract_strided_slice %0 {offsets = [0, 0], sizes = [1, 256], strides = [1, 1]} : vector<3x256xf32> to vector<1x256xf32>
    %4 = vector.extract_strided_slice %2 {offsets = [0, 0], sizes = [1, 256], strides = [1, 1]} : vector<3x256xf32> to vector<1x256xf32>
    %5 = arith.addf %3, %4 : vector<1x256xf32>
    %6 = vector.extract_strided_slice %0 {offsets = [1, 0], sizes = [1, 256], strides = [1, 1]} : vector<3x256xf32> to vector<1x256xf32>
    %7 = vector.extract_strided_slice %2 {offsets = [1, 0], sizes = [1, 256], strides = [1, 1]} : vector<3x256xf32> to vector<1x256xf32>
    %8 = arith.addf %6, %7 : vector<1x256xf32>
    %9 = vector.extract_strided_slice %0 {offsets = [2, 0], sizes = [1, 256], strides = [1, 1]} : vector<3x256xf32> to vector<1x256xf32>
    %10 = vector.extract_strided_slice %2 {offsets = [2, 0], sizes = [1, 256], strides = [1, 1]} : vector<3x256xf32> to vector<1x256xf32>
    %11 = arith.addf %9, %10 : vector<1x256xf32>
    %12 = math.floor %5 : vector<1x256xf32>
    %13 = math.floor %8 : vector<1x256xf32>
    %14 = math.floor %11 : vector<1x256xf32>
    %15 = arith.subf %5, %12 : vector<1x256xf32>
    %16 = arith.subf %8, %13 : vector<1x256xf32>
    %17 = arith.subf %11, %14 : vector<1x256xf32>
    %18 = arith.fptosi %12 : vector<1x256xf32> to vector<1x256xi32>
    %19 = arith.fptosi %13 : vector<1x256xf32> to vector<1x256xi32>
    %20 = arith.fptosi %14 : vector<1x256xf32> to vector<1x256xi32>
    %21 = tpu.iota {dimensions = array<i32: 0>} : vector<256x1xi32>
    %cst = arith.constant 0.000000e+00 : f32
    %22 = vector.broadcast %cst : f32 to vector<256x256xf32>
    %c0_i32 = arith.constant 0 : i32
    %23 = vector.broadcast %c0_i32 : i32 to vector<1x256xi32>
    %24 = arith.addi %20, %23 : vector<1x256xi32>
    %cst_4 = arith.constant 1.000000e+00 : f32
    %25 = vector.broadcast %cst_4 : f32 to vector<1x256xf32>
    %26 = arith.subf %25, %17 : vector<1x256xf32>
    %c0_i32_5 = arith.constant 0 : i32
    %27 = vector.broadcast %c0_i32_5 : i32 to vector<1x256xi32>
    %28 = arith.cmpi sge, %24, %27 : vector<1x256xi32>
    %c3_i32 = arith.constant 3 : i32
    %29 = vector.broadcast %c3_i32 : i32 to vector<1x256xi32>
    %30 = arith.cmpi sle, %24, %29 : vector<1x256xi32>
    %31 = arith.andi %28, %30 : vector<1x256xi1>
    %c0_i32_6 = arith.constant 0 : i32
    %32 = vector.broadcast %c0_i32_6 : i32 to vector<1x256xi32>
    %33 = arith.addi %19, %32 : vector<1x256xi32>
    %cst_7 = arith.constant 1.000000e+00 : f32
    %34 = vector.broadcast %cst_7 : f32 to vector<1x256xf32>
    %35 = arith.subf %34, %16 : vector<1x256xf32>
    %c0_i32_8 = arith.constant 0 : i32
    %36 = vector.broadcast %c0_i32_8 : i32 to vector<1x256xi32>
    %37 = arith.cmpi sge, %33, %36 : vector<1x256xi32>
    %c7_i32 = arith.constant 7 : i32
    %38 = vector.broadcast %c7_i32 : i32 to vector<1x256xi32>
    %39 = arith.cmpi sle, %33, %38 : vector<1x256xi32>
    %40 = arith.andi %37, %39 : vector<1x256xi1>
    %c0_i32_9 = arith.constant 0 : i32
    %41 = vector.broadcast %c0_i32_9 : i32 to vector<1x256xi32>
    %42 = arith.addi %18, %41 : vector<1x256xi32>
    %cst_10 = arith.constant 1.000000e+00 : f32
    %43 = vector.broadcast %cst_10 : f32 to vector<1x256xf32>
    %44 = arith.subf %43, %15 : vector<1x256xf32>
    %c0_i32_11 = arith.constant 0 : i32
    %45 = vector.broadcast %c0_i32_11 : i32 to vector<1x256xi32>
    %46 = arith.cmpi sge, %42, %45 : vector<1x256xi32>
    %c7_i32_12 = arith.constant 7 : i32
    %47 = vector.broadcast %c7_i32_12 : i32 to vector<1x256xi32>
    %48 = arith.cmpi sle, %42, %47 : vector<1x256xi32>
    %49 = arith.andi %46, %48 : vector<1x256xi1>
    %50 = arith.andi %31, %40 : vector<1x256xi1>
    %51 = arith.andi %50, %49 : vector<1x256xi1>
    %52 = arith.mulf %26, %35 : vector<1x256xf32>
    %53 = arith.mulf %52, %44 : vector<1x256xf32>
    %cst_13 = arith.constant 0.000000e+00 : f32
    %54 = vector.broadcast %cst_13 : f32 to vector<1x256xf32>
    %55 = arith.select %51, %53, %54 : vector<1x256xi1>, vector<1x256xf32>
    %c8_i32 = arith.constant 8 : i32
    %56 = vector.broadcast %c8_i32 : i32 to vector<1x256xi32>
    %57 = arith.muli %24, %56 : vector<1x256xi32>
    %58 = arith.addi %57, %33 : vector<1x256xi32>
    %c8_i32_14 = arith.constant 8 : i32
    %59 = vector.broadcast %c8_i32_14 : i32 to vector<1x256xi32>
    %60 = arith.muli %58, %59 : vector<1x256xi32>
    %61 = arith.addi %60, %42 : vector<1x256xi32>
    %62 = vector.broadcast %21 : vector<256x1xi32> to vector<256x256xi32>
    %63 = vector.broadcast %61 : vector<1x256xi32> to vector<256x256xi32>
    %64 = arith.cmpi eq, %62, %63 : vector<256x256xi32>
    %cst_15 = arith.constant 0.000000e+00 : f32
    %65 = vector.shape_cast %55 : vector<1x256xf32> to vector<1x256xf32>
    %66 = vector.broadcast %65 : vector<1x256xf32> to vector<256x256xf32>
    %67 = vector.broadcast %cst_15 : f32 to vector<256x256xf32>
    %68 = arith.select %64, %66, %67 : vector<256x256xi1>, vector<256x256xf32>
    %69 = arith.addf %22, %68 : vector<256x256xf32>
    %c1_i32 = arith.constant 1 : i32
    %70 = vector.broadcast %c1_i32 : i32 to vector<1x256xi32>
    %71 = arith.addi %18, %70 : vector<1x256xi32>
    %c0_i32_16 = arith.constant 0 : i32
    %72 = vector.broadcast %c0_i32_16 : i32 to vector<1x256xi32>
    %73 = arith.cmpi sge, %71, %72 : vector<1x256xi32>
    %c7_i32_17 = arith.constant 7 : i32
    %74 = vector.broadcast %c7_i32_17 : i32 to vector<1x256xi32>
    %75 = arith.cmpi sle, %71, %74 : vector<1x256xi32>
    %76 = arith.andi %73, %75 : vector<1x256xi1>
    %77 = arith.andi %31, %40 : vector<1x256xi1>
    %78 = arith.andi %77, %76 : vector<1x256xi1>
    %79 = arith.mulf %26, %35 : vector<1x256xf32>
    %80 = arith.mulf %79, %15 : vector<1x256xf32>
    %cst_18 = arith.constant 0.000000e+00 : f32
    %81 = vector.broadcast %cst_18 : f32 to vector<1x256xf32>
    %82 = arith.select %78, %80, %81 : vector<1x256xi1>, vector<1x256xf32>
    %c8_i32_19 = arith.constant 8 : i32
    %83 = vector.broadcast %c8_i32_19 : i32 to vector<1x256xi32>
    %84 = arith.muli %24, %83 : vector<1x256xi32>
    %85 = arith.addi %84, %33 : vector<1x256xi32>
    %c8_i32_20 = arith.constant 8 : i32
    %86 = vector.broadcast %c8_i32_20 : i32 to vector<1x256xi32>
    %87 = arith.muli %85, %86 : vector<1x256xi32>
    %88 = arith.addi %87, %71 : vector<1x256xi32>
    %89 = vector.broadcast %21 : vector<256x1xi32> to vector<256x256xi32>
    %90 = vector.broadcast %88 : vector<1x256xi32> to vector<256x256xi32>
    %91 = arith.cmpi eq, %89, %90 : vector<256x256xi32>
    %cst_21 = arith.constant 0.000000e+00 : f32
    %92 = vector.shape_cast %82 : vector<1x256xf32> to vector<1x256xf32>
    %93 = vector.broadcast %92 : vector<1x256xf32> to vector<256x256xf32>
    %94 = vector.broadcast %cst_21 : f32 to vector<256x256xf32>
    %95 = arith.select %91, %93, %94 : vector<256x256xi1>, vector<256x256xf32>
    %96 = arith.addf %69, %95 : vector<256x256xf32>
    %c1_i32_22 = arith.constant 1 : i32
    %97 = vector.broadcast %c1_i32_22 : i32 to vector<1x256xi32>
    %98 = arith.addi %19, %97 : vector<1x256xi32>
    %c0_i32_23 = arith.constant 0 : i32
    %99 = vector.broadcast %c0_i32_23 : i32 to vector<1x256xi32>
    %100 = arith.cmpi sge, %98, %99 : vector<1x256xi32>
    %c7_i32_24 = arith.constant 7 : i32
    %101 = vector.broadcast %c7_i32_24 : i32 to vector<1x256xi32>
    %102 = arith.cmpi sle, %98, %101 : vector<1x256xi32>
    %103 = arith.andi %100, %102 : vector<1x256xi1>
    %c0_i32_25 = arith.constant 0 : i32
    %104 = vector.broadcast %c0_i32_25 : i32 to vector<1x256xi32>
    %105 = arith.addi %18, %104 : vector<1x256xi32>
    %cst_26 = arith.constant 1.000000e+00 : f32
    %106 = vector.broadcast %cst_26 : f32 to vector<1x256xf32>
    %107 = arith.subf %106, %15 : vector<1x256xf32>
    %c0_i32_27 = arith.constant 0 : i32
    %108 = vector.broadcast %c0_i32_27 : i32 to vector<1x256xi32>
    %109 = arith.cmpi sge, %105, %108 : vector<1x256xi32>
    %c7_i32_28 = arith.constant 7 : i32
    %110 = vector.broadcast %c7_i32_28 : i32 to vector<1x256xi32>
    %111 = arith.cmpi sle, %105, %110 : vector<1x256xi32>
    %112 = arith.andi %109, %111 : vector<1x256xi1>
    %113 = arith.andi %31, %103 : vector<1x256xi1>
    %114 = arith.andi %113, %112 : vector<1x256xi1>
    %115 = arith.mulf %26, %16 : vector<1x256xf32>
    %116 = arith.mulf %115, %107 : vector<1x256xf32>
    %cst_29 = arith.constant 0.000000e+00 : f32
    %117 = vector.broadcast %cst_29 : f32 to vector<1x256xf32>
    %118 = arith.select %114, %116, %117 : vector<1x256xi1>, vector<1x256xf32>
    %c8_i32_30 = arith.constant 8 : i32
    %119 = vector.broadcast %c8_i32_30 : i32 to vector<1x256xi32>
    %120 = arith.muli %24, %119 : vector<1x256xi32>
    %121 = arith.addi %120, %98 : vector<1x256xi32>
    %c8_i32_31 = arith.constant 8 : i32
    %122 = vector.broadcast %c8_i32_31 : i32 to vector<1x256xi32>
    %123 = arith.muli %121, %122 : vector<1x256xi32>
    %124 = arith.addi %123, %105 : vector<1x256xi32>
    %125 = vector.broadcast %21 : vector<256x1xi32> to vector<256x256xi32>
    %126 = vector.broadcast %124 : vector<1x256xi32> to vector<256x256xi32>
    %127 = arith.cmpi eq, %125, %126 : vector<256x256xi32>
    %cst_32 = arith.constant 0.000000e+00 : f32
    %128 = vector.shape_cast %118 : vector<1x256xf32> to vector<1x256xf32>
    %129 = vector.broadcast %128 : vector<1x256xf32> to vector<256x256xf32>
    %130 = vector.broadcast %cst_32 : f32 to vector<256x256xf32>
    %131 = arith.select %127, %129, %130 : vector<256x256xi1>, vector<256x256xf32>
    %132 = arith.addf %96, %131 : vector<256x256xf32>
    %c1_i32_33 = arith.constant 1 : i32
    %133 = vector.broadcast %c1_i32_33 : i32 to vector<1x256xi32>
    %134 = arith.addi %18, %133 : vector<1x256xi32>
    %c0_i32_34 = arith.constant 0 : i32
    %135 = vector.broadcast %c0_i32_34 : i32 to vector<1x256xi32>
    %136 = arith.cmpi sge, %134, %135 : vector<1x256xi32>
    %c7_i32_35 = arith.constant 7 : i32
    %137 = vector.broadcast %c7_i32_35 : i32 to vector<1x256xi32>
    %138 = arith.cmpi sle, %134, %137 : vector<1x256xi32>
    %139 = arith.andi %136, %138 : vector<1x256xi1>
    %140 = arith.andi %31, %103 : vector<1x256xi1>
    %141 = arith.andi %140, %139 : vector<1x256xi1>
    %142 = arith.mulf %26, %16 : vector<1x256xf32>
    %143 = arith.mulf %142, %15 : vector<1x256xf32>
    %cst_36 = arith.constant 0.000000e+00 : f32
    %144 = vector.broadcast %cst_36 : f32 to vector<1x256xf32>
    %145 = arith.select %141, %143, %144 : vector<1x256xi1>, vector<1x256xf32>
    %c8_i32_37 = arith.constant 8 : i32
    %146 = vector.broadcast %c8_i32_37 : i32 to vector<1x256xi32>
    %147 = arith.muli %24, %146 : vector<1x256xi32>
    %148 = arith.addi %147, %98 : vector<1x256xi32>
    %c8_i32_38 = arith.constant 8 : i32
    %149 = vector.broadcast %c8_i32_38 : i32 to vector<1x256xi32>
    %150 = arith.muli %148, %149 : vector<1x256xi32>
    %151 = arith.addi %150, %134 : vector<1x256xi32>
    %152 = vector.broadcast %21 : vector<256x1xi32> to vector<256x256xi32>
    %153 = vector.broadcast %151 : vector<1x256xi32> to vector<256x256xi32>
    %154 = arith.cmpi eq, %152, %153 : vector<256x256xi32>
    %cst_39 = arith.constant 0.000000e+00 : f32
    %155 = vector.shape_cast %145 : vector<1x256xf32> to vector<1x256xf32>
    %156 = vector.broadcast %155 : vector<1x256xf32> to vector<256x256xf32>
    %157 = vector.broadcast %cst_39 : f32 to vector<256x256xf32>
    %158 = arith.select %154, %156, %157 : vector<256x256xi1>, vector<256x256xf32>
    %159 = arith.addf %132, %158 : vector<256x256xf32>
    %c1_i32_40 = arith.constant 1 : i32
    %160 = vector.broadcast %c1_i32_40 : i32 to vector<1x256xi32>
    %161 = arith.addi %20, %160 : vector<1x256xi32>
    %c0_i32_41 = arith.constant 0 : i32
    %162 = vector.broadcast %c0_i32_41 : i32 to vector<1x256xi32>
    %163 = arith.cmpi sge, %161, %162 : vector<1x256xi32>
    %c3_i32_42 = arith.constant 3 : i32
    %164 = vector.broadcast %c3_i32_42 : i32 to vector<1x256xi32>
    %165 = arith.cmpi sle, %161, %164 : vector<1x256xi32>
    %166 = arith.andi %163, %165 : vector<1x256xi1>
    %c0_i32_43 = arith.constant 0 : i32
    %167 = vector.broadcast %c0_i32_43 : i32 to vector<1x256xi32>
    %168 = arith.addi %19, %167 : vector<1x256xi32>
    %cst_44 = arith.constant 1.000000e+00 : f32
    %169 = vector.broadcast %cst_44 : f32 to vector<1x256xf32>
    %170 = arith.subf %169, %16 : vector<1x256xf32>
    %c0_i32_45 = arith.constant 0 : i32
    %171 = vector.broadcast %c0_i32_45 : i32 to vector<1x256xi32>
    %172 = arith.cmpi sge, %168, %171 : vector<1x256xi32>
    %c7_i32_46 = arith.constant 7 : i32
    %173 = vector.broadcast %c7_i32_46 : i32 to vector<1x256xi32>
    %174 = arith.cmpi sle, %168, %173 : vector<1x256xi32>
    %175 = arith.andi %172, %174 : vector<1x256xi1>
    %c0_i32_47 = arith.constant 0 : i32
    %176 = vector.broadcast %c0_i32_47 : i32 to vector<1x256xi32>
    %177 = arith.addi %18, %176 : vector<1x256xi32>
    %cst_48 = arith.constant 1.000000e+00 : f32
    %178 = vector.broadcast %cst_48 : f32 to vector<1x256xf32>
    %179 = arith.subf %178, %15 : vector<1x256xf32>
    %c0_i32_49 = arith.constant 0 : i32
    %180 = vector.broadcast %c0_i32_49 : i32 to vector<1x256xi32>
    %181 = arith.cmpi sge, %177, %180 : vector<1x256xi32>
    %c7_i32_50 = arith.constant 7 : i32
    %182 = vector.broadcast %c7_i32_50 : i32 to vector<1x256xi32>
    %183 = arith.cmpi sle, %177, %182 : vector<1x256xi32>
    %184 = arith.andi %181, %183 : vector<1x256xi1>
    %185 = arith.andi %166, %175 : vector<1x256xi1>
    %186 = arith.andi %185, %184 : vector<1x256xi1>
    %187 = arith.mulf %17, %170 : vector<1x256xf32>
    %188 = arith.mulf %187, %179 : vector<1x256xf32>
    %cst_51 = arith.constant 0.000000e+00 : f32
    %189 = vector.broadcast %cst_51 : f32 to vector<1x256xf32>
    %190 = arith.select %186, %188, %189 : vector<1x256xi1>, vector<1x256xf32>
    %c8_i32_52 = arith.constant 8 : i32
    %191 = vector.broadcast %c8_i32_52 : i32 to vector<1x256xi32>
    %192 = arith.muli %161, %191 : vector<1x256xi32>
    %193 = arith.addi %192, %168 : vector<1x256xi32>
    %c8_i32_53 = arith.constant 8 : i32
    %194 = vector.broadcast %c8_i32_53 : i32 to vector<1x256xi32>
    %195 = arith.muli %193, %194 : vector<1x256xi32>
    %196 = arith.addi %195, %177 : vector<1x256xi32>
    %197 = vector.broadcast %21 : vector<256x1xi32> to vector<256x256xi32>
    %198 = vector.broadcast %196 : vector<1x256xi32> to vector<256x256xi32>
    %199 = arith.cmpi eq, %197, %198 : vector<256x256xi32>
    %cst_54 = arith.constant 0.000000e+00 : f32
    %200 = vector.shape_cast %190 : vector<1x256xf32> to vector<1x256xf32>
    %201 = vector.broadcast %200 : vector<1x256xf32> to vector<256x256xf32>
    %202 = vector.broadcast %cst_54 : f32 to vector<256x256xf32>
    %203 = arith.select %199, %201, %202 : vector<256x256xi1>, vector<256x256xf32>
    %204 = arith.addf %159, %203 : vector<256x256xf32>
    %c1_i32_55 = arith.constant 1 : i32
    %205 = vector.broadcast %c1_i32_55 : i32 to vector<1x256xi32>
    %206 = arith.addi %18, %205 : vector<1x256xi32>
    %c0_i32_56 = arith.constant 0 : i32
    %207 = vector.broadcast %c0_i32_56 : i32 to vector<1x256xi32>
    %208 = arith.cmpi sge, %206, %207 : vector<1x256xi32>
    %c7_i32_57 = arith.constant 7 : i32
    %209 = vector.broadcast %c7_i32_57 : i32 to vector<1x256xi32>
    %210 = arith.cmpi sle, %206, %209 : vector<1x256xi32>
    %211 = arith.andi %208, %210 : vector<1x256xi1>
    %212 = arith.andi %166, %175 : vector<1x256xi1>
    %213 = arith.andi %212, %211 : vector<1x256xi1>
    %214 = arith.mulf %17, %170 : vector<1x256xf32>
    %215 = arith.mulf %214, %15 : vector<1x256xf32>
    %cst_58 = arith.constant 0.000000e+00 : f32
    %216 = vector.broadcast %cst_58 : f32 to vector<1x256xf32>
    %217 = arith.select %213, %215, %216 : vector<1x256xi1>, vector<1x256xf32>
    %c8_i32_59 = arith.constant 8 : i32
    %218 = vector.broadcast %c8_i32_59 : i32 to vector<1x256xi32>
    %219 = arith.muli %161, %218 : vector<1x256xi32>
    %220 = arith.addi %219, %168 : vector<1x256xi32>
    %c8_i32_60 = arith.constant 8 : i32
    %221 = vector.broadcast %c8_i32_60 : i32 to vector<1x256xi32>
    %222 = arith.muli %220, %221 : vector<1x256xi32>
    %223 = arith.addi %222, %206 : vector<1x256xi32>
    %224 = vector.broadcast %21 : vector<256x1xi32> to vector<256x256xi32>
    %225 = vector.broadcast %223 : vector<1x256xi32> to vector<256x256xi32>
    %226 = arith.cmpi eq, %224, %225 : vector<256x256xi32>
    %cst_61 = arith.constant 0.000000e+00 : f32
    %227 = vector.shape_cast %217 : vector<1x256xf32> to vector<1x256xf32>
    %228 = vector.broadcast %227 : vector<1x256xf32> to vector<256x256xf32>
    %229 = vector.broadcast %cst_61 : f32 to vector<256x256xf32>
    %230 = arith.select %226, %228, %229 : vector<256x256xi1>, vector<256x256xf32>
    %231 = arith.addf %204, %230 : vector<256x256xf32>
    %c1_i32_62 = arith.constant 1 : i32
    %232 = vector.broadcast %c1_i32_62 : i32 to vector<1x256xi32>
    %233 = arith.addi %19, %232 : vector<1x256xi32>
    %c0_i32_63 = arith.constant 0 : i32
    %234 = vector.broadcast %c0_i32_63 : i32 to vector<1x256xi32>
    %235 = arith.cmpi sge, %233, %234 : vector<1x256xi32>
    %c7_i32_64 = arith.constant 7 : i32
    %236 = vector.broadcast %c7_i32_64 : i32 to vector<1x256xi32>
    %237 = arith.cmpi sle, %233, %236 : vector<1x256xi32>
    %238 = arith.andi %235, %237 : vector<1x256xi1>
    %c0_i32_65 = arith.constant 0 : i32
    %239 = vector.broadcast %c0_i32_65 : i32 to vector<1x256xi32>
    %240 = arith.addi %18, %239 : vector<1x256xi32>
    %cst_66 = arith.constant 1.000000e+00 : f32
    %241 = vector.broadcast %cst_66 : f32 to vector<1x256xf32>
    %242 = arith.subf %241, %15 : vector<1x256xf32>
    %c0_i32_67 = arith.constant 0 : i32
    %243 = vector.broadcast %c0_i32_67 : i32 to vector<1x256xi32>
    %244 = arith.cmpi sge, %240, %243 : vector<1x256xi32>
    %c7_i32_68 = arith.constant 7 : i32
    %245 = vector.broadcast %c7_i32_68 : i32 to vector<1x256xi32>
    %246 = arith.cmpi sle, %240, %245 : vector<1x256xi32>
    %247 = arith.andi %244, %246 : vector<1x256xi1>
    %248 = arith.andi %166, %238 : vector<1x256xi1>
    %249 = arith.andi %248, %247 : vector<1x256xi1>
    %250 = arith.mulf %17, %16 : vector<1x256xf32>
    %251 = arith.mulf %250, %242 : vector<1x256xf32>
    %cst_69 = arith.constant 0.000000e+00 : f32
    %252 = vector.broadcast %cst_69 : f32 to vector<1x256xf32>
    %253 = arith.select %249, %251, %252 : vector<1x256xi1>, vector<1x256xf32>
    %c8_i32_70 = arith.constant 8 : i32
    %254 = vector.broadcast %c8_i32_70 : i32 to vector<1x256xi32>
    %255 = arith.muli %161, %254 : vector<1x256xi32>
    %256 = arith.addi %255, %233 : vector<1x256xi32>
    %c8_i32_71 = arith.constant 8 : i32
    %257 = vector.broadcast %c8_i32_71 : i32 to vector<1x256xi32>
    %258 = arith.muli %256, %257 : vector<1x256xi32>
    %259 = arith.addi %258, %240 : vector<1x256xi32>
    %260 = vector.broadcast %21 : vector<256x1xi32> to vector<256x256xi32>
    %261 = vector.broadcast %259 : vector<1x256xi32> to vector<256x256xi32>
    %262 = arith.cmpi eq, %260, %261 : vector<256x256xi32>
    %cst_72 = arith.constant 0.000000e+00 : f32
    %263 = vector.shape_cast %253 : vector<1x256xf32> to vector<1x256xf32>
    %264 = vector.broadcast %263 : vector<1x256xf32> to vector<256x256xf32>
    %265 = vector.broadcast %cst_72 : f32 to vector<256x256xf32>
    %266 = arith.select %262, %264, %265 : vector<256x256xi1>, vector<256x256xf32>
    %267 = arith.addf %231, %266 : vector<256x256xf32>
    %c1_i32_73 = arith.constant 1 : i32
    %268 = vector.broadcast %c1_i32_73 : i32 to vector<1x256xi32>
    %269 = arith.addi %18, %268 : vector<1x256xi32>
    %c0_i32_74 = arith.constant 0 : i32
    %270 = vector.broadcast %c0_i32_74 : i32 to vector<1x256xi32>
    %271 = arith.cmpi sge, %269, %270 : vector<1x256xi32>
    %c7_i32_75 = arith.constant 7 : i32
    %272 = vector.broadcast %c7_i32_75 : i32 to vector<1x256xi32>
    %273 = arith.cmpi sle, %269, %272 : vector<1x256xi32>
    %274 = arith.andi %271, %273 : vector<1x256xi1>
    %275 = arith.andi %166, %238 : vector<1x256xi1>
    %276 = arith.andi %275, %274 : vector<1x256xi1>
    %277 = arith.mulf %17, %16 : vector<1x256xf32>
    %278 = arith.mulf %277, %15 : vector<1x256xf32>
    %cst_76 = arith.constant 0.000000e+00 : f32
    %279 = vector.broadcast %cst_76 : f32 to vector<1x256xf32>
    %280 = arith.select %276, %278, %279 : vector<1x256xi1>, vector<1x256xf32>
    %c8_i32_77 = arith.constant 8 : i32
    %281 = vector.broadcast %c8_i32_77 : i32 to vector<1x256xi32>
    %282 = arith.muli %161, %281 : vector<1x256xi32>
    %283 = arith.addi %282, %233 : vector<1x256xi32>
    %c8_i32_78 = arith.constant 8 : i32
    %284 = vector.broadcast %c8_i32_78 : i32 to vector<1x256xi32>
    %285 = arith.muli %283, %284 : vector<1x256xi32>
    %286 = arith.addi %285, %269 : vector<1x256xi32>
    %287 = vector.broadcast %21 : vector<256x1xi32> to vector<256x256xi32>
    %288 = vector.broadcast %286 : vector<1x256xi32> to vector<256x256xi32>
    %289 = arith.cmpi eq, %287, %288 : vector<256x256xi32>
    %cst_79 = arith.constant 0.000000e+00 : f32
    %290 = vector.shape_cast %280 : vector<1x256xf32> to vector<1x256xf32>
    %291 = vector.broadcast %290 : vector<1x256xf32> to vector<256x256xf32>
    %292 = vector.broadcast %cst_79 : f32 to vector<256x256xf32>
    %293 = arith.select %289, %291, %292 : vector<256x256xi1>, vector<256x256xf32>
    %294 = arith.addf %267, %293 : vector<256x256xf32>
    %c0_80 = arith.constant 0 : index
    %c0_81 = arith.constant 0 : index
    %c0_82 = arith.constant 0 : index
    %295 = vector.load %arg2[%c0_80, %c0_81, %c0_82] : memref<1x1x256xf32, #tpu.memory_space<vmem>>, vector<1x1x256xf32>
    %296 = vector.shape_cast %295 : vector<1x1x256xf32> to vector<1x256xf32>
    %cst_83 = arith.constant dense<0.000000e+00> : vector<1x256xf32>
    %297 = tpu.matmul %296, %294, %cst_83 {dimension_numbers = #tpu.dot_dimension_numbers<[1], [0], [0], [1], [0, 0, 1, 1], [], []>, precision = #tpu.contract_precision<fp32>} : vector<1x256xf32>, vector<256x256xf32>, vector<1x256xf32> -> vector<1x256xf32>
    %c0_84 = arith.constant 0 : index
    %c0_85 = arith.constant 0 : index
    %c0_86 = arith.constant 0 : index
    %298 = vector.load %arg4[%c0_84, %c0_85, %c0_86] : memref<1x1x256xf32, #tpu.memory_space<vmem>>, vector<1x1x256xf32>
    %299 = vector.shape_cast %298 : vector<1x1x256xf32> to vector<1x256xf32>
    %300 = vector.shape_cast %297 : vector<1x256xf32> to vector<1x1x256xf32>
    tpu.vector_store %arg4[%c0_84, %c0_85, %c0_86], %300 {strides = array<i32>} : memref<1x1x256xf32, #tpu.memory_space<vmem>>, vector<1x1x256xf32>,
    return
  }
  func.func @transform_0(%arg0: i32) -> (i32, i32) {
    %c0_i32 = arith.constant 0 : i32
    %c0_i32_0 = arith.constant 0 : i32
    %c0_i32_1 = arith.constant 0 : i32
    return %c0_i32, %c0_i32_0 : i32, i32
  }
  func.func @transform_1(%arg0: i32) -> (i32, i32, i32) {
    %c0_i32 = arith.constant 0 : i32
    %c0_i32_0 = arith.constant 0 : i32
    %c0_i32_1 = arith.constant 0 : i32
    return %arg0, %c0_i32, %c0_i32_0 : i32, i32, i32
  }
  func.func @transform_2(%arg0: i32) -> (i32, i32, i32) {
    %c0_i32 = arith.constant 0 : i32
    %c0_i32_0 = arith.constant 0 : i32
    %c0_i32_1 = arith.constant 0 : i32
    return %arg0, %c0_i32, %c0_i32_0 : i32, i32, i32
  }
  func.func @transform_3(%arg0: i32) -> (i32, i32, i32) {
    %c0_i32 = arith.constant 0 : i32
    %c0_i32_0 = arith.constant 0 : i32
    %c0_i32_1 = arith.constant 0 : i32
    return %arg0, %c0_i32, %c0_i32_0 : i32, i32, i32
  }
}

</mosaic_0001>

<bundles_post_ra>
// kernel: tpu_custom_call.1
= control target key start
LH: loop header
LB: loop body
LE: loop exit
PB: predicated region body
PF: predicated region fallthrough
CT: control target
= control target key end

     0   :  { %8 = vsyncpa [#allocation3], 0  ;;  %s6899_s0 = inlined_call_operand.vmem [shape: f32[3,256], index: 0, kind: input, shape index: {}]   ;;  %s6900_s1 = inlined_call_operand.vmem [shape: f32[2,1,256], index: 1, kind: input, shape index: {}]   ;;  %s6901_s2 = inlined_call_operand.vmem [shape: f32[2,3,256], index: 2, kind: input, shape index: {}]   ;;  %s6902_s3 = inlined_call_operand.hbm [shape: f32[2,1,256], index: 3, kind: output, shape index: {}]  }
   0x1   :  { %10 = vsyncpa [#allocation3 + $0x1], 0  ;;  %s3675_s12 = smov 0   ;;  %s3677_s13 = smov 0  }
   0x2   :  { %s3679_s14 = smov 0   ;;  %s3681_s15 = smov 0  }
   0x3 LB: > { %s3696_s16 = sadd.s32 4294967295, %s3650_s15   ;;  %s3532_s17 = sadd.s32 4294967294, %s3650_s15   ;;  %s3650_s15 = sphi %s3681_s15, %s7598_s15   ;;  %s3646_s14 = sphi %s3679_s14, %s7597_s14   ;;  %s3642_s13 = sphi %s3677_s13, %s7596_s13   ;;  %s3638_s12 = sphi %s3675_s12, %s7595_s12  }
   0x4   : > { %s3700_s18 = sadd.s32 1, %s3650_s15   ;;  %s96_s19 = sadd.s32 1, %s3646_s14 }
   0x5   : > { %s93_s20 = ssub.s32 %s3650_s15, %s3700_s18  ;;  %p106_p0 = scmp.ne.s32.totalorder %s3646_s14, %s3642_s13 }
   0x6   : > { %p94_p1 = scmp.eq.s32.totalorder %s93_s20, 0  ;;  %p107_p2 = scmp.eq.s32.totalorder %s3696_s16, 1 }
   0x7   : > { %p112_p3 = scmp.ne.s32.totalorder %s3642_s13, %s3638_s12  ;;  %p113_p4 = scmp.eq.s32.totalorder %s3532_s17, 1 }
   0x8   : > { %s3711_s21 = scalar_select %p94_p1, %s3646_s14, %s96_s19  }
   0x9   : > { %p3713_p5 = por %p107_p2, %p106_p0  ;;  %p3717_p6 = por %p113_p4, %p112_p3 }
   0xa   : > { %p3535_p7 = scmp.ge.s32.totalorder %s3650_s15, 1  ;;  %p149_p8 = scmp.lt.s32.totalorder %s3650_s15, 3 }
   0xc   : > { %p150_p9 = pnand %p3535_p7, %p149_p8 }
   0xe   : > { %153 = sbr.rel (%p150_p9) target bundleno = 878 (0x36e), region = 32 }
  0x13   : > { %p177_p10 = scmp.lt.s32.totalorder %s3696_s16, 1  ;;  %v186_v0 = vld [vmem:[%s6899_s0] sm:$0x77]  ;;  %v6903_v1 = vlaneseq  ;;  %v3652_v30 = vmov 0   ;;  %s174_s8 = sand.u32 1, %s3642_s13  }
  0x14   : > { %s3536_s9 = sshll.u32 %s174_s8, 1  ;;  %s3546_s10 = sshll.u32 %s3696_s16, 5 }
  0x15   : > { %s3725_s24 = scalar_select %p177_p10, %s3696_s16, 1  ;;  %v3735_v4 = vshrl.u32 %v6903_v1, 7 }
  0x16   : > { %s176_s11 = scalar_lea.vmem [#allocation2], %s3536_s9  ;;  %s3654_s27 = smov [#allocation2]  }
  0x17   : > { %s3545_s25 = sshll.u32 %s3725_s24, 3  ;;  %7205 = vst [vmem:[#allocation5_spill] sm:$0xff] %v3735_v4  ;;  %v3738_v8 = vadd.s32 120, %v3735_v4  ;;  %v3741_v9 = vsub.s32 2, %v3735_v4  ;;  %v3744_v10 = vsub.s32 6, %v3735_v4  ;;  %v3747_v11 = vadd.s32 112, %v3735_v4 }
  0x18   : > { %s185_s30 = scalar_lea.vmem %s6901_s2, %s3545_s25  ;;  %v3750_v12 = vadd.s32 104, %v3735_v4  ;;  %v3755_v16 = vadd.s32 96, %v3735_v4  ;;  %v3758_v17 = vadd.s32 88, %v3735_v4  ;;  %v3761_v18 = vadd.s32 80, %v3735_v4  ;;  %s3537_s4 = sshll.u32 %s3725_s24, 1 }
  0x19   : > { %v187_v2 = vld [vmem:[%s185_s30] sm:$0x77]  ;;  %v3764_v19 = vadd.s32 72, %v3735_v4  ;;  %v3767_v20 = vadd.s32 64, %v3735_v4  ;;  %s180_s7 = scalar_lea.vmem %s6900_s1, %s3537_s4  ;;  %s3461_s17 = sshll.u32 %s176_s11, 4  ;;  %s3462_s17 = int_to_ptr.vmem [resolvable:$true] %s3461_s17 }
  0x1a   : > { %v188_v3 = vadd.f32 %v187_v2, %v186_v0  ;;  %s3459_s24 = scalar_lea.hbm %s6902_s3, %s3546_s10  ;;  %s3447_s25 = scalar_lea.sflag [#allocation3], %s174_s8 }
  0x1b   : > { %s3590_s26 = scalar_lea.vmem %s3462_s17, 32  ;;  %s3594_s16 = sshll.u32 %s3654_s27, 4  ;;  %s3595_s16 = int_to_ptr.vmem [resolvable:$false] %s3594_s16 }
  0x1c   : > { %v189_v5 = vfloor.f32 %v188_v3  ;;  %p3591_p11 = scmp.ne.s32.totalorder %s3462_s17, %s3590_s26  ;;  %s3596_s28 = scalar_lea.vmem %s3595_s16, 64 }
  0x1d   : > { %p3597_p0 = scmp.lt.s32.totalorder %s3462_s17, %s3595_s16  ;;  %p3598_p1 = scmp.lt.s32.totalorder %s3596_s28, %s3590_s26 }
  0x1e   : > { %v190_v6 = vsub.f32 %v188_v3, %v189_v5  ;;  %v3547_v7 = vtrunc.f32 %v189_v5  ;;  %p3592_p12 = pnand %p3591_p11, %p3713_p5 }
  0x1f   : > { %p3599_p2 = por %p3598_p1, %p3597_p0 }
  0x20   : > { %v3752_v13 = vcvt.f32.s32 %v3547_v7  ;;  %v225_v14 = vsub.f32 1.0, %v190_v6  ;;  %v725_v15 = vrot.slane %v190_v6, 7  ;;  %v3771_v22 = vrot.slane %v190_v6, 6  ;;  %p3593_p13 = pneg %p3592_p12 }
  0x22   : > { %vm226_vm0 = vcmp.ge.s32.totalorder %v3752_v13, 0  ;;  %vm229_vm1 = vcmp.le.s32.totalorder %v3752_v13, 7  ;;  %v239_v21 = vrot.slane %v225_v14, 7  ;;  %vm227_vm2 = vcmp.le.s32.totalorder %v3752_v13, 3  ;;  %p3600_p3 = pnand %p3599_p2, %p3593_p13 }
  0x23   : > { %v242_v23 = vrot.slane %v225_v14, 6  ;;  %v246_v24 = vmul.u32 8, %v3752_v13  ;;  %v247_v25 = vrot.slane %v3752_v13, 7  ;;  %vm230_vm3 = vmand %vm226_vm0, %vm229_vm1  ;;  %v3779_v27 = vrot.slane %v3752_v13, 6 }
  0x24   : > { %v241_v26 = vmul.f32 %v239_v21, %v225_v14  ;;  %v3782_v28 = vadd.s32 1, %v3752_v13  ;;  %v727_v29 = vmul.f32 %v725_v15, %v225_v14  ;;  %v231_v31 = vsel %vm230_vm3, 1, %v3652_v30  ;;  %vm3790_vm4 = vmand %vm226_vm0, %vm227_vm2 }
  0x25   : > { %v248_v32 = vadd.s32 %v247_v25, %v246_v24  ;;  %v1196_v33 = vmul.f32 %v239_v21, %v190_v6  ;;  %v3786_v34 = vmul.f32 %v725_v15, %v190_v6  ;;  %v232_v36 = vrot.slane %v231_v31, 7 }
  0x26   : > { %v235_v37 = vrot.slane %v231_v31, 6  ;;  %v244_v38 = vmul.f32 %v242_v23, %v241_v26  ;;  %vm480_vm5 = vcmp.ge.s32.totalorder %v3782_v28, 0  ;;  %vm481_vm6 = vcmp.le.s32.totalorder %v3782_v28, 7 }
  0x27   : > { %v249_v39 = vmul.u32 8, %v248_v32  ;;  %v490_v40 = vmul.f32 %v3771_v22, %v241_v26  ;;  %v3798_v41 = vrot.slane %v3782_v28, 6  ;;  %vm3800_vm7 = vcmp.ne.s32.totalorder %v232_v36, 0  ;;  %vm482_vm9 = vmand %vm480_vm5, %vm481_vm6 }
  0x28   : > { %vm3804_vm8 = vcmp.ne.s32.totalorder %v235_v37, 0  ;;  %v728_v44 = vmul.f32 %v727_v29, %v242_v23  ;;  %v730_v45 = vrot.slane %v3782_v28, 7  ;;  %vm234_vm10 = vmand %vm3790_vm4, %vm3800_vm7  ;;  %v483_v47 = vsel %vm482_vm9, 1, %v3652_v30 }
  0x29   : > { %v3816_v46 = vadd.s32 %v3779_v27, %v249_v39  ;;  %v3819_v48 = vadd.s32 %v3798_v41, %v249_v39  ;;  %v962_v49 = vmul.f32 %v727_v29, %v3771_v22  ;;  %vm237_vm11 = vmand %vm234_vm10, %vm3804_vm8  ;;  %v484_v50 = vrot.slane %v483_v47, 6 }
  0x2a   : > { %v721_v51 = vrot.slane %v483_v47, 7  ;;  %v731_v52 = vadd.s32 %v730_v45, %v246_v24  ;;  %vm1192_vm12 = vcmp.le.s32.totalorder %v3782_v28, 3  ;;  %v3832_v53 = vsel %vm237_vm11, %v244_v38, 0.0 }
  0x2b   : > { %v259_v54 = vrot.slane %v3816_v46, %v3744_v10  ;;  %v501_v55 = vrot.slane %v3819_v48, %v3744_v10  ;;  %vm3840_vm13 = vmand %vm480_vm5, %vm1192_vm12  ;;  %v1197_v57 = vmul.f32 %v1196_v33, %v242_v23  ;;  %v336_v58 = vrot.slane %v3832_v53, %v3741_v9 }
  0x2c   : > { %v340_v59 = vrot.slane %v3832_v53, %v3744_v10  ;;  %vm3848_vm14 = vcmp.ne.s32.totalorder %v484_v50, 0  ;;  %vm3852_vm15 = vcmp.ne.s32.totalorder %v721_v51, 0  ;;  %vm1194_vm0 = vmand %vm3840_vm13, %vm3800_vm7  ;;  %v732_v0 = vmul.u32 8, %v731_v52 }
  0x2d   : > { %v3861_v62 = vrot.slane %v259_v54, %v3741_v9  ;;  %vm486_vm1 = vmand %vm234_vm10, %vm3848_vm14  ;;  %v3871_v63 = vrot.slane %v501_v55, %v3741_v9  ;;  %v1199_v2 = vmul.u32 8, %v3782_v28  ;;  %v1431_v6 = vmul.f32 %v1196_v33, %v3771_v22 }
  0x2e   : > { %v3875_v3 = vrot.slane %v340_v59, %v3741_v9  ;;  %v3877_v5 = vsel %vm486_vm1, %v490_v40, 0.0  ;;  %vm723_vm2 = vmand %vm3790_vm4, %vm3852_vm15  ;;  %v1664_v7 = vmul.f32 %v3786_v34, %v242_v23  ;;  %v3899_v23 = vadd.s32 %v732_v0, %v3779_v27 }
  0x2f   : > { %vm299_vm3 = vcmp.eq.s32.totalorder %v3738_v8, %v3861_v62  ;;  %vm541_vm5 = vcmp.eq.s32.totalorder %v3738_v8, %v3871_v63  ;;  %v578_v14 = vrot.slane %v3877_v5, %v3741_v9  ;;  %v582_v15 = vrot.slane %v3877_v5, %v3744_v10  ;;  %vm724_vm6 = vmand %vm723_vm2, %vm3804_vm8 }
  0x30   : > { %v382_v21 = vsel %vm299_vm3, %v3875_v3, 0.0  ;;  %v3896_v24 = vsel %vm724_vm6, %v728_v44, 0.0  ;;  %vm961_vm4 = vmand %vm723_vm2, %vm3848_vm14  ;;  %v3904_v26 = vadd.s32 %v732_v0, %v3798_v41  ;;  %v741_v33 = vrot.slane %v3899_v23, %v3744_v10 }
  0x31   : > { %v3907_v29 = vrot.slane %v582_v15, %v3741_v9  ;;  %v818_v30 = vrot.slane %v3896_v24, %v3741_v9  ;;  %v822_v31 = vrot.slane %v3896_v24, %v3744_v10  ;;  %v3913_v32 = vsel %vm961_vm4, %v962_v49, 0.0  ;;  %vm1195_vm9 = vmand %vm1194_vm0, %vm3804_vm8 }
  0x32   : > { %v972_v35 = vrot.slane %v3904_v26, %v3744_v10  ;;  %v1053_v36 = vrot.slane %v3913_v32, %v3744_v10  ;;  %v3928_v37 = vsel %vm1195_vm9, %v1197_v57, 0.0  ;;  %vm1430_vm10 = vmand %vm1194_vm0, %vm3848_vm14  ;;  %v1200_v40 = vadd.s32 %v1199_v2, %v247_v25 }
  0x33   : > { %v624_v38 = vsel %vm541_vm5, %v3907_v29, 0.0  ;;  %v3942_v39 = vrot.slane %v822_v31, %v3741_v9  ;;  %v1291_v44 = vrot.slane %v3928_v37, %v3744_v10  ;;  %vm1661_vm7 = vmand %vm3840_vm13, %vm3852_vm15  ;;  %v3953_v47 = vrot.slane %v741_v33, %v3741_v9 }
  0x34   : > { %v688_v42 = vadd.f32 %v624_v38, %v382_v21  ;;  %v3956_v49 = vrot.slane %v972_v35, %v3741_v9  ;;  %v3959_v50 = vrot.slane %v1053_v36, %v3741_v9  ;;  %vm1662_vm11 = vmand %vm1661_vm7, %vm3804_vm8  ;;  %v1201_v13 = vmul.u32 8, %v1200_v40 }
  0x35   : > { %v3969_v25 = vrot.slane %v1291_v44, %v3741_v9  ;;  %v3971_v51 = vsel %vm1430_vm10, %v1431_v6, 0.0  ;;  %v3973_v52 = vsel %vm1662_vm11, %v1664_v7, 0.0  ;;  %vm781_vm12 = vcmp.eq.s32.totalorder %v3738_v8, %v3953_v47  ;;  %vm1896_vm8 = vmand %vm1661_vm7, %vm3848_vm14 }
  0x36   : > { %vm1012_vm0 = vcmp.eq.s32.totalorder %v3738_v8, %v3956_v49  ;;  %v1522_v43 = vrot.slane %v3971_v51, %v3744_v10  ;;  %v1666_v54 = vadd.s32 %v1199_v2, %v730_v45  ;;  %v864_v55 = vsel %vm781_vm12, %v3942_v39, 0.0 }
  0x37   : > { %v1095_v57 = vsel %vm1012_vm0, %v3959_v50, 0.0  ;;  %v1202_v59 = vadd.s32 %v1201_v13, %v3779_v27  ;;  %v1433_v0 = vadd.s32 %v1201_v13, %v3798_v41  ;;  %v928_v6 = vadd.f32 %v864_v55, %v688_v42 }
  0x38   : > { %v3988_v7 = vrot.slane %v1522_v43, %v3741_v9  ;;  %v1667_v15 = vmul.u32 8, %v1666_v54  ;;  %v1757_v21 = vrot.slane %v3973_v52, %v3744_v10  ;;  %v1897_v2 = vmul.f32 %v3786_v34, %v3771_v22 }
  0x39   : > { %v1210_v28 = vrot.slane %v1202_v59, %v3744_v10  ;;  %v1441_v45 = vrot.slane %v1433_v0, %v3744_v10  ;;  %v255_v31 = vrot.slane %v3816_v46, %v3741_v9  ;;  %v1159_v33 = vadd.f32 %v1095_v57, %v928_v6 }
  0x3a   : > { %v4006_v35 = vadd.s32 %v1667_v15, %v3779_v27  ;;  %v4009_v56 = vrot.slane %v1757_v21, %v3741_v9  ;;  %v4012_v60 = vadd.s32 %v1667_v15, %v3798_v41  ;;  %v4020_v22 = vsel %vm1896_vm8, %v1897_v2, 0.0 }
  0x3b   : > { %v4015_v61 = vrot.slane %v1210_v28, %v3741_v9  ;;  %v4018_v36 = vrot.slane %v1441_v45, %v3741_v9  ;;  %v4023_v34 = vrot.slane %v255_v31, %v3741_v9  ;;  %v1988_v41 = vrot.slane %v4020_v22, %v3744_v10 }
  0x3c   : > { %v1676_v27 = vrot.slane %v4006_v35, %v3744_v10  ;;  %v1907_v46 = vrot.slane %v4012_v60, %v3744_v10  ;;  %v4035_v38 = vrot.slane %v336_v58, %v3741_v9  ;;  %v497_v40 = vrot.slane %v3819_v48, %v3741_v9 }
  0x3d   : > { %vm1250_vm13 = vcmp.eq.s32.totalorder %v3738_v8, %v4015_v61  ;;  %vm1481_vm14 = vcmp.eq.s32.totalorder %v3738_v8, %v4018_v36  ;;  %vm298_vm15 = vcmp.eq.s32.totalorder %v3738_v8, %v4023_v34  ;;  %v4054_v13 = vrot.slane %v1988_v41, %v3741_v9 }
  0x3e   : > { %v1333_v10 = vsel %vm1250_vm13, %v3969_v25, 0.0  ;;  %v1564_v44 = vsel %vm1481_vm14, %v3988_v7, 0.0  ;;  %v4048_v53 = vrot.slane %v1676_v27, %v3741_v9  ;;  %v4051_v58 = vrot.slane %v1907_v46, %v3741_v9 }
  0x3f   : > { %v1397_v42 = vadd.f32 %v1333_v10, %v1159_v33  ;;  %v381_v43 = vsel %vm298_vm15, %v4035_v38, 0.0  ;;  %v4058_v54 = vrot.slane %v497_v40, %v3741_v9  ;;  %v4068_v48 = vrot.slane %v578_v14, %v3741_v9 }
  0x40   : > { %vm1716_vm1 = vcmp.eq.s32.totalorder %v3738_v8, %v4048_v53  ;;  %vm1947_vm2 = vcmp.eq.s32.totalorder %v3738_v8, %v4051_v58  ;;  %v737_v55 = vrot.slane %v3899_v23, %v3741_v9  ;;  %v4084_v5 = vrot.slane %v818_v30, %v3741_v9 }
  0x41   : > { %v1628_v57 = vadd.f32 %v1564_v44, %v1397_v42  ;;  %v1799_v6 = vsel %vm1716_vm1, %v4009_v56, 0.0  ;;  %v2030_v15 = vsel %vm1947_vm2, %v4054_v13, 0.0  ;;  %vm540_vm3 = vcmp.eq.s32.totalorder %v3738_v8, %v4058_v54 }
  0x42   : > { %v623_v21 = vsel %vm540_vm3, %v4068_v48, 0.0  ;;  %v4078_v28 = vrot.slane %v737_v55, %v3741_v9  ;;  %v968_v14 = vrot.slane %v3904_v26, %v3741_v9  ;;  %v1049_v2 = vrot.slane %v3913_v32, %v3741_v9 }
  0x43   : > { %v1863_v23 = vadd.f32 %v1799_v6, %v1628_v57  ;;  %v687_v45 = vadd.f32 %v623_v21, %v381_v43  ;;  %v1206_v31 = vrot.slane %v1202_v59, %v3741_v9  ;;  %v1287_v24 = vrot.slane %v3928_v37, %v3741_v9 }
  0x44   : > { %vm780_vm5 = vcmp.eq.s32.totalorder %v3738_v8, %v4078_v28  ;;  %v4094_v33 = vrot.slane %v968_v14, %v3741_v9  ;;  %v1437_v30 = vrot.slane %v1433_v0, %v3741_v9  ;;  %v4103_v46 = vrot.slane %v1049_v2, %v3741_v9 }
  0x45   : > { %v4099_v27 = vadd.f32 %v2030_v15, %v1863_v23  ;;  %v863_v26 = vsel %vm780_vm5, %v4084_v5, 0.0  ;;  %v4106_v32 = vrot.slane %v1206_v31, %v3741_v9  ;;  %v4111_v41 = vrot.slane %v1287_v24, %v3741_v9 }
  0x46   : > { %v927_v59 = vadd.f32 %v863_v26, %v687_v45  ;;  %vm1011_vm6 = vcmp.eq.s32.totalorder %v3738_v8, %v4094_v33  ;;  %v4114_v37 = vrot.slane %v1437_v30, %v3741_v9  ;;  %v1518_v10 = vrot.slane %v3971_v51, %v3741_v9 }
  0x47   : > { %v4117_v0 = vand.u32 4294901760, %v4099_v27  ;;  %v1094_v40 = vsel %vm1011_vm6, %v4103_v46, 0.0  ;;  %vm1249_vm4 = vcmp.eq.s32.totalorder %v3738_v8, %v4106_v32  ;;  %v1672_v43 = vrot.slane %v4006_v35, %v3741_v9 }
  0x48   : > { %v1158_v44 = vadd.f32 %v1094_v40, %v927_v59  ;;  %v1332_v42 = vsel %vm1249_vm4, %v4111_v41, 0.0  ;;  %vm1480_vm9 = vcmp.eq.s32.totalorder %v3738_v8, %v4114_v37  ;;  %v4131_v55 = vrot.slane %v1518_v10, %v3741_v9 }
  0x49   : > { %7218 = vst [vmem:[#allocation6_spill] sm:$0xff] %v4117_v0  ;;  %2140 = vmatprep.subr.mxu0 %v4117_v0  ;;  %v1753_v57 = vrot.slane %v3973_v52, %v3741_v9  ;;  %v1903_v51 = vrot.slane %v4012_v60, %v3741_v9  ;;  %v1984_v6 = vrot.slane %v4020_v22, %v3741_v9  ;;  %v4180_v10 = vadd.s32 56, %v3735_v4 }
  0x4a   : > { %v1396_v15 = vadd.f32 %v1332_v42, %v1158_v44  ;;  %v4140_v21 = vrot.slane %v1672_v43, %v3741_v9  ;;  %vm297_vm10 = vcmp.eq.s32.totalorder %v3747_v11, %v3861_v62  ;;  %vm539_vm7 = vcmp.eq.s32.totalorder %v3747_v11, %v3871_v63 }
  0x4b   : > { %v1563_v35 = vsel %vm1480_vm9, %v4131_v55, 0.0  ;;  %v4148_v52 = vrot.slane %v1753_v57, %v3741_v9  ;;  %v4151_v60 = vrot.slane %v1903_v51, %v3741_v9  ;;  %v4154_v22 = vrot.slane %v1984_v6, %v3741_v9  ;;  %7219 = vst [vmem:[#allocation7_spill] sm:$0xff] %v4180_v10 }
  0x4c   : > { %v1627_v14 = vadd.f32 %v1563_v35, %v1396_v15  ;;  %vm1715_vm11 = vcmp.eq.s32.totalorder %v3738_v8, %v4140_v21  ;;  %v380_v23 = vsel %vm297_vm10, %v3875_v3, 0.0  ;;  %v622_v45 = vsel %vm539_vm7, %v3907_v29, 0.0 }
  0x4d   : > { %v1798_v2 = vsel %vm1715_vm11, %v4148_v52, 0.0  ;;  %vm1946_vm12 = vcmp.eq.s32.totalorder %v3738_v8, %v4151_v60  ;;  %v686_v31 = vadd.f32 %v622_v45, %v380_v23  ;;  %vm779_vm0 = vcmp.eq.s32.totalorder %v3747_v11, %v3953_v47 }
  0x4e   : > { %v1862_v24 = vadd.f32 %v1798_v2, %v1627_v14  ;;  %v2029_v9 = vsel %vm1946_vm12, %v4154_v22, 0.0  ;;  %v862_v30 = vsel %vm779_vm0, %v3942_v39, 0.0  ;;  %vm1010_vm8 = vcmp.eq.s32.totalorder %v3747_v11, %v3956_v49 }
  0x4f   : > { %v926_v26 = vadd.f32 %v862_v30, %v686_v31  ;;  %v1093_v59 = vsel %vm1010_vm8, %v3959_v50, 0.0  ;;  %vm1248_vm13 = vcmp.eq.s32.totalorder %v3747_v11, %v4015_v61  ;;  %vm1479_vm14 = vcmp.eq.s32.totalorder %v3747_v11, %v4018_v36 }
  0x50   : > { %v4174_v8 = vadd.f32 %v2029_v9, %v1862_v24  ;;  %v1331_v40 = vsel %vm1248_vm13, %v3969_v25, 0.0  ;;  %vm1714_vm15 = vcmp.eq.s32.totalorder %v3747_v11, %v4048_v53  ;;  %v1562_v42 = vsel %vm1479_vm14, %v3988_v7, 0.0 }
  0x51   : > { %v1157_v44 = vadd.f32 %v1093_v59, %v926_v26  ;;  %vm1945_vm1 = vcmp.eq.s32.totalorder %v3747_v11, %v4051_v58  ;;  %vm296_vm2 = vcmp.eq.s32.totalorder %v3747_v11, %v4023_v34  ;;  %v1797_v57 = vsel %vm1714_vm15, %v4009_v56, 0.0 }
  0x52   : > { %v4188_v43 = vand.u32 4294901760, %v4174_v8  ;;  %v379_v51 = vsel %vm296_vm2, %v4035_v38, 0.0  ;;  %vm538_vm3 = vcmp.eq.s32.totalorder %v3747_v11, %v4058_v54  ;;  %vm778_vm5 = vcmp.eq.s32.totalorder %v3747_v11, %v4078_v28 }
  0x53   : > { %v1395_v6 = vadd.f32 %v1331_v40, %v1157_v44  ;;  %v621_v15 = vsel %vm538_vm3, %v4068_v48, 0.0  ;;  %vm1009_vm6 = vcmp.eq.s32.totalorder %v3747_v11, %v4094_v33  ;;  %v2028_v35 = vsel %vm1945_vm1, %v4054_v13, 0.0 }
  0x54   : > { %7220 = vst [vmem:[#allocation8_spill] sm:$0xff] %v4188_v43  ;;  %2142 = vmatpush1.msra.mxu0 %v4188_v43  ;;  %v685_v14 = vadd.f32 %v621_v15, %v379_v51  ;;  %v861_v23 = vsel %vm778_vm5, %v4084_v5, 0.0  ;;  %vm1247_vm4 = vcmp.eq.s32.totalorder %v3747_v11, %v4106_v32  ;;  %v1092_v2 = vsel %vm1009_vm6, %v4103_v46, 0.0 }
  0x55   : > { %v1626_v45 = vadd.f32 %v1562_v42, %v1395_v6  ;;  %vm1478_vm9 = vcmp.eq.s32.totalorder %v3747_v11, %v4114_v37  ;;  %vm1713_vm10 = vcmp.eq.s32.totalorder %v3747_v11, %v4140_v21  ;;  %v1330_v24 = vsel %vm1247_vm4, %v4111_v41, 0.0 }
  0x56   : > { %v925_v31 = vadd.f32 %v861_v23, %v685_v14  ;;  %v1561_v9 = vsel %vm1478_vm9, %v4131_v55, 0.0  ;;  %v1796_v30 = vsel %vm1713_vm10, %v4148_v52, 0.0  ;;  %vm1944_vm7 = vcmp.eq.s32.totalorder %v3747_v11, %v4151_v60 }
  0x57   : > { %v1861_v26 = vadd.f32 %v1797_v57, %v1626_v45  ;;  %vm295_vm11 = vcmp.eq.s32.totalorder %v3750_v12, %v3861_v62  ;;  %vm537_vm12 = vcmp.eq.s32.totalorder %v3750_v12, %v3871_v63  ;;  %vm777_vm0 = vcmp.eq.s32.totalorder %v3750_v12, %v3953_v47 }
  0x58   : > { %v1156_v59 = vadd.f32 %v1092_v2, %v925_v31  ;;  %v378_v40 = vsel %vm295_vm11, %v3875_v3, 0.0  ;;  %v620_v44 = vsel %vm537_vm12, %v3907_v29, 0.0  ;;  %v860_v51 = vsel %vm777_vm0, %v3942_v39, 0.0 }
  0x59   : > { %v4222_v42 = vadd.f32 %v2028_v35, %v1861_v26  ;;  %v684_v57 = vadd.f32 %v620_v44, %v378_v40  ;;  %vm1008_vm8 = vcmp.eq.s32.totalorder %v3750_v12, %v3956_v49  ;;  %vm1246_vm13 = vcmp.eq.s32.totalorder %v3750_v12, %v4015_v61 }
  0x5a   : > { %v1394_v6 = vadd.f32 %v1330_v24, %v1156_v59  ;;  %v1091_v15 = vsel %vm1008_vm8, %v3959_v50, 0.0  ;;  %vm1477_vm14 = vcmp.eq.s32.totalorder %v3750_v12, %v4018_v36  ;;  %v2027_v35 = vsel %vm1944_vm7, %v4154_v22, 0.0 }
  0x5b   : > { %v4233_v14 = vand.u32 4294901760, %v4222_v42  ;;  %v924_v23 = vadd.f32 %v860_v51, %v684_v57  ;;  %v1329_v45 = vsel %vm1246_vm13, %v3969_v25, 0.0  ;;  %vm1712_vm15 = vcmp.eq.s32.totalorder %v3750_v12, %v4048_v53 }
  0x5c   : > { %v1625_v2 = vadd.f32 %v1561_v9, %v1394_v6  ;;  %vm1943_vm1 = vcmp.eq.s32.totalorder %v3750_v12, %v4051_v58  ;;  %vm294_vm2 = vcmp.eq.s32.totalorder %v3750_v12, %v4023_v34  ;;  %v1560_v24 = vsel %vm1477_vm14, %v3988_v7, 0.0 }
  0x5d   : > { %7221 = vst [vmem:[#allocation9_spill] sm:$0xff] %v4233_v14  ;;  %2144 = vmatprep.subr.mxu0 %v4233_v14  ;;  %v1155_v31 = vadd.f32 %v1091_v15, %v924_v23  ;;  %v1795_v11 = vsel %vm1712_vm15, %v4009_v56, 0.0  ;;  %v377_v26 = vsel %vm294_vm2, %v4035_v38, 0.0  ;;  %vm536_vm3 = vcmp.eq.s32.totalorder %v3750_v12, %v4058_v54 }
  0x5e   : > { %v1860_v59 = vadd.f32 %v1796_v30, %v1625_v2  ;;  %vm776_vm5 = vcmp.eq.s32.totalorder %v3750_v12, %v4078_v28  ;;  %vm1007_vm6 = vcmp.eq.s32.totalorder %v3750_v12, %v4094_v33  ;;  %v2026_v40 = vsel %vm1943_vm1, %v4054_v13, 0.0 }
  0x5f   : > { %v1393_v9 = vadd.f32 %v1329_v45, %v1155_v31  ;;  %v619_v44 = vsel %vm536_vm3, %v4068_v48, 0.0  ;;  %v859_v57 = vsel %vm776_vm5, %v4084_v5, 0.0  ;;  %vm1245_vm4 = vcmp.eq.s32.totalorder %v3750_v12, %v4106_v32 }
  0x60   : > { %v4259_v51 = vadd.f32 %v2027_v35, %v1860_v59  ;;  %v683_v6 = vadd.f32 %v619_v44, %v377_v26  ;;  %vm1476_vm9 = vcmp.eq.s32.totalorder %v3750_v12, %v4114_v37  ;;  %v1090_v15 = vsel %vm1007_vm6, %v4103_v46, 0.0 }
  0x61   : > { %v1624_v30 = vadd.f32 %v1560_v24, %v1393_v9  ;;  %v1328_v23 = vsel %vm1245_vm4, %v4111_v41, 0.0  ;;  %vm1711_vm10 = vcmp.eq.s32.totalorder %v3750_v12, %v4140_v21  ;;  %v1559_v2 = vsel %vm1476_vm9, %v4131_v55, 0.0 }
  0x62   : > { %v4270_v45 = vand.u32 4294901760, %v4259_v51  ;;  %v923_v35 = vadd.f32 %v859_v57, %v683_v6  ;;  %v1794_v31 = vsel %vm1711_vm10, %v4148_v52, 0.0  ;;  %vm1942_vm7 = vcmp.eq.s32.totalorder %v3750_v12, %v4151_v60 }
  0x63   : > { %v1859_v26 = vadd.f32 %v1795_v11, %v1624_v30  ;;  %vm293_vm11 = vcmp.eq.s32.totalorder %v3755_v16, %v3861_v62  ;;  %vm535_vm12 = vcmp.eq.s32.totalorder %v3755_v16, %v3871_v63  ;;  %vm775_vm0 = vcmp.eq.s32.totalorder %v3755_v16, %v3953_v47 }
  0x64   : > { %7222 = vst [vmem:[#allocation10_spill] sm:$0xff] %v4270_v45  ;;  %2146 = vmatpush1.msra.mxu0 %v4270_v45  ;;  %v1154_v24 = vadd.f32 %v1090_v15, %v923_v35  ;;  %v376_v59 = vsel %vm293_vm11, %v3875_v3, 0.0  ;;  %v618_v9 = vsel %vm535_vm12, %v3907_v29, 0.0  ;;  %v858_v57 = vsel %vm775_vm0, %v3942_v39, 0.0 }
  0x65   : > { %v4285_v11 = vadd.f32 %v2026_v40, %v1859_v26  ;;  %v682_v44 = vadd.f32 %v618_v9, %v376_v59  ;;  %vm1006_vm8 = vcmp.eq.s32.totalorder %v3755_v16, %v3956_v49  ;;  %vm1244_vm13 = vcmp.eq.s32.totalorder %v3755_v16, %v4015_v61 }
  0x66   : > { %v1392_v6 = vadd.f32 %v1328_v23, %v1154_v24  ;;  %v1089_v30 = vsel %vm1006_vm8, %v3959_v50, 0.0  ;;  %vm1475_vm14 = vcmp.eq.s32.totalorder %v3755_v16, %v4018_v36  ;;  %v2025_v40 = vsel %vm1942_vm7, %v4154_v22, 0.0 }
  0x67   : > { %v4296_v15 = vand.u32 4294901760, %v4285_v11  ;;  %v922_v35 = vadd.f32 %v858_v57, %v682_v44  ;;  %v1327_v26 = vsel %vm1244_vm13, %v3969_v25, 0.0  ;;  %vm1710_vm15 = vcmp.eq.s32.totalorder %v3755_v16, %v4048_v53 }
  0x68   : > { %v1623_v23 = vadd.f32 %v1559_v2, %v1392_v6  ;;  %vm1941_vm1 = vcmp.eq.s32.totalorder %v3755_v16, %v4051_v58  ;;  %vm292_vm2 = vcmp.eq.s32.totalorder %v3755_v16, %v4023_v34  ;;  %v1558_v59 = vsel %vm1475_vm14, %v3988_v7, 0.0 }
  0x69   : > { %7223 = vst [vmem:[#allocation11_spill] sm:$0xff] %v4296_v15  ;;  %2148 = vmatprep.subr.mxu0 %v4296_v15  ;;  %v1153_v24 = vadd.f32 %v1089_v30, %v922_v35  ;;  %v1793_v12 = vsel %vm1710_vm15, %v4009_v56, 0.0  ;;  %v375_v9 = vsel %vm292_vm2, %v4035_v38, 0.0  ;;  %vm534_vm3 = vcmp.eq.s32.totalorder %v3755_v16, %v4058_v54 }
  0x6a   : > { %v1858_v44 = vadd.f32 %v1794_v31, %v1623_v23  ;;  %vm774_vm5 = vcmp.eq.s32.totalorder %v3755_v16, %v4078_v28  ;;  %vm1005_vm6 = vcmp.eq.s32.totalorder %v3755_v16, %v4094_v33  ;;  %v2024_v57 = vsel %vm1941_vm1, %v4054_v13, 0.0 }
  0x6b   : > { %v1391_v2 = vadd.f32 %v1327_v26, %v1153_v24  ;;  %v617_v6 = vsel %vm534_vm3, %v4068_v48, 0.0  ;;  %v857_v30 = vsel %vm774_vm5, %v4084_v5, 0.0  ;;  %vm1243_vm4 = vcmp.eq.s32.totalorder %v3755_v16, %v4106_v32 }
  0x6c   : > { %v4322_v35 = vadd.f32 %v2025_v40, %v1858_v44  ;;  %v681_v1 = vadd.f32 %v617_v6, %v375_v9  ;;  %vm1474_vm9 = vcmp.eq.s32.totalorder %v3755_v16, %v4114_v37  ;;  %v1088_v23 = vsel %vm1005_vm6, %v4103_v46, 0.0 }
  0x6d   : > { %v1622_v31 = vadd.f32 %v1558_v59, %v1391_v2  ;;  %v1326_v26 = vsel %vm1243_vm4, %v4111_v41, 0.0  ;;  %vm1709_vm10 = vcmp.eq.s32.totalorder %v3755_v16, %v4140_v21  ;;  %v1557_v9 = vsel %vm1474_vm9, %v4131_v55, 0.0 }
  0x6e   : > { %v4333_v24 = vand.u32 4294901760, %v4322_v35  ;;  %v921_v40 = vadd.f32 %v857_v30, %v681_v1  ;;  %v1792_v44 = vsel %vm1709_vm10, %v4148_v52, 0.0  ;;  %vm1940_vm7 = vcmp.eq.s32.totalorder %v3755_v16, %v4151_v60 }
  0x6f   : > { %v1857_v6 = vadd.f32 %v1793_v12, %v1622_v31  ;;  %vm291_vm11 = vcmp.eq.s32.totalorder %v3758_v17, %v3861_v62  ;;  %vm533_vm12 = vcmp.eq.s32.totalorder %v3758_v17, %v3871_v63  ;;  %vm773_vm0 = vcmp.eq.s32.totalorder %v3758_v17, %v3953_v47 }
  0x70   : > { %7224 = vst [vmem:[#allocation12_spill] sm:$0xff] %v4333_v24  ;;  %2150 = vmatpush1.msra.mxu0 %v4333_v24  ;;  %v1152_v59 = vadd.f32 %v1088_v23, %v921_v40  ;;  %v374_v2 = vsel %vm291_vm11, %v3875_v3, 0.0  ;;  %v616_v1 = vsel %vm533_vm12, %v3907_v29, 0.0  ;;  %v856_v31 = vsel %vm773_vm0, %v3942_v39, 0.0 }
  0x71   : > { %v4348_v12 = vadd.f32 %v2024_v57, %v1857_v6  ;;  %v680_v30 = vadd.f32 %v616_v1, %v374_v2  ;;  %vm1004_vm8 = vcmp.eq.s32.totalorder %v3758_v17, %v3956_v49  ;;  %vm1242_vm13 = vcmp.eq.s32.totalorder %v3758_v17, %v4015_v61 }
  0x72   : > { %v1390_v4 = vadd.f32 %v1326_v26, %v1152_v59  ;;  %v1087_v10 = vsel %vm1004_vm8, %v3959_v50, 0.0  ;;  %vm1473_vm14 = vcmp.eq.s32.totalorder %v3758_v17, %v4018_v36  ;;  %v2023_v57 = vsel %vm1940_vm7, %v4154_v22, 0.0 }
  0x73   : > { %7225 = vst [vmem:[#allocation13_spill] sm:$0xff] %v4348_v12  ;;  %v4359_v23 = vand.u32 4294901760, %v4348_v12  ;;  %v920_v40 = vadd.f32 %v856_v31, %v680_v30  ;;  %v1325_v6 = vsel %vm1242_vm13, %v3969_v25, 0.0  ;;  %v1556_v59 = vsel %vm1473_vm14, %v3988_v7, 0.0 }
  0x74   : > { %v1621_v26 = vadd.f32 %v1557_v9, %v1390_v4  ;;  %vm1708_vm15 = vcmp.eq.s32.totalorder %v3758_v17, %v4048_v53  ;;  %v4371_v2 = vsub.f32 %v4099_v27, %v4117_v0  ;;  %vm1939_vm1 = vcmp.eq.s32.totalorder %v3758_v17, %v4051_v58 }
  0x75   : > { %7226 = vst [vmem:[#allocation14_spill] sm:$0xff] %v4359_v23  ;;  %2152 = vmatprep.subr.mxu0 %v4359_v23  ;;  %v1151_v1 = vadd.f32 %v1087_v10, %v920_v40  ;;  %v1791_v12 = vsel %vm1708_vm15, %v4009_v56, 0.0  ;;  %vm290_vm2 = vcmp.eq.s32.totalorder %v3758_v17, %v4023_v34  ;;  %vm532_vm3 = vcmp.eq.s32.totalorder %v3758_v17, %v4058_v54 }
  0x76   : > { %7227 = vst [vmem:[#allocation15_spill] sm:$0xff] %v4371_v2  ;;  %v1856_v4 = vadd.f32 %v1792_v44, %v1621_v26  ;;  %v6908_v16 = vand.u32 4294901760, %v4371_v2  ;;  %v373_v9 = vsel %vm290_vm2, %v4035_v38, 0.0  ;;  %v615_v30 = vsel %vm532_vm3, %v4068_v48, 0.0 }
  0x77   : > { %v1389_v27 = vadd.f32 %v1325_v6, %v1151_v1  ;;  %vm772_vm5 = vcmp.eq.s32.totalorder %v3758_v17, %v4078_v28  ;;  %vm1003_vm6 = vcmp.eq.s32.totalorder %v3758_v17, %v4094_v33  ;;  %v679_v31 = vadd.f32 %v615_v30, %v373_v9 }
  0x78   : > { %v4388_v10 = vadd.f32 %v2023_v57, %v1856_v4  ;;  %v2287_v44 = vsub.f32 %v4371_v2, %v6908_v16  ;;  %v855_v40 = vsel %vm772_vm5, %v4084_v5, 0.0  ;;  %v1086_v6 = vsel %vm1003_vm6, %v4103_v46, 0.0 }
  0x79   : > { %v1620_v26 = vadd.f32 %v1556_v59, %v1389_v27  ;;  %vm1241_vm4 = vcmp.eq.s32.totalorder %v3758_v17, %v4106_v32  ;;  %vm1472_vm9 = vcmp.eq.s32.totalorder %v3758_v17, %v4114_v37  ;;  %v2022_v57 = vsel %vm1939_vm1, %v4054_v13, 0.0 }
  0x7a   : > { %v4400_v1 = vand.u32 4294901760, %v4388_v10  ;;  %v2288_v4 = vand.u32 4294901760, %v2287_v44  ;;  %v919_v9 = vadd.f32 %v855_v40, %v679_v31  ;;  %v1324_v59 = vsel %vm1241_vm4, %v4111_v41, 0.0 }
  0x7b   : > { %v1855_v30 = vadd.f32 %v1791_v12, %v1620_v26  ;;  %v1555_v27 = vsel %vm1472_vm9, %v4131_v55, 0.0  ;;  %vm1707_vm10 = vcmp.eq.s32.totalorder %v3758_v17, %v4140_v21  ;;  %vm1938_vm7 = vcmp.eq.s32.totalorder %v3758_v17, %v4151_v60 }
  0x7c   : > { %7228 = vst [vmem:[#allocation16_spill] sm:$0xff] %v4400_v1  ;;  %2154 = vmatpush1.msra.mxu0 %v4400_v1  ;;  %2289 = vmatprep.subr.mxu1 %v2288_v4  ;;  %v1150_v16 = vadd.f32 %v1086_v6, %v919_v9  ;;  %v1790_v0 = vsel %vm1707_vm10, %v4148_v52, 0.0  ;;  %v4416_v44 = vsub.f32 %v4174_v8, %v4188_v43 }
  0x7d   : > { %v4418_v12 = vadd.f32 %v2022_v57, %v1855_v30  ;;  %vm289_vm11 = vcmp.eq.s32.totalorder %v3761_v18, %v3861_v62  ;;  %vm531_vm12 = vcmp.eq.s32.totalorder %v3761_v18, %v3871_v63  ;;  %vm771_vm0 = vcmp.eq.s32.totalorder %v3761_v18, %v3953_v47 }
  0x7e   : > { %7229 = vst [vmem:[#allocation17_spill] sm:$0xff] %v4416_v44  ;;  %v1388_v31 = vadd.f32 %v1324_v59, %v1150_v16  ;;  %v6911_v40 = vand.u32 4294901760, %v4416_v44  ;;  %v372_v26 = vsel %vm289_vm11, %v3875_v3, 0.0  ;;  %v614_v6 = vsel %vm531_vm12, %v3907_v29, 0.0 }
  0x7f   : > { %v4430_v8 = vand.u32 4294901760, %v4418_v12  ;;  %v678_v57 = vadd.f32 %v614_v6, %v372_v26  ;;  %v854_v4 = vsel %vm771_vm0, %v3942_v39, 0.0  ;;  %vm1002_vm8 = vcmp.eq.s32.totalorder %v3761_v18, %v3956_v49 }
  0x80   : > { %v1619_v9 = vadd.f32 %v1555_v27, %v1388_v31  ;;  %v2293_v16 = vsub.f32 %v4416_v44, %v6911_v40  ;;  %v1085_v30 = vsel %vm1002_vm8, %v3959_v50, 0.0  ;;  %vm1240_vm13 = vcmp.eq.s32.totalorder %v3761_v18, %v4015_v61 }
  0x81   : > { %7230 = vst [vmem:[#allocation18_spill] sm:$0xff] %v4430_v8  ;;  %2156 = vmatprep.subr.mxu0 %v4430_v8  ;;  %v2021_v59 = vsel %vm1938_vm7, %v4154_v22, 0.0  ;;  %v918_v26 = vadd.f32 %v854_v4, %v678_v57  ;;  %vm1471_vm14 = vcmp.eq.s32.totalorder %v3761_v18, %v4018_v36  ;;  %vm1706_vm15 = vcmp.eq.s32.totalorder %v3761_v18, %v4048_v53 }
  0x82   : > { %v1854_v27 = vadd.f32 %v1790_v0, %v1619_v9  ;;  %v2294_v31 = vand.u32 4294901760, %v2293_v16  ;;  %v1323_v6 = vsel %vm1240_vm13, %v3969_v25, 0.0  ;;  %v1554_v40 = vsel %vm1471_vm14, %v3988_v7, 0.0 }
  0x83   : > { %v1149_v43 = vadd.f32 %v1085_v30, %v918_v26  ;;  %v1789_v44 = vsel %vm1706_vm15, %v4009_v56, 0.0  ;;  %v4455_v17 = vsub.f32 %v4222_v42, %v4233_v14  ;;  %vm288_vm1 = vcmp.eq.s32.totalorder %v3761_v18, %v4023_v34 }
  0x84   : > { %v4459_v57 = vadd.f32 %v2021_v59, %v1854_v27  ;;  %2295 = vmatpush1.msra.mxu1 %v2294_v31  ;;  %vm1937_vm2 = vcmp.eq.s32.totalorder %v3761_v18, %v4051_v58  ;;  %v371_v0 = vsel %vm288_vm1, %v4035_v38, 0.0  ;;  %vm530_vm3 = vcmp.eq.s32.totalorder %v3761_v18, %v4058_v54 }
  0x85   : > { %7231 = vst [vmem:[#allocation19_spill] sm:$0xff] %v4455_v17  ;;  %v1387_v4 = vadd.f32 %v1323_v6, %v1149_v43  ;;  %v6916_v9 = vand.u32 4294901760, %v4455_v17  ;;  %v613_v42 = vsel %vm530_vm3, %v4068_v48, 0.0  ;;  %vm770_vm5 = vcmp.eq.s32.totalorder %v3761_v18, %v4078_v28 }
  0x86   : > { %v4471_v16 = vand.u32 4294901760, %v4459_v57  ;;  %v677_v30 = vadd.f32 %v613_v42, %v371_v0  ;;  %v853_v59 = vsel %vm770_vm5, %v4084_v5, 0.0  ;;  %vm1001_vm6 = vcmp.eq.s32.totalorder %v3761_v18, %v4094_v33 }
  0x87   : > { %v1618_v26 = vadd.f32 %v1554_v40, %v1387_v4  ;;  %v2299_v43 = vsub.f32 %v4455_v17, %v6916_v9  ;;  %v1084_v27 = vsel %vm1001_vm6, %v4103_v46, 0.0  ;;  %vm1239_vm4 = vcmp.eq.s32.totalorder %v3761_v18, %v4106_v32 }
  0x88   : > { %7232 = vst [vmem:[#allocation20_spill] sm:$0xff] %v4471_v16  ;;  %2158 = vmatpush1.msra.mxu0 %v4471_v16  ;;  %v2020_v31 = vsel %vm1937_vm2, %v4054_v13, 0.0  ;;  %v917_v6 = vadd.f32 %v853_v59, %v677_v30  ;;  %vm1470_vm9 = vcmp.eq.s32.totalorder %v3761_v18, %v4114_v37  ;;  %vm1705_vm10 = vcmp.eq.s32.totalorder %v3761_v18, %v4140_v21 }
  0x89   : > { %v1853_v40 = vadd.f32 %v1789_v44, %v1618_v26  ;;  %v2300_v0 = vand.u32 4294901760, %v2299_v43  ;;  %v1322_v4 = vsel %vm1239_vm4, %v4111_v41, 0.0  ;;  %v1553_v42 = vsel %vm1470_vm9, %v4131_v55, 0.0 }
  0x8a   : > { %v1148_v9 = vadd.f32 %v1084_v27, %v917_v6  ;;  %v1788_v14 = vsel %vm1705_vm10, %v4148_v52, 0.0  ;;  %v4496_v17 = vsub.f32 %v4259_v51, %v4270_v45  ;;  %vm287_vm7 = vcmp.eq.s32.totalorder %v3764_v19, %v3861_v62 }
  0x8b   : > { %v4500_v30 = vadd.f32 %v2020_v31, %v1853_v40  ;;  %2301 = vmatprep.subr.mxu1 %v2300_v0  ;;  %vm1936_vm11 = vcmp.eq.s32.totalorder %v3761_v18, %v4151_v60  ;;  %v370_v44 = vsel %vm287_vm7, %v3875_v3, 0.0  ;;  %vm529_vm12 = vcmp.eq.s32.totalorder %v3764_v19, %v3871_v63 }
  0x8c   : > { %7233 = vst [vmem:[#allocation21_spill] sm:$0xff] %v4496_v17  ;;  %v1386_v59 = vadd.f32 %v1322_v4, %v1148_v9  ;;  %v6921_v26 = vand.u32 4294901760, %v4496_v17  ;;  %v612_v51 = vsel %vm529_vm12, %v3907_v29, 0.0  ;;  %vm769_vm0 = vcmp.eq.s32.totalorder %v3764_v19, %v3953_v47 }
  0x8d   : > { %v4512_v43 = vand.u32 4294901760, %v4500_v30  ;;  %v676_v27 = vadd.f32 %v612_v51, %v370_v44  ;;  %v852_v31 = vsel %vm769_vm0, %v3942_v39, 0.0  ;;  %vm1000_vm8 = vcmp.eq.s32.totalorder %v3764_v19, %v3956_v49 }
  0x8e   : > { %v1617_v6 = vadd.f32 %v1553_v42, %v1386_v59  ;;  %v2305_v9 = vsub.f32 %v4496_v17, %v6921_v26  ;;  %v1083_v40 = vsel %vm1000_vm8, %v3959_v50, 0.0  ;;  %vm1238_vm13 = vcmp.eq.s32.totalorder %v3764_v19, %v4015_v61 }
  0x8f   : > { %7234 = vst [vmem:[#allocation22_spill] sm:$0xff] %v4512_v43  ;;  %2160 = vmatprep.subr.mxu0 %v4512_v43  ;;  %v2019_v0 = vsel %vm1936_vm11, %v4154_v22, 0.0  ;;  %v916_v4 = vadd.f32 %v852_v31, %v676_v27  ;;  %vm1469_vm14 = vcmp.eq.s32.totalorder %v3764_v19, %v4018_v36  ;;  %vm1704_vm15 = vcmp.eq.s32.totalorder %v3764_v19, %v4048_v53 }
  0x90   : > { %v1852_v42 = vadd.f32 %v1788_v14, %v1617_v6  ;;  %v2306_v44 = vand.u32 4294901760, %v2305_v9  ;;  %v1321_v59 = vsel %vm1238_vm13, %v3969_v25, 0.0  ;;  %v1552_v51 = vsel %vm1469_vm14, %v3988_v7, 0.0 }
  0x91   : > { %v1147_v26 = vadd.f32 %v1083_v40, %v916_v4  ;;  %v1787_v45 = vsel %vm1704_vm15, %v4009_v56, 0.0  ;;  %v4537_v18 = vsub.f32 %v4285_v11, %v4296_v15  ;;  %vm286_vm1 = vcmp.eq.s32.totalorder %v3764_v19, %v4023_v34 }
  0x92   : > { %v4541_v27 = vadd.f32 %v2019_v0, %v1852_v42  ;;  %2307 = vmatpush1.msra.mxu1 %v2306_v44  ;;  %vm1935_vm2 = vcmp.eq.s32.totalorder %v3764_v19, %v4051_v58  ;;  %v369_v14 = vsel %vm286_vm1, %v4035_v38, 0.0  ;;  %vm528_vm3 = vcmp.eq.s32.totalorder %v3764_v19, %v4058_v54 }
  0x93   : > { %7235 = vst [vmem:[#allocation23_spill] sm:$0xff] %v4537_v18  ;;  %v1385_v31 = vadd.f32 %v1321_v59, %v1147_v26  ;;  %v6924_v6 = vand.u32 4294901760, %v4537_v18  ;;  %v611_v11 = vsel %vm528_vm3, %v4068_v48, 0.0  ;;  %vm768_vm5 = vcmp.eq.s32.totalorder %v3764_v19, %v4078_v28 }
  0x94   : > { %v4553_v9 = vand.u32 4294901760, %v4541_v27  ;;  %v675_v40 = vadd.f32 %v611_v11, %v369_v14  ;;  %v851_v0 = vsel %vm768_vm5, %v4084_v5, 0.0  ;;  %vm999_vm6 = vcmp.eq.s32.totalorder %v3764_v19, %v4094_v33 }
  0x95   : > { %v1616_v4 = vadd.f32 %v1552_v51, %v1385_v31  ;;  %v2311_v26 = vsub.f32 %v4537_v18, %v6924_v6  ;;  %v1082_v42 = vsel %vm999_vm6, %v4103_v46, 0.0  ;;  %vm1237_vm4 = vcmp.eq.s32.totalorder %v3764_v19, %v4106_v32 }
  0x96   : > { %7236 = vst [vmem:[#allocation24_spill] sm:$0xff] %v4553_v9  ;;  %2162 = vmatpush1.msra.mxu0 %v4553_v9  ;;  %v2018_v44 = vsel %vm1935_vm2, %v4054_v13, 0.0  ;;  %v915_v59 = vadd.f32 %v851_v0, %v675_v40  ;;  %vm1468_vm9 = vcmp.eq.s32.totalorder %v3764_v19, %v4114_v37  ;;  %vm1703_vm10 = vcmp.eq.s32.totalorder %v3764_v19, %v4140_v21 }
  0x97   : > { %v1851_v51 = vadd.f32 %v1787_v45, %v1616_v4  ;;  %v2312_v14 = vand.u32 4294901760, %v2311_v26  ;;  %v1320_v31 = vsel %vm1237_vm4, %v4111_v41, 0.0  ;;  %v1551_v11 = vsel %vm1468_vm9, %v4131_v55, 0.0 }
  0x98   : > { %v1146_v6 = vadd.f32 %v1082_v42, %v915_v59  ;;  %v1786_v15 = vsel %vm1703_vm10, %v4148_v52, 0.0  ;;  %v4578_v18 = vsub.f32 %v4322_v35, %v4333_v24  ;;  %vm285_vm7 = vcmp.eq.s32.totalorder %v3767_v20, %v3861_v62 }
  0x99   : > { %v4582_v40 = vadd.f32 %v2018_v44, %v1851_v51  ;;  %2313 = vmatprep.subr.mxu1 %v2312_v14  ;;  %vm1934_vm11 = vcmp.eq.s32.totalorder %v3764_v19, %v4151_v60  ;;  %v368_v45 = vsel %vm285_vm7, %v3875_v3, 0.0  ;;  %vm527_vm12 = vcmp.eq.s32.totalorder %v3767_v20, %v3871_v63 }
  0x9a   : > { %7237 = vst [vmem:[#allocation25_spill] sm:$0xff] %v4578_v18  ;;  %v1384_v0 = vadd.f32 %v1320_v31, %v1146_v6  ;;  %v6929_v4 = vand.u32 4294901760, %v4578_v18  ;;  %v610_v35 = vsel %vm527_vm12, %v3907_v29, 0.0  ;;  %vm767_vm0 = vcmp.eq.s32.totalorder %v3767_v20, %v3953_v47 }
  0x9b   : > { %v4594_v26 = vand.u32 4294901760, %v4582_v40  ;;  %v674_v42 = vadd.f32 %v610_v35, %v368_v45  ;;  %v850_v44 = vsel %vm767_vm0, %v3942_v39, 0.0  ;;  %vm998_vm8 = vcmp.eq.s32.totalorder %v3767_v20, %v3956_v49 }
  0x9c   : > { %v1615_v59 = vadd.f32 %v1551_v11, %v1384_v0  ;;  %v2317_v6 = vsub.f32 %v4578_v18, %v6929_v4  ;;  %v1081_v51 = vsel %vm998_vm8, %v3959_v50, 0.0  ;;  %vm1236_vm13 = vcmp.eq.s32.totalorder %v3767_v20, %v4015_v61  ;;  %v7239_v18 = vld [vmem:[#allocation13_spill] sm:$0xff] }
  0x9d   : > { %7238 = vst [vmem:[#allocation26_spill] sm:$0xff] %v4594_v26  ;;  %2164 = vmatprep.subr.mxu0 %v4594_v26  ;;  %v2017_v14 = vsel %vm1934_vm11, %v4154_v22, 0.0  ;;  %v914_v31 = vadd.f32 %v850_v44, %v674_v42  ;;  %vm1467_vm14 = vcmp.eq.s32.totalorder %v3767_v20, %v4018_v36  ;;  %vm1702_vm15 = vcmp.eq.s32.totalorder %v3767_v20, %v4048_v53 }
  0x9e   : > { %v1850_v11 = vadd.f32 %v1786_v15, %v1615_v59  ;;  %v2318_v45 = vand.u32 4294901760, %v2317_v6  ;;  %v1319_v0 = vsel %vm1236_vm13, %v3969_v25, 0.0  ;;  %v1550_v35 = vsel %vm1467_vm14, %v3988_v7, 0.0 }
  0x9f   : > { %v1145_v4 = vadd.f32 %v1081_v51, %v914_v31  ;;  %v1785_v24 = vsel %vm1702_vm15, %v4009_v56, 0.0  ;;  %v4619_v19 = vsub.f32 %v7239_v18, %v4359_v23  ;;  %vm284_vm1 = vcmp.eq.s32.totalorder %v3767_v20, %v4023_v34 }
  0xa0   : > { %v4623_v42 = vadd.f32 %v2017_v14, %v1850_v11  ;;  %2319 = vmatpush1.msra.mxu1 %v2318_v45  ;;  %vm1933_vm2 = vcmp.eq.s32.totalorder %v3767_v20, %v4051_v58  ;;  %v367_v15 = vsel %vm284_vm1, %v4035_v38, 0.0  ;;  %vm526_vm3 = vcmp.eq.s32.totalorder %v3767_v20, %v4058_v54 }
  0xa1   : > { %7240 = vst [vmem:[#allocation13_spill] sm:$0xff] %v4619_v19  ;;  %v1383_v44 = vadd.f32 %v1319_v0, %v1145_v4  ;;  %v6934_v59 = vand.u32 4294901760, %v4619_v19  ;;  %v609_v18 = vsel %vm526_vm3, %v4068_v48, 0.0  ;;  %vm766_vm5 = vcmp.eq.s32.totalorder %v3767_v20, %v4078_v28 }
  0xa2   : > { %v4635_v6 = vand.u32 4294901760, %v4623_v42  ;;  %v673_v51 = vadd.f32 %v609_v18, %v367_v15  ;;  %v849_v14 = vsel %vm766_vm5, %v4084_v5, 0.0  ;;  %vm997_vm6 = vcmp.eq.s32.totalorder %v3767_v20, %v4094_v33 }
  0xa3   : > { %v1614_v31 = vadd.f32 %v1550_v35, %v1383_v44  ;;  %v2323_v4 = vsub.f32 %v4619_v19, %v6934_v59  ;;  %v1080_v11 = vsel %vm997_vm6, %v4103_v46, 0.0  ;;  %vm1235_vm4 = vcmp.eq.s32.totalorder %v3767_v20, %v4106_v32 }
  0xa4   : > { %7241 = vst [vmem:[#allocation27_spill] sm:$0xff] %v4635_v6  ;;  %2166 = vmatpush1.msra.mxu0 %v4635_v6  ;;  %v2016_v45 = vsel %vm1933_vm2, %v4054_v13, 0.0  ;;  %v913_v0 = vadd.f32 %v849_v14, %v673_v51  ;;  %vm1466_vm9 = vcmp.eq.s32.totalorder %v3767_v20, %v4114_v37  ;;  %vm1701_vm10 = vcmp.eq.s32.totalorder %v3767_v20, %v4140_v21  ;;  %v7243_v51 = vld [vmem:[#allocation7_spill] sm:$0xff] }
  0xa5   : > { %v1849_v35 = vadd.f32 %v1785_v24, %v1614_v31  ;;  %v2324_v15 = vand.u32 4294901760, %v2323_v4  ;;  %v1318_v44 = vsel %vm1235_vm4, %v4111_v41, 0.0  ;;  %v1549_v18 = vsel %vm1466_vm9, %v4131_v55, 0.0 }
  0xa6   : > { %v1144_v59 = vadd.f32 %v1080_v11, %v913_v0  ;;  %v1784_v23 = vsel %vm1701_vm10, %v4148_v52, 0.0  ;;  %v4660_v19 = vsub.f32 %v4388_v10, %v4400_v1  ;;  %vm283_vm7 = vcmp.eq.s32.totalorder %v7243_v51, %v3861_v62 }
  0xa7   : > { %v4664_v14 = vadd.f32 %v2016_v45, %v1849_v35  ;;  %2325 = vmatprep.subr.mxu1 %v2324_v15  ;;  %vm1932_vm11 = vcmp.eq.s32.totalorder %v3767_v20, %v4151_v60  ;;  %v366_v24 = vsel %vm283_vm7, %v3875_v3, 0.0  ;;  %vm525_vm12 = vcmp.eq.s32.totalorder %v7243_v51, %v3871_v63 }
  0xa8   : > { %7242 = vst [vmem:[#allocation28_spill] sm:$0xff] %v4660_v19  ;;  %v1382_v31 = vadd.f32 %v1318_v44, %v1144_v59  ;;  %v6939_v4 = vand.u32 4294901760, %v4660_v19  ;;  %v608_v10 = vsel %vm525_vm12, %v3907_v29, 0.0  ;;  %vm765_vm0 = vcmp.eq.s32.totalorder %v7243_v51, %v3953_v47 }
  0xa9   : > { %v4676_v11 = vand.u32 4294901760, %v4664_v14  ;;  %v672_v45 = vadd.f32 %v608_v10, %v366_v24  ;;  %v848_v0 = vsel %vm765_vm0, %v3942_v39, 0.0  ;;  %vm996_vm8 = vcmp.eq.s32.totalorder %v7243_v51, %v3956_v49 }
  0xaa   : > { %v1613_v35 = vadd.f32 %v1549_v18, %v1382_v31  ;;  %v2329_v59 = vsub.f32 %v4660_v19, %v6939_v4  ;;  %v1079_v15 = vsel %vm996_vm8, %v3959_v50, 0.0  ;;  %vm1234_vm13 = vcmp.eq.s32.totalorder %v7243_v51, %v4015_v61 }
  0xab   : > { %7244 = vst [vmem:[#allocation7_spill] sm:$0xff] %v4676_v11  ;;  %2168 = vmatprep.subr.mxu0 %v4676_v11  ;;  %v2015_v44 = vsel %vm1932_vm11, %v4154_v22, 0.0  ;;  %v912_v24 = vadd.f32 %v848_v0, %v672_v45  ;;  %vm1465_vm14 = vcmp.eq.s32.totalorder %v7243_v51, %v4018_v36  ;;  %vm1700_vm15 = vcmp.eq.s32.totalorder %v7243_v51, %v4048_v53 }
  0xac   : > { %v1848_v18 = vadd.f32 %v1784_v23, %v1613_v35  ;;  %v2330_v31 = vand.u32 4294901760, %v2329_v59  ;;  %v1317_v10 = vsel %vm1234_vm13, %v3969_v25, 0.0  ;;  %v1548_v4 = vsel %vm1465_vm14, %v3988_v7, 0.0 }
  0xad   : > { %v1143_v1 = vadd.f32 %v1079_v15, %v912_v24  ;;  %v1783_v19 = vsel %vm1700_vm15, %v4009_v56, 0.0  ;;  %v4701_v20 = vsub.f32 %v4418_v12, %v4430_v8  ;;  %vm282_vm1 = vcmp.eq.s32.totalorder %v7243_v51, %v4023_v34 }
  0xae   : > { %v4705_v45 = vadd.f32 %v2015_v44, %v1848_v18  ;;  %2331 = vmatpush1.msra.mxu1 %v2330_v31  ;;  %vm1931_vm2 = vcmp.eq.s32.totalorder %v7243_v51, %v4051_v58  ;;  %v365_v23 = vsel %vm282_vm1, %v4035_v38, 0.0  ;;  %vm524_vm3 = vcmp.eq.s32.totalorder %v7243_v51, %v4058_v54 }
  0xaf   : > { %7245 = vst [vmem:[#allocation29_spill] sm:$0xff] %v4701_v20  ;;  %v1381_v0 = vadd.f32 %v1317_v10, %v1143_v1  ;;  %v6944_v35 = vand.u32 4294901760, %v4701_v20  ;;  %v607_v12 = vsel %vm524_vm3, %v4068_v48, 0.0  ;;  %vm764_vm5 = vcmp.eq.s32.totalorder %v7243_v51, %v4078_v28 }
  0xb0   : > { %v4717_v59 = vand.u32 4294901760, %v4705_v45  ;;  %v671_v15 = vadd.f32 %v607_v12, %v365_v23  ;;  %v847_v44 = vsel %vm764_vm5, %v4084_v5, 0.0  ;;  %vm995_vm6 = vcmp.eq.s32.totalorder %v7243_v51, %v4094_v33 }
  0xb1   : > { %v1612_v24 = vadd.f32 %v1548_v4, %v1381_v0  ;;  %v2335_v1 = vsub.f32 %v4701_v20, %v6944_v35  ;;  %v1078_v18 = vsel %vm995_vm6, %v4103_v46, 0.0  ;;  %vm1233_vm4 = vcmp.eq.s32.totalorder %v7243_v51, %v4106_v32 }
  0xb2   : > { %7246 = vst [vmem:[#allocation30_spill] sm:$0xff] %v4717_v59  ;;  %2170 = vmatpush1.msra.mxu0 %v4717_v59  ;;  %v2014_v31 = vsel %vm1931_vm2, %v4054_v13, 0.0  ;;  %v911_v10 = vadd.f32 %v847_v44, %v671_v15  ;;  %vm1464_vm9 = vcmp.eq.s32.totalorder %v7243_v51, %v4114_v37  ;;  %vm1699_vm10 = vcmp.eq.s32.totalorder %v7243_v51, %v4140_v21  ;;  %v7248_v15 = vld [vmem:[#allocation5_spill] sm:$0xff] }
  0xb3   : > { %v1847_v4 = vadd.f32 %v1783_v19, %v1612_v24  ;;  %v2336_v23 = vand.u32 4294901760, %v2335_v1  ;;  %v1316_v0 = vsel %vm1233_vm4, %v4111_v41, 0.0  ;;  %v1547_v12 = vsel %vm1464_vm9, %v4131_v55, 0.0 }
  0xb4   : > { %v1142_v35 = vadd.f32 %v1078_v18, %v911_v10  ;;  %vm1930_vm7 = vcmp.eq.s32.totalorder %v7243_v51, %v4151_v60  ;;  %v4743_v8 = vsub.f32 %v4459_v57, %v4471_v16  ;;  %v4746_v44 = vadd.s32 48, %v7248_v15 }
  0xb5   : > { %v4748_v20 = vadd.f32 %v2014_v31, %v1847_v4  ;;  %2337 = vmatprep.subr.mxu1 %v2336_v23  ;;  %v1782_v19 = vsel %vm1699_vm10, %v4148_v52, 0.0  ;;  %v2013_v24 = vsel %vm1930_vm7, %v4154_v22, 0.0  ;;  %v4754_v1 = vsub.f32 %v4500_v30, %v4512_v43 }
  0xb6   : > { %7247 = vst [vmem:[#allocation31_spill] sm:$0xff] %v4743_v8  ;;  %v1380_v18 = vadd.f32 %v1316_v0, %v1142_v35  ;;  %v6949_v51 = vand.u32 4294901760, %v4743_v8  ;;  %vm281_vm11 = vcmp.eq.s32.totalorder %v4746_v44, %v3861_v62  ;;  %vm523_vm12 = vcmp.eq.s32.totalorder %v4746_v44, %v3871_v63 }
  0xb7   : > { %7249 = vst [vmem:[#allocation32_spill] sm:$0xff] %v4754_v1  ;;  %v4762_v57 = vand.u32 4294901760, %v4748_v20  ;;  %v364_v31 = vsel %vm281_vm11, %v3875_v3, 0.0  ;;  %v606_v10 = vsel %vm523_vm12, %v3907_v29, 0.0  ;;  %vm763_vm0 = vcmp.eq.s32.totalorder %v4746_v44, %v3953_v47 }
  0xb8   : > { %v1611_v30 = vadd.f32 %v1547_v12, %v1380_v18  ;;  %v2341_v35 = vsub.f32 %v4743_v8, %v6949_v51  ;;  %v670_v4 = vadd.f32 %v606_v10, %v364_v31  ;;  %v846_v23 = vsel %vm763_vm0, %v3942_v39, 0.0 }
  0xb9   : > { %7250 = vst [vmem:[#allocation33_spill] sm:$0xff] %v4762_v57  ;;  %2172 = vmatprep.subr.mxu0 %v4762_v57  ;;  %vm994_vm8 = vcmp.eq.s32.totalorder %v4746_v44, %v3956_v49  ;;  %vm1232_vm13 = vcmp.eq.s32.totalorder %v4746_v44, %v4015_v61  ;;  %vm1463_vm14 = vcmp.eq.s32.totalorder %v4746_v44, %v4018_v36 }
  0xba   : > { %vm1698_vm15 = vcmp.eq.s32.totalorder %v4746_v44, %v4048_v53  ;;  %v1846_v0 = vadd.f32 %v1782_v19, %v1611_v30  ;;  %v2342_v12 = vand.u32 4294901760, %v2341_v35  ;;  %v910_v18 = vadd.f32 %v846_v23, %v670_v4 }
  0xbb   : > { %v1077_v31 = vsel %vm994_vm8, %v3959_v50, 0.0  ;;  %v1315_v10 = vsel %vm1232_vm13, %v3969_v25, 0.0  ;;  %v1546_v51 = vsel %vm1463_vm14, %v3988_v7, 0.0  ;;  %v1781_v43 = vsel %vm1698_vm15, %v4009_v56, 0.0 }
  0xbc   : > { %v4787_v16 = vsub.f32 %v4541_v27, %v4553_v9  ;;  %v4789_v8 = vadd.f32 %v2013_v24, %v1846_v0  ;;  %2343 = vmatpush1.msra.mxu1 %v2342_v12  ;;  %v1141_v17 = vadd.f32 %v1077_v31, %v910_v18  ;;  %vm1929_vm1 = vcmp.eq.s32.totalorder %v4746_v44, %v4051_v58 }
  0xbd   : > { %v6958_v19 = vand.u32 4294901760, %v4754_v1  ;;  %vm280_vm2 = vcmp.eq.s32.totalorder %v4746_v44, %v4023_v34  ;;  %vm522_vm3 = vcmp.eq.s32.totalorder %v4746_v44, %v4058_v54  ;;  %vm762_vm5 = vcmp.eq.s32.totalorder %v4746_v44, %v4078_v28 }
  0xbe   : > { %7251 = vst [vmem:[#allocation34_spill] sm:$0xff] %v4787_v16  ;;  %vm993_vm6 = vcmp.eq.s32.totalorder %v4746_v44, %v4094_v33  ;;  %v4803_v27 = vand.u32 4294901760, %v4789_v8  ;;  %v1379_v24 = vadd.f32 %v1315_v10, %v1141_v17  ;;  %v363_v35 = vsel %vm280_vm2, %v4035_v38, 0.0 }
  0xbf   : > { %v2347_v30 = vsub.f32 %v4754_v1, %v6958_v19  ;;  %v2012_v4 = vsel %vm1929_vm1, %v4054_v13, 0.0  ;;  %v605_v23 = vsel %vm522_vm3, %v4068_v48, 0.0  ;;  %v845_v0 = vsel %vm762_vm5, %v4084_v5, 0.0 }
  0xc0   : > { %7252 = vst [vmem:[#allocation35_spill] sm:$0xff] %v4803_v27  ;;  %vm1231_vm4 = vcmp.eq.s32.totalorder %v4746_v44, %v4106_v32  ;;  %2174 = vmatpush1.msra.mxu0 %v4803_v27  ;;  %v1610_v12 = vadd.f32 %v1546_v51, %v1379_v24  ;;  %v669_v17 = vadd.f32 %v605_v23, %v363_v35  ;;  %v1076_v31 = vsel %vm993_vm6, %v4103_v46, 0.0 }
  0xc1   : > { %v2348_v18 = vand.u32 4294901760, %v2347_v30  ;;  %vm1462_vm9 = vcmp.eq.s32.totalorder %v4746_v44, %v4114_v37  ;;  %vm1697_vm10 = vcmp.eq.s32.totalorder %v4746_v44, %v4140_v21  ;;  %vm1928_vm7 = vcmp.eq.s32.totalorder %v4746_v44, %v4151_v60 }
  0xc2   : > { %v6963_v10 = vand.u32 4294901760, %v4787_v16  ;;  %v1845_v19 = vadd.f32 %v1781_v43, %v1610_v12  ;;  %v909_v9 = vadd.f32 %v845_v0, %v669_v17  ;;  %v1314_v51 = vsel %vm1231_vm4, %v4111_v41, 0.0 }
  0xc3   : > { %2349 = vmatprep.subr.mxu1 %v2348_v18  ;;  %v1545_v24 = vsel %vm1462_vm9, %v4131_v55, 0.0  ;;  %v1780_v30 = vsel %vm1697_vm10, %v4148_v52, 0.0  ;;  %v2011_v35 = vsel %vm1928_vm7, %v4154_v22, 0.0  ;;  %v4831_v1 = vadd.s32 40, %v7248_v15 }
  0xc4   : > { %v2353_v23 = vsub.f32 %v4787_v16, %v6963_v10  ;;  %v4833_v44 = vadd.f32 %v2012_v4, %v1845_v19  ;;  %v1140_v43 = vadd.f32 %v1076_v31, %v909_v9  ;;  %v4837_v0 = vsub.f32 %v4582_v40, %v4594_v26 }
  0xc5   : > { %v4841_v12 = vsub.f32 %v4623_v42, %v4635_v6  ;;  %vm279_vm11 = vcmp.eq.s32.totalorder %v4831_v1, %v3861_v62  ;;  %vm521_vm12 = vcmp.eq.s32.totalorder %v4831_v1, %v3871_v63  ;;  %vm761_vm0 = vcmp.eq.s32.totalorder %v4831_v1, %v3953_v47 }
  0xc6   : > { %7253 = vst [vmem:[#allocation36_spill] sm:$0xff] %v4837_v0  ;;  %v2354_v18 = vand.u32 4294901760, %v2353_v23  ;;  %v4850_v9 = vand.u32 4294901760, %v4833_v44  ;;  %v1378_v19 = vadd.f32 %v1314_v51, %v1140_v43  ;;  %v362_v40 = vsel %vm279_vm11, %v3875_v3, 0.0 }
  0xc7   : > { %7254 = vst [vmem:[#allocation37_spill] sm:$0xff] %v4841_v12  ;;  %v604_v4 = vsel %vm521_vm12, %v3907_v29, 0.0  ;;  %v844_v17 = vsel %vm761_vm0, %v3942_v39, 0.0  ;;  %vm992_vm8 = vcmp.eq.s32.totalorder %v4831_v1, %v3956_v49  ;;  %vm1230_vm13 = vcmp.eq.s32.totalorder %v4831_v1, %v4015_v61 }
  0xc8   : > { %7255 = vst [vmem:[#allocation38_spill] sm:$0xff] %v4850_v9  ;;  %2355 = vmatpush1.msra.mxu1 %v2354_v18  ;;  %v668_v42 = vadd.f32 %v604_v4, %v362_v40  ;;  %2176 = vmatprep.subr.mxu0 %v4850_v9  ;;  %v1609_v31 = vadd.f32 %v1545_v24, %v1378_v19  ;;  %v1075_v23 = vsel %vm992_vm8, %v3959_v50, 0.0  ;;  %v4864_v51 = vadd.s32 32, %v7248_v15 }
  0xc9   : > { %vm1461_vm14 = vcmp.eq.s32.totalorder %v4831_v1, %v4018_v36  ;;  %v1313_v18 = vsel %vm1230_vm13, %v3969_v25, 0.0  ;;  %vm1696_vm15 = vcmp.eq.s32.totalorder %v4831_v1, %v4048_v53  ;;  %vm1927_vm1 = vcmp.eq.s32.totalorder %v4831_v1, %v4051_v58 }
  0xca   : > { %v908_v43 = vadd.f32 %v844_v17, %v668_v42  ;;  %v1544_v40 = vsel %vm1461_vm14, %v3988_v7, 0.0  ;;  %v1844_v4 = vadd.f32 %v1780_v30, %v1609_v31  ;;  %v1779_v10 = vsel %vm1696_vm15, %v4009_v56, 0.0 }
  0xcb   : > { %v6968_v24 = vand.u32 4294901760, %v4837_v0  ;;  %vm278_vm2 = vcmp.eq.s32.totalorder %v4831_v1, %v4023_v34  ;;  %vm520_vm3 = vcmp.eq.s32.totalorder %v4831_v1, %v4058_v54  ;;  %vm760_vm5 = vcmp.eq.s32.totalorder %v4831_v1, %v4078_v28 }
  0xcc   : > { %v1139_v19 = vadd.f32 %v1075_v23, %v908_v43  ;;  %v4880_v42 = vadd.f32 %v2011_v35, %v1844_v4  ;;  %v361_v17 = vsel %vm278_vm2, %v4035_v38, 0.0  ;;  %v603_v31 = vsel %vm520_vm3, %v4068_v48, 0.0 }
  0xcd   : > { %v2359_v30 = vsub.f32 %v4837_v0, %v6968_v24  ;;  %v667_v43 = vadd.f32 %v603_v31, %v361_v17  ;;  %v843_v6 = vsel %vm760_vm5, %v4084_v5, 0.0  ;;  %vm991_vm6 = vcmp.eq.s32.totalorder %v4831_v1, %v4094_v33 }
  0xce   : > { %v1377_v23 = vadd.f32 %v1313_v18, %v1139_v19  ;;  %v4891_v26 = vand.u32 4294901760, %v4880_v42  ;;  %v1074_v4 = vsel %vm991_vm6, %v4103_v46, 0.0  ;;  %vm1229_vm4 = vcmp.eq.s32.totalorder %v4831_v1, %v4106_v32 }
  0xcf   : > { %v2360_v35 = vand.u32 4294901760, %v2359_v30  ;;  %v2010_v18 = vsel %vm1927_vm1, %v4054_v13, 0.0  ;;  %v907_v19 = vadd.f32 %v843_v6, %v667_v43  ;;  %vm1460_vm9 = vcmp.eq.s32.totalorder %v4831_v1, %v4114_v37 }
  0xd0   : > { %7256 = vst [vmem:[#allocation39_spill] sm:$0xff] %v4891_v26  ;;  %v1608_v24 = vadd.f32 %v1544_v40, %v1377_v23  ;;  %2178 = vmatpush1.msra.mxu0 %v4891_v26  ;;  %v1312_v30 = vsel %vm1229_vm4, %v4111_v41, 0.0  ;;  %v1543_v17 = vsel %vm1460_vm9, %v4131_v55, 0.0  ;;  %vm1695_vm10 = vcmp.eq.s32.totalorder %v4831_v1, %v4140_v21 }
  0xd1   : > { %2361 = vmatprep.subr.mxu1 %v2360_v35  ;;  %v6971_v40 = vand.u32 4294901760, %v4841_v12  ;;  %v1138_v23 = vadd.f32 %v1074_v4, %v907_v19  ;;  %v1778_v0 = vsel %vm1695_vm10, %v4148_v52, 0.0  ;;  %vm1926_vm7 = vcmp.eq.s32.totalorder %v4831_v1, %v4151_v60 }
  0xd2   : > { %v1843_v31 = vadd.f32 %v1779_v10, %v1608_v24  ;;  %vm277_vm11 = vcmp.eq.s32.totalorder %v4864_v51, %v3861_v62  ;;  %vm519_vm12 = vcmp.eq.s32.totalorder %v4864_v51, %v3871_v63  ;;  %vm759_vm0 = vcmp.eq.s32.totalorder %v4864_v51, %v3953_v47 }
  0xd3   : > { %v2365_v6 = vsub.f32 %v4841_v12, %v6971_v40  ;;  %v1376_v24 = vadd.f32 %v1312_v30, %v1138_v23  ;;  %v360_v43 = vsel %vm277_vm11, %v3875_v3, 0.0  ;;  %v602_v35 = vsel %vm519_vm12, %v3907_v29, 0.0 }
  0xd4   : > { %v4920_v10 = vadd.f32 %v2010_v18, %v1843_v31  ;;  %v666_v19 = vadd.f32 %v602_v35, %v360_v43  ;;  %v842_v40 = vsel %vm759_vm0, %v3942_v39, 0.0  ;;  %vm990_vm8 = vcmp.eq.s32.totalorder %v4864_v51, %v3956_v49 }
  0xd5   : > { %v2366_v4 = vand.u32 4294901760, %v2365_v6  ;;  %v1607_v16 = vadd.f32 %v1543_v17, %v1376_v24  ;;  %v1073_v2 = vsel %vm990_vm8, %v3959_v50, 0.0  ;;  %vm1228_vm13 = vcmp.eq.s32.totalorder %v4864_v51, %v4015_v61 }
  0xd6   : > { %v4928_v12 = vand.u32 4294901760, %v4920_v10  ;;  %v2009_v18 = vsel %vm1926_vm7, %v4154_v22, 0.0  ;;  %v906_v30 = vadd.f32 %v842_v40, %v666_v19  ;;  %vm1459_vm14 = vcmp.eq.s32.totalorder %v4864_v51, %v4018_v36 }
  0xd7   : > { %2367 = vmatpush1.msra.mxu1 %v2366_v4  ;;  %vm1694_vm15 = vcmp.eq.s32.totalorder %v4864_v51, %v4048_v53  ;;  %v1842_v17 = vadd.f32 %v1778_v0, %v1607_v16  ;;  %v1311_v31 = vsel %vm1228_vm13, %v3969_v25, 0.0  ;;  %v1542_v23 = vsel %vm1459_vm14, %v3988_v7, 0.0 }
  0xd8   : > { %7257 = vst [vmem:[#allocation40_spill] sm:$0xff] %v4928_v12  ;;  %2180 = vmatprep.subr.mxu0 %v4928_v12  ;;  %v1777_v6 = vsel %vm1694_vm15, %v4009_v56, 0.0  ;;  %v1137_v24 = vadd.f32 %v1073_v2, %v906_v30  ;;  %vm1925_vm1 = vcmp.eq.s32.totalorder %v4864_v51, %v4051_v58  ;;  %v4949_v1 = vsub.f32 %v4664_v14, %v4676_v11 }
  0xd9   : > { %vm276_vm2 = vcmp.eq.s32.totalorder %v4864_v51, %v4023_v34  ;;  %v4953_v40 = vadd.f32 %v2009_v18, %v1842_v17  ;;  %vm518_vm3 = vcmp.eq.s32.totalorder %v4864_v51, %v4058_v54  ;;  %vm758_vm5 = vcmp.eq.s32.totalorder %v4864_v51, %v4078_v28 }
  0xda   : > { %7258 = vst [vmem:[#allocation41_spill] sm:$0xff] %v4949_v1  ;;  %v359_v16 = vsel %vm276_vm2, %v4035_v38, 0.0  ;;  %v1375_v2 = vadd.f32 %v1311_v31, %v1137_v24  ;;  %v6978_v0 = vand.u32 4294901760, %v4949_v1  ;;  %v601_v43 = vsel %vm518_vm3, %v4068_v48, 0.0 }
  0xdb   : > { %v841_v14 = vsel %vm758_vm5, %v4084_v5, 0.0  ;;  %v4964_v35 = vand.u32 4294901760, %v4953_v40  ;;  %v665_v4 = vadd.f32 %v601_v43, %v359_v16  ;;  %vm989_vm6 = vcmp.eq.s32.totalorder %v4864_v51, %v4094_v33 }
  0xdc   : > { %vm1227_vm4 = vcmp.eq.s32.totalorder %v4864_v51, %v4106_v32  ;;  %v1606_v19 = vadd.f32 %v1542_v23, %v1375_v2  ;;  %v2008_v18 = vsel %vm1925_vm1, %v4054_v13, 0.0  ;;  %v2371_v30 = vsub.f32 %v4949_v1, %v6978_v0 }
  0xdd   : > { %7259 = vst [vmem:[#allocation42_spill] sm:$0xff] %v4964_v35  ;;  %v1072_v17 = vsel %vm989_vm6, %v4103_v46, 0.0  ;;  %2182 = vmatpush1.msra.mxu0 %v4964_v35  ;;  %v905_v31 = vadd.f32 %v841_v14, %v665_v4  ;;  %vm1458_vm9 = vcmp.eq.s32.totalorder %v4864_v51, %v4114_v37  ;;  %vm1693_vm10 = vcmp.eq.s32.totalorder %v4864_v51, %v4140_v21 }
  0xde   : > { %vm1924_vm7 = vcmp.eq.s32.totalorder %v4864_v51, %v4151_v60  ;;  %v1841_v23 = vadd.f32 %v1777_v6, %v1606_v19  ;;  %v2372_v24 = vand.u32 4294901760, %v2371_v30  ;;  %v1310_v16 = vsel %vm1227_vm4, %v4111_v41, 0.0 }
  0xdf   : > { %v1541_v2 = vsel %vm1458_vm9, %v4131_v55, 0.0  ;;  %v1136_v43 = vadd.f32 %v1072_v17, %v905_v31  ;;  %v1776_v0 = vsel %vm1693_vm10, %v4148_v52, 0.0  ;;  %v4990_v14 = vsub.f32 %v4705_v45, %v4717_v59 }
  0xe0   : > { %v4993_v4 = vadd.s32 24, %v7248_v15  ;;  %v4995_v11 = vadd.f32 %v2008_v18, %v1841_v23  ;;  %2373 = vmatprep.subr.mxu1 %v2372_v24  ;;  %v2007_v51 = vsel %vm1924_vm7, %v4154_v22, 0.0  ;;  %v5000_v6 = vsub.f32 %v4748_v20, %v4762_v57 }
  0xe1   : > { %7260 = vst [vmem:[#allocation43_spill] sm:$0xff] %v4990_v14  ;;  %v5004_v19 = vsub.f32 %v4789_v8, %v4803_v27  ;;  %v1374_v30 = vadd.f32 %v1310_v16, %v1136_v43  ;;  %v6981_v45 = vand.u32 4294901760, %v4990_v14  ;;  %v5036_v27 = vadd.s32 16, %v7248_v15 }
  0xe2   : > { %7261 = vst [vmem:[#allocation44_spill] sm:$0xff] %v5000_v6  ;;  %vm275_vm11 = vcmp.eq.s32.totalorder %v4993_v4, %v3861_v62  ;;  %vm517_vm12 = vcmp.eq.s32.totalorder %v4993_v4, %v3871_v63  ;;  %v5012_v18 = vand.u32 4294901760, %v4995_v11  ;;  %vm757_vm0 = vcmp.eq.s32.totalorder %v4993_v4, %v3953_v47 }
  0xe3   : > { %7262 = vst [vmem:[#allocation45_spill] sm:$0xff] %v5004_v19  ;;  %v358_v17 = vsel %vm275_vm11, %v3875_v3, 0.0  ;;  %v600_v20 = vsel %vm517_vm12, %v3907_v29, 0.0  ;;  %v1605_v8 = vadd.f32 %v1541_v2, %v1374_v30  ;;  %v2377_v31 = vsub.f32 %v4990_v14, %v6981_v45 }
  0xe4   : > { %7263 = vst [vmem:[#allocation46_spill] sm:$0xff] %v5012_v18  ;;  %v664_v23 = vadd.f32 %v600_v20, %v358_v17  ;;  %v840_v24 = vsel %vm757_vm0, %v3942_v39, 0.0  ;;  %2184 = vmatprep.subr.mxu0 %v5012_v18  ;;  %vm988_vm8 = vcmp.eq.s32.totalorder %v4993_v4, %v3956_v49  ;;  %vm1226_vm13 = vcmp.eq.s32.totalorder %v4993_v4, %v4015_v61 }
  0xe5   : > { %vm1457_vm14 = vcmp.eq.s32.totalorder %v4993_v4, %v4018_v36  ;;  %vm1692_vm15 = vcmp.eq.s32.totalorder %v4993_v4, %v4048_v53  ;;  %v1840_v16 = vadd.f32 %v1776_v0, %v1605_v8  ;;  %v2378_v2 = vand.u32 4294901760, %v2377_v31 }
  0xe6   : > { %v904_v43 = vadd.f32 %v840_v24, %v664_v23  ;;  %v1071_v30 = vsel %vm988_vm8, %v3959_v50, 0.0  ;;  %v1309_v17 = vsel %vm1226_vm13, %v3969_v25, 0.0  ;;  %v1540_v20 = vsel %vm1457_vm14, %v3988_v7, 0.0 }
  0xe7   : > { %v1775_v45 = vsel %vm1692_vm15, %v4009_v56, 0.0  ;;  %v5038_v57 = vadd.f32 %v2007_v51, %v1840_v16  ;;  %2379 = vmatpush1.msra.mxu1 %v2378_v2  ;;  %vm1923_vm1 = vcmp.eq.s32.totalorder %v4993_v4, %v4051_v58  ;;  %v6988_v0 = vand.u32 4294901760, %v5000_v6 }
  0xe8   : > { %v1135_v59 = vadd.f32 %v1071_v30, %v904_v43  ;;  %vm274_vm2 = vcmp.eq.s32.totalorder %v4993_v4, %v4023_v34  ;;  %vm516_vm3 = vcmp.eq.s32.totalorder %v4993_v4, %v4058_v54  ;;  %vm756_vm5 = vcmp.eq.s32.totalorder %v4993_v4, %v4078_v28 }
  0xe9   : > { %7264 = vst [vmem:[#allocation47_spill] sm:$0xff] %v5038_v57  ;;  %vm987_vm6 = vcmp.eq.s32.totalorder %v4993_v4, %v4094_v33  ;;  %v5052_v51 = vand.u32 4294901760, %v5038_v57  ;;  %v2383_v31 = vsub.f32 %v5000_v6, %v6988_v0  ;;  %v357_v23 = vsel %vm274_vm2, %v4035_v38, 0.0 }
  0xea   : > { %v1373_v8 = vadd.f32 %v1309_v17, %v1135_v59  ;;  %v2006_v24 = vsel %vm1923_vm1, %v4054_v13, 0.0  ;;  %v599_v16 = vsel %vm516_vm3, %v4068_v48, 0.0  ;;  %v839_v2 = vsel %vm756_vm5, %v4084_v5, 0.0 }
  0xeb   : > { %7265 = vst [vmem:[#allocation48_spill] sm:$0xff] %v5052_v51  ;;  %vm1225_vm4 = vcmp.eq.s32.totalorder %v4993_v4, %v4106_v32  ;;  %2186 = vmatpush1.msra.mxu0 %v5052_v51  ;;  %v2384_v30 = vand.u32 4294901760, %v2383_v31  ;;  %v663_v59 = vadd.f32 %v599_v16, %v357_v23  ;;  %v1070_v17 = vsel %vm987_vm6, %v4103_v46, 0.0 }
  0xec   : > { %v1604_v43 = vadd.f32 %v1540_v20, %v1373_v8  ;;  %v1308_v0 = vsel %vm1225_vm4, %v4111_v41, 0.0  ;;  %vm1456_vm9 = vcmp.eq.s32.totalorder %v4993_v4, %v4114_v37  ;;  %vm1691_vm10 = vcmp.eq.s32.totalorder %v4993_v4, %v4140_v21 }
  0xed   : > { %v6997_v6 = vand.u32 4294901760, %v5004_v19  ;;  %2385 = vmatprep.subr.mxu1 %v2384_v30  ;;  %v903_v1 = vadd.f32 %v839_v2, %v663_v59  ;;  %v1539_v57 = vsel %vm1456_vm9, %v4131_v55, 0.0  ;;  %vm1922_vm7 = vcmp.eq.s32.totalorder %v4993_v4, %v4151_v60 }
  0xee   : > { %v1839_v14 = vadd.f32 %v1775_v45, %v1604_v43  ;;  %v1774_v20 = vsel %vm1691_vm10, %v4148_v52, 0.0  ;;  %vm273_vm11 = vcmp.eq.s32.totalorder %v5036_v27, %v3861_v62  ;;  %vm515_vm12 = vcmp.eq.s32.totalorder %v5036_v27, %v3871_v63 }
  0xef   : > { %v2389_v8 = vsub.f32 %v5004_v19, %v6997_v6  ;;  %v1134_v31 = vadd.f32 %v1070_v17, %v903_v1  ;;  %v356_v23 = vsel %vm273_vm11, %v3875_v3, 0.0  ;;  %v598_v16 = vsel %vm515_vm12, %v3907_v29, 0.0 }
  0xf0   : > { %v5082_v45 = vadd.f32 %v2006_v24, %v1839_v14  ;;  %v662_v43 = vadd.f32 %v598_v16, %v356_v23  ;;  %vm755_vm0 = vcmp.eq.s32.totalorder %v5036_v27, %v3953_v47  ;;  %vm986_vm8 = vcmp.eq.s32.totalorder %v5036_v27, %v3956_v49 }
  0xf1   : > { %v2390_v2 = vand.u32 4294901760, %v2389_v8  ;;  %v1372_v59 = vadd.f32 %v1308_v0, %v1134_v31  ;;  %v838_v14 = vsel %vm755_vm0, %v3942_v39, 0.0  ;;  %v1069_v1 = vsel %vm986_vm8, %v3959_v50, 0.0 }
  0xf2   : > { %v5091_v30 = vand.u32 4294901760, %v5082_v45  ;;  %v902_v24 = vadd.f32 %v838_v14, %v662_v43  ;;  %vm1224_vm13 = vcmp.eq.s32.totalorder %v5036_v27, %v4015_v61  ;;  %vm1455_vm14 = vcmp.eq.s32.totalorder %v5036_v27, %v4018_v36 }
  0xf3   : > { %2391 = vmatpush1.msra.mxu1 %v2390_v2  ;;  %vm1690_vm15 = vcmp.eq.s32.totalorder %v5036_v27, %v4048_v53  ;;  %v1603_v17 = vadd.f32 %v1539_v57, %v1372_v59  ;;  %v2005_v0 = vsel %vm1922_vm7, %v4154_v22, 0.0  ;;  %v1307_v8 = vsel %vm1224_vm13, %v3969_v25, 0.0 }
  0xf4   : > { %7266 = vst [vmem:[#allocation49_spill] sm:$0xff] %v5091_v30  ;;  %2188 = vmatprep.subr.mxu0 %v5091_v30  ;;  %v1538_v31 = vsel %vm1455_vm14, %v3988_v7, 0.0  ;;  %v1133_v23 = vadd.f32 %v1069_v1, %v902_v24  ;;  %v1773_v16 = vsel %vm1690_vm15, %v4009_v56, 0.0  ;;  %v5111_v2 = vsub.f32 %v4833_v44, %v4850_v9 }
  0xf5   : > { %vm272_vm1 = vcmp.eq.s32.totalorder %v5036_v27, %v4023_v34  ;;  %v1838_v57 = vadd.f32 %v1774_v20, %v1603_v17  ;;  %vm1921_vm2 = vcmp.eq.s32.totalorder %v5036_v27, %v4051_v58  ;;  %vm514_vm3 = vcmp.eq.s32.totalorder %v5036_v27, %v4058_v54 }
  0xf6   : > { %7267 = vst [vmem:[#allocation50_spill] sm:$0xff] %v5111_v2  ;;  %v355_v4 = vsel %vm272_vm1, %v4035_v38, 0.0  ;;  %v1371_v43 = vadd.f32 %v1307_v8, %v1133_v23  ;;  %v6996_v59 = vand.u32 4294901760, %v5111_v2  ;;  %v597_v14 = vsel %vm514_vm3, %v4068_v48, 0.0 }
  0xf7   : > { %vm754_vm5 = vcmp.eq.s32.totalorder %v5036_v27, %v4078_v28  ;;  %v5124_v44 = vadd.f32 %v2005_v0, %v1838_v57  ;;  %v661_v1 = vadd.f32 %v597_v14, %v355_v4  ;;  %vm985_vm6 = vcmp.eq.s32.totalorder %v5036_v27, %v4094_v33 }
  0xf8   : > { %v837_v20 = vsel %vm754_vm5, %v4084_v5, 0.0  ;;  %v1602_v24 = vadd.f32 %v1538_v31, %v1371_v43  ;;  %v2395_v17 = vsub.f32 %v5111_v2, %v6996_v59  ;;  %v1068_v8 = vsel %vm985_vm6, %v4103_v46, 0.0 }
  0xf9   : > { %vm1223_vm4 = vcmp.eq.s32.totalorder %v5036_v27, %v4106_v32  ;;  %v5136_v23 = vand.u32 4294901760, %v5124_v44  ;;  %v2004_v0 = vsel %vm1921_vm2, %v4054_v13, 0.0  ;;  %v901_v57 = vadd.f32 %v837_v20, %v661_v1 }
  0xfa   : > { %vm1454_vm9 = vcmp.eq.s32.totalorder %v5036_v27, %v4114_v37  ;;  %v1837_v31 = vadd.f32 %v1773_v16, %v1602_v24  ;;  %v2396_v4 = vand.u32 4294901760, %v2395_v17  ;;  %v1306_v43 = vsel %vm1223_vm4, %v4111_v41, 0.0 }
  0xfb   : > { %7268 = vst [vmem:[#allocation51_spill] sm:$0xff] %v5136_v23  ;;  %vm1689_vm10 = vcmp.eq.s32.totalorder %v5036_v27, %v4140_v21  ;;  %2190 = vmatpush1.msra.mxu0 %v5136_v23  ;;  %v1132_v14 = vadd.f32 %v1068_v8, %v901_v57  ;;  %v1537_v59 = vsel %vm1454_vm9, %v4131_v55, 0.0  ;;  %vm1920_vm7 = vcmp.eq.s32.totalorder %v5036_v27, %v4151_v60 }
  0xfc   : > { %v5153_v1 = vsub.f32 %v4880_v42, %v4891_v26  ;;  %v5155_v20 = vadd.f32 %v2004_v0, %v1837_v31  ;;  %2397 = vmatprep.subr.mxu1 %v2396_v4  ;;  %v1772_v16 = vsel %vm1689_vm10, %v4148_v52, 0.0  ;;  %v2003_v24 = vsel %vm1920_vm7, %v4154_v22, 0.0 }
  0xfd   : > { %v194_v17 = vadd.s32 8, %v7248_v15  ;;  %v1370_v6 = vadd.f32 %v1306_v43, %v1132_v14  ;;  %v5163_v57 = vsub.f32 %v4920_v10, %v4928_v12  ;;  %v5167_v27 = vsub.f32 %v4953_v40, %v4964_v35 }
  0xfe   : > { %7269 = vst [vmem:[#allocation52_spill] sm:$0xff] %v5153_v1  ;;  %v6998_v8 = vand.u32 4294901760, %v5153_v1  ;;  %v5170_v42 = vand.u32 4294901760, %v5155_v20  ;;  %vm269_vm14 = vcmp.eq.s32.totalorder %v7248_v15, %v3861_v62 }
  0xff   : > { %7270 = vst [vmem:[#allocation53_spill] sm:$0xff] %v5163_v57  ;;  %7271 = vst [vmem:[#allocation54_spill] sm:$0xff] %v5167_v27  ;;  %vm271_vm11 = vcmp.eq.s32.totalorder %v194_v17, %v3861_v62  ;;  %vm513_vm12 = vcmp.eq.s32.totalorder %v194_v17, %v3871_v63  ;;  %vm753_vm0 = vcmp.eq.s32.totalorder %v194_v17, %v3953_v47  ;;  %v7017_v19 = vand.u32 4294901760, %v5167_v27 }
 0x100   : > { %7272 = vst [vmem:[#allocation55_spill] sm:$0xff] %v5170_v42  ;;  %v1601_v0 = vadd.f32 %v1537_v59, %v1370_v6  ;;  %v2401_v31 = vsub.f32 %v5153_v1, %v6998_v8  ;;  %v354_v10 = vsel %vm271_vm11, %v3875_v3, 0.0  ;;  %v596_v4 = vsel %vm513_vm12, %v3907_v29, 0.0  ;;  %2192 = vmatprep.subr.mxu0 %v5170_v42 }
 0x101   : > { %v660_v40 = vadd.f32 %v596_v4, %v354_v10  ;;  %v836_v43 = vsel %vm753_vm0, %v3942_v39, 0.0  ;;  %vm984_vm8 = vcmp.eq.s32.totalorder %v194_v17, %v3956_v49  ;;  %vm1222_vm13 = vcmp.eq.s32.totalorder %v194_v17, %v4015_v61 }
 0x102   : > { %v1836_v6 = vadd.f32 %v1772_v16, %v1601_v0  ;;  %v2402_v59 = vand.u32 4294901760, %v2401_v31  ;;  %v1067_v14 = vsel %vm984_vm8, %v3959_v50, 0.0  ;;  %v1305_v8 = vsel %vm1222_vm13, %v3969_v25, 0.0 }
 0x103   : > { %v900_v35 = vadd.f32 %v836_v43, %v660_v40  ;;  %vm1453_vm15 = vcmp.eq.s32.totalorder %v194_v17, %v4018_v36  ;;  %vm1688_vm1 = vcmp.eq.s32.totalorder %v194_v17, %v4048_v53  ;;  %vm1919_vm2 = vcmp.eq.s32.totalorder %v194_v17, %v4051_v58 }
 0x104   : > { %v5191_v10 = vadd.f32 %v2003_v24, %v1836_v6  ;;  %2403 = vmatpush1.msra.mxu1 %v2402_v59  ;;  %v1536_v4 = vsel %vm1453_vm15, %v3988_v7, 0.0  ;;  %v1771_v12 = vsel %vm1688_vm1, %v4009_v56, 0.0  ;;  %v2002_v16 = vsel %vm1919_vm2, %v4054_v13, 0.0 }
 0x105   : > { %v1131_v0 = vadd.f32 %v1067_v14, %v900_v35  ;;  %v7007_v31 = vand.u32 4294901760, %v5163_v57  ;;  %vm270_vm3 = vcmp.eq.s32.totalorder %v194_v17, %v4023_v34  ;;  %vm512_vm5 = vcmp.eq.s32.totalorder %v194_v17, %v4058_v54 }
 0x106   : > { %v5200_v40 = vand.u32 4294901760, %v5191_v10  ;;  %v353_v24 = vsel %vm270_vm3, %v4035_v38, 0.0  ;;  %v595_v43 = vsel %vm512_vm5, %v4068_v48, 0.0  ;;  %vm752_vm6 = vcmp.eq.s32.totalorder %v194_v17, %v4078_v28 }
 0x107   : > { %v1369_v6 = vadd.f32 %v1305_v8, %v1131_v0  ;;  %v2407_v35 = vsub.f32 %v5163_v57, %v7007_v31  ;;  %v659_v59 = vadd.f32 %v595_v43, %v353_v24  ;;  %v835_v14 = vsel %vm752_vm6, %v4084_v5, 0.0 }
 0x108   : > { %7273 = vst [vmem:[#allocation56_spill] sm:$0xff] %v5200_v40  ;;  %2194 = vmatpush1.msra.mxu0 %v5200_v40  ;;  %vm983_vm4 = vcmp.eq.s32.totalorder %v194_v17, %v4094_v33  ;;  %vm1221_vm9 = vcmp.eq.s32.totalorder %v194_v17, %v4106_v32  ;;  %vm1452_vm10 = vcmp.eq.s32.totalorder %v194_v17, %v4114_v37 }
 0x109   : > { %vm1687_vm7 = vcmp.eq.s32.totalorder %v194_v17, %v4140_v21  ;;  %v1600_v26 = vadd.f32 %v1536_v4, %v1369_v6  ;;  %v2408_v9 = vand.u32 4294901760, %v2407_v35  ;;  %v899_v8 = vadd.f32 %v835_v14, %v659_v59 }
 0x10a   : > { %v1066_v0 = vsel %vm983_vm4, %v4103_v46, 0.0  ;;  %v1304_v31 = vsel %vm1221_vm9, %v4111_v41, 0.0  ;;  %v1535_v24 = vsel %vm1452_vm10, %v4131_v55, 0.0  ;;  %v1770_v43 = vsel %vm1687_vm7, %v4148_v52, 0.0 }
 0x10b   : > { %vm1918_vm11 = vcmp.eq.s32.totalorder %v194_v17, %v4151_v60  ;;  %v1835_v57 = vadd.f32 %v1771_v12, %v1600_v26  ;;  %2409 = vmatprep.subr.mxu1 %v2408_v9  ;;  %v1130_v1 = vadd.f32 %v1066_v0, %v899_v8  ;;  %v352_v4 = vsel %vm269_vm14, %v3875_v3, 0.0 }
 0x10c   : > { %v2001_v2 = vsel %vm1918_vm11, %v4154_v22, 0.0  ;;  %vm511_vm12 = vcmp.eq.s32.totalorder %v7248_v15, %v3871_v63  ;;  %vm751_vm0 = vcmp.eq.s32.totalorder %v7248_v15, %v3953_v47  ;;  %vm982_vm8 = vcmp.eq.s32.totalorder %v7248_v15, %v3956_v49 }
 0x10d   : > { %v5231_v26 = vadd.f32 %v2002_v16, %v1835_v57  ;;  %v1368_v12 = vadd.f32 %v1304_v31, %v1130_v1  ;;  %v2413_v9 = vsub.f32 %v5167_v27, %v7017_v19  ;;  %v594_v17 = vsel %vm511_vm12, %v3907_v29, 0.0 }
 0x10e   : > { %v658_v6 = vadd.f32 %v594_v17, %v352_v4  ;;  %v834_v35 = vsel %vm751_vm0, %v3942_v39, 0.0  ;;  %v1065_v59 = vsel %vm982_vm8, %v3959_v50, 0.0  ;;  %vm1220_vm13 = vcmp.eq.s32.totalorder %v7248_v15, %v4015_v61 }
 0x10f   : > { %v5242_v14 = vand.u32 4294901760, %v5231_v26  ;;  %v1599_v57 = vadd.f32 %v1535_v24, %v1368_v12  ;;  %v2414_v16 = vand.u32 4294901760, %v2413_v9  ;;  %v1303_v1 = vsel %vm1220_vm13, %v3969_v25, 0.0 }
 0x110   : > { %v898_v31 = vadd.f32 %v834_v35, %v658_v6  ;;  %vm1451_vm14 = vcmp.eq.s32.totalorder %v7248_v15, %v4018_v36  ;;  %vm1686_vm15 = vcmp.eq.s32.totalorder %v7248_v15, %v4048_v53  ;;  %vm1917_vm1 = vcmp.eq.s32.totalorder %v7248_v15, %v4051_v58 }
 0x111   : > { %7274 = vst [vmem:[#allocation57_spill] sm:$0xff] %v5242_v14  ;;  %2196 = vmatprep.subr.mxu0 %v5242_v14  ;;  %v1834_v8 = vadd.f32 %v1770_v43, %v1599_v57  ;;  %2415 = vmatpush1.msra.mxu1 %v2414_v16  ;;  %v1534_v0 = vsel %vm1451_vm14, %v3988_v7, 0.0  ;;  %v1769_v24 = vsel %vm1686_vm15, %v4009_v56, 0.0  ;;  %v2000_v4 = vsel %vm1917_vm1, %v4054_v13, 0.0 }
 0x112   : > { %v1129_v12 = vadd.f32 %v1065_v59, %v898_v31  ;;  %v5257_v9 = vsub.f32 %v4995_v11, %v5012_v18  ;;  %vm268_vm2 = vcmp.eq.s32.totalorder %v7248_v15, %v4023_v34  ;;  %vm510_vm3 = vcmp.eq.s32.totalorder %v7248_v15, %v4058_v54 }
 0x113   : > { %v5263_v17 = vadd.f32 %v2001_v2, %v1834_v8  ;;  %v351_v43 = vsel %vm268_vm2, %v4035_v38, 0.0  ;;  %v593_v6 = vsel %vm510_vm3, %v4068_v48, 0.0  ;;  %vm750_vm5 = vcmp.eq.s32.totalorder %v7248_v15, %v4078_v28 }
 0x114   : > { %7275 = vst [vmem:[#allocation58_spill] sm:$0xff] %v5257_v9  ;;  %v1367_v35 = vadd.f32 %v1303_v1, %v1129_v12  ;;  %v7016_v59 = vand.u32 4294901760, %v5257_v9  ;;  %v657_v11 = vadd.f32 %v593_v6, %v351_v43  ;;  %v833_v57 = vsel %vm750_vm5, %v4084_v5, 0.0 }
 0x115   : > { %v5272_v16 = vand.u32 4294901760, %v5263_v17  ;;  %vm981_vm6 = vcmp.eq.s32.totalorder %v7248_v15, %v4094_v33  ;;  %vm1219_vm4 = vcmp.eq.s32.totalorder %v7248_v15, %v4106_v32  ;;  %vm1450_vm9 = vcmp.eq.s32.totalorder %v7248_v15, %v4114_v37 }
 0x116   : > { %v1598_v2 = vadd.f32 %v1534_v0, %v1367_v35  ;;  %v2419_v1 = vsub.f32 %v5257_v9, %v7016_v59  ;;  %v897_v31 = vadd.f32 %v833_v57, %v657_v11  ;;  %v1064_v8 = vsel %vm981_vm6, %v4103_v46, 0.0  ;;  %v7277_v57 = vld [vmem:[#allocation47_spill] sm:$0xff] }
 0x117   : > { %7276 = vst [vmem:[#allocation59_spill] sm:$0xff] %v5272_v16  ;;  %2198 = vmatpush1.msra.mxu0 %v5272_v16  ;;  %v1302_v12 = vsel %vm1219_vm4, %v4111_v41, 0.0  ;;  %v1533_v43 = vsel %vm1450_vm9, %v4131_v55, 0.0  ;;  %vm1685_vm10 = vcmp.eq.s32.totalorder %v7248_v15, %v4140_v21  ;;  %vm1916_vm7 = vcmp.eq.s32.totalorder %v7248_v15, %v4151_v60 }
 0x118   : > { %v1833_v0 = vadd.f32 %v1769_v24, %v1598_v2  ;;  %v2420_v6 = vand.u32 4294901760, %v2419_v1  ;;  %v1128_v35 = vadd.f32 %v1064_v8, %v897_v31  ;;  %v1768_v59 = vsel %vm1685_vm10, %v4148_v52, 0.0 }
 0x119   : > { %v1999_v11 = vsel %vm1916_vm7, %v4154_v22, 0.0  ;;  %v5295_v19 = vsub.f32 %v7277_v57, %v5052_v51  ;;  %v5298_v18 = vadd.s32 248, %v7248_v15  ;;  %v5302_v9 = vsub.f32 %v5082_v45, %v5091_v30 }
 0x11a   : > { %v5304_v27 = vadd.f32 %v2000_v4, %v1833_v0  ;;  %2421 = vmatprep.subr.mxu1 %v2420_v6  ;;  %v1366_v24 = vadd.f32 %v1302_v12, %v1128_v35  ;;  %v5308_v2 = vsub.f32 %v5124_v44, %v5136_v23  ;;  %v5311_v1 = vadd.s32 240, %v7248_v15 }
 0x11b   : > { %7278 = vst [vmem:[#allocation47_spill] sm:$0xff] %v5295_v19  ;;  %7279 = vst [vmem:[#allocation60_spill] sm:$0xff] %v5302_v9  ;;  %v7024_v31 = vand.u32 4294901760, %v5295_v19  ;;  %vm331_vm11 = vcmp.eq.s32.totalorder %v5298_v18, %v3861_v62  ;;  %vm573_vm12 = vcmp.eq.s32.totalorder %v5298_v18, %v3871_v63  ;;  %vm813_vm0 = vcmp.eq.s32.totalorder %v5298_v18, %v3953_v47 }
 0x11c   : > { %7280 = vst [vmem:[#allocation61_spill] sm:$0xff] %v5308_v2  ;;  %v5321_v45 = vand.u32 4294901760, %v5304_v27  ;;  %v1597_v4 = vadd.f32 %v1533_v43, %v1366_v24  ;;  %v414_v44 = vsel %vm331_vm11, %v3875_v3, 0.0  ;;  %v656_v8 = vsel %vm573_vm12, %v3907_v29, 0.0 }
 0x11d   : > { %v2425_v12 = vsub.f32 %v5295_v19, %v7024_v31  ;;  %v720_v0 = vadd.f32 %v656_v8, %v414_v44  ;;  %v896_v6 = vsel %vm813_vm0, %v3942_v39, 0.0  ;;  %vm1044_vm8 = vcmp.eq.s32.totalorder %v5298_v18, %v3956_v49 }
 0x11e   : > { %7281 = vst [vmem:[#allocation62_spill] sm:$0xff] %v5321_v45  ;;  %2200 = vmatprep.subr.mxu0 %v5321_v45  ;;  %v1832_v35 = vadd.f32 %v1768_v59, %v1597_v4  ;;  %v1127_v57 = vsel %vm1044_vm8, %v3959_v50, 0.0  ;;  %vm1282_vm13 = vcmp.eq.s32.totalorder %v5298_v18, %v4015_v61  ;;  %vm1513_vm14 = vcmp.eq.s32.totalorder %v5298_v18, %v4018_v36 }
 0x11f   : > { %v2426_v43 = vand.u32 4294901760, %v2425_v12  ;;  %v960_v24 = vadd.f32 %v896_v6, %v720_v0  ;;  %v1365_v44 = vsel %vm1282_vm13, %v3969_v25, 0.0  ;;  %v1596_v8 = vsel %vm1513_vm14, %v3988_v7, 0.0 }
 0x120   : > { %v5339_v31 = vadd.f32 %v1999_v11, %v1832_v35  ;;  %vm1748_vm15 = vcmp.eq.s32.totalorder %v5298_v18, %v4048_v53  ;;  %vm1979_vm1 = vcmp.eq.s32.totalorder %v5298_v18, %v4051_v58  ;;  %v7027_v59 = vand.u32 4294901760, %v5302_v9 }
 0x121   : > { %2427 = vmatpush1.msra.mxu1 %v2426_v43  ;;  %v1191_v4 = vadd.f32 %v1127_v57, %v960_v24  ;;  %v1831_v23 = vsel %vm1748_vm15, %v4009_v56, 0.0  ;;  %v2062_v12 = vsel %vm1979_vm1, %v4054_v13, 0.0  ;;  %vm330_vm2 = vcmp.eq.s32.totalorder %v5298_v18, %v4023_v34 }
 0x122   : > { %v5351_v11 = vand.u32 4294901760, %v5339_v31  ;;  %v2431_v0 = vsub.f32 %v5302_v9, %v7027_v59  ;;  %v413_v6 = vsel %vm330_vm2, %v4035_v38, 0.0  ;;  %vm572_vm3 = vcmp.eq.s32.totalorder %v5298_v18, %v4058_v54 }
 0x123   : > { %v1429_v35 = vadd.f32 %v1365_v44, %v1191_v4  ;;  %v655_v57 = vsel %vm572_vm3, %v4068_v48, 0.0  ;;  %vm812_vm5 = vcmp.eq.s32.totalorder %v5298_v18, %v4078_v28  ;;  %vm1043_vm6 = vcmp.eq.s32.totalorder %v5298_v18, %v4094_v33 }
 0x124   : > { %7282 = vst [vmem:[#allocation63_spill] sm:$0xff] %v5351_v11  ;;  %2202 = vmatpush1.msra.mxu0 %v5351_v11  ;;  %v2432_v43 = vand.u32 4294901760, %v2431_v0  ;;  %v719_v24 = vadd.f32 %v655_v57, %v413_v6  ;;  %v895_v59 = vsel %vm812_vm5, %v4084_v5, 0.0  ;;  %v1126_v30 = vsel %vm1043_vm6, %v4103_v46, 0.0 }
 0x125   : > { %v1660_v51 = vadd.f32 %v1596_v8, %v1429_v35  ;;  %vm1281_vm4 = vcmp.eq.s32.totalorder %v5298_v18, %v4106_v32  ;;  %vm1512_vm9 = vcmp.eq.s32.totalorder %v5298_v18, %v4114_v37  ;;  %vm1747_vm10 = vcmp.eq.s32.totalorder %v5298_v18, %v4140_v21 }
 0x126   : > { %2433 = vmatprep.subr.mxu1 %v2432_v43  ;;  %v959_v44 = vadd.f32 %v895_v59, %v719_v24  ;;  %v1364_v4 = vsel %vm1281_vm4, %v4111_v41, 0.0  ;;  %v1595_v0 = vsel %vm1512_vm9, %v4131_v55, 0.0  ;;  %v1830_v6 = vsel %vm1747_vm10, %v4148_v52, 0.0 }
 0x127   : > { %v1895_v57 = vadd.f32 %v1831_v23, %v1660_v51  ;;  %vm1978_vm7 = vcmp.eq.s32.totalorder %v5298_v18, %v4151_v60  ;;  %v7034_v8 = vand.u32 4294901760, %v5308_v2  ;;  %vm329_vm11 = vcmp.eq.s32.totalorder %v5311_v1, %v3861_v62 }
 0x128   : > { %v1190_v35 = vadd.f32 %v1126_v30, %v959_v44  ;;  %v2061_v9 = vsel %vm1978_vm7, %v4154_v22, 0.0  ;;  %v412_v59 = vsel %vm329_vm11, %v3875_v3, 0.0  ;;  %vm571_vm12 = vcmp.eq.s32.totalorder %v5311_v1, %v3871_v63 }
 0x129   : > { %v5385_v43 = vadd.f32 %v2062_v12, %v1895_v57  ;;  %v2437_v51 = vsub.f32 %v5308_v2, %v7034_v8  ;;  %v654_v18 = vsel %vm571_vm12, %v3907_v29, 0.0  ;;  %vm811_vm0 = vcmp.eq.s32.totalorder %v5311_v1, %v3953_v47 }
 0x12a   : > { %v1428_v23 = vadd.f32 %v1364_v4, %v1190_v35  ;;  %v718_v30 = vadd.f32 %v654_v18, %v412_v59  ;;  %v894_v24 = vsel %vm811_vm0, %v3942_v39, 0.0  ;;  %vm1042_vm8 = vcmp.eq.s32.totalorder %v5311_v1, %v3956_v49 }
 0x12b   : > { %v5397_v44 = vand.u32 4294901760, %v5385_v43  ;;  %v2438_v12 = vand.u32 4294901760, %v2437_v51  ;;  %v1125_v57 = vsel %vm1042_vm8, %v3959_v50, 0.0  ;;  %vm1280_vm13 = vcmp.eq.s32.totalorder %v5311_v1, %v4015_v61 }
 0x12c   : > { %v1659_v8 = vadd.f32 %v1595_v0, %v1428_v23  ;;  %v958_v2 = vadd.f32 %v894_v24, %v718_v30  ;;  %v1363_v19 = vsel %vm1280_vm13, %v3969_v25, 0.0  ;;  %vm1511_vm14 = vcmp.eq.s32.totalorder %v5311_v1, %v4018_v36 }
 0x12d   : > { %7283 = vst [vmem:[#allocation64_spill] sm:$0xff] %v5397_v44  ;;  %2204 = vmatprep.subr.mxu0 %v5397_v44  ;;  %2439 = vmatpush1.msra.mxu1 %v2438_v12  ;;  %v1594_v4 = vsel %vm1511_vm14, %v3988_v7, 0.0  ;;  %vm1746_vm15 = vcmp.eq.s32.totalorder %v5311_v1, %v4048_v53  ;;  %vm1977_vm1 = vcmp.eq.s32.totalorder %v5311_v1, %v4051_v58 }
 0x12e   : > { %v5413_v0 = vsub.f32 %v5155_v20, %v5170_v42  ;;  %v1894_v35 = vadd.f32 %v1830_v6, %v1659_v8  ;;  %v1189_v59 = vadd.f32 %v1125_v57, %v958_v2  ;;  %v1829_v51 = vsel %vm1746_vm15, %v4009_v56, 0.0 }
 0x12f   : > { %v2060_v18 = vsel %vm1977_vm1, %v4054_v13, 0.0  ;;  %vm328_vm2 = vcmp.eq.s32.totalorder %v5311_v1, %v4023_v34  ;;  %vm570_vm3 = vcmp.eq.s32.totalorder %v5311_v1, %v4058_v54  ;;  %vm810_vm5 = vcmp.eq.s32.totalorder %v5311_v1, %v4078_v28 }
 0x130   : > { %7284 = vst [vmem:[#allocation65_spill] sm:$0xff] %v5413_v0  ;;  %v7041_v23 = vand.u32 4294901760, %v5413_v0  ;;  %v5424_v30 = vadd.f32 %v2061_v9, %v1894_v35  ;;  %v1427_v20 = vadd.f32 %v1363_v19, %v1189_v59  ;;  %v411_v2 = vsel %vm328_vm2, %v4035_v38, 0.0 }
 0x131   : > { %v653_v6 = vsel %vm570_vm3, %v4068_v48, 0.0  ;;  %v893_v12 = vsel %vm810_vm5, %v4084_v5, 0.0  ;;  %vm1041_vm6 = vcmp.eq.s32.totalorder %v5311_v1, %v4094_v33  ;;  %vm1279_vm4 = vcmp.eq.s32.totalorder %v5311_v1, %v4106_v32 }
 0x132   : > { %v2443_v8 = vsub.f32 %v5413_v0, %v7041_v23  ;;  %v717_v24 = vadd.f32 %v653_v6, %v411_v2  ;;  %v5435_v57 = vand.u32 4294901760, %v5424_v30  ;;  %v1658_v9 = vadd.f32 %v1594_v4, %v1427_v20 }
 0x133   : > { %v1124_v19 = vsel %vm1041_vm6, %v4103_v46, 0.0  ;;  %v1362_v42 = vsel %vm1279_vm4, %v4111_v41, 0.0  ;;  %vm1510_vm9 = vcmp.eq.s32.totalorder %v5311_v1, %v4114_v37  ;;  %vm1745_vm10 = vcmp.eq.s32.totalorder %v5311_v1, %v4140_v21 }
 0x134   : > { %7285 = vst [vmem:[#allocation66_spill] sm:$0xff] %v5435_v57  ;;  %v2444_v35 = vand.u32 4294901760, %v2443_v8  ;;  %v957_v59 = vadd.f32 %v893_v12, %v717_v24  ;;  %2206 = vmatpush2.msra.mxu0 %v5435_v57  ;;  %v1893_v2 = vadd.f32 %v1829_v51, %v1658_v9  ;;  %v1593_v6 = vsel %vm1510_vm9, %v4131_v55, 0.0 }
 0x135   : > { %vm1976_vm7 = vcmp.eq.s32.totalorder %v5311_v1, %v4151_v60  ;;  %v1828_v20 = vsel %vm1745_vm10, %v4148_v52, 0.0  ;;  %v5453_v24 = vsub.f32 %v5191_v10, %v5200_v40  ;;  %v222_v51 = vadd.s32 232, %v7248_v15 }
 0x136   : > { %2445 = vmatprep.subr.mxu1 %v2444_v35  ;;  %v1188_v4 = vadd.f32 %v1124_v19, %v957_v59  ;;  %v2059_v8 = vsel %vm1976_vm7, %v4154_v22, 0.0  ;;  %v5455_v12 = vadd.f32 %v2060_v18, %v1893_v2  ;;  %v5460_v9 = vsub.f32 %v5231_v26, %v5242_v14 }
 0x137   : > { %7286 = vst [vmem:[#allocation67_spill] sm:$0xff] %v5453_v24  ;;  %v5464_v1 = vsub.f32 %v5263_v17, %v5272_v16  ;;  %v7044_v35 = vand.u32 4294901760, %v5453_v24  ;;  %v5468_v59 = vadd.s32 224, %v7248_v15  ;;  %v5472_v10 = vsub.f32 %v5304_v27, %v5321_v45 }
 0x138   : > { %7287 = vst [vmem:[#allocation68_spill] sm:$0xff] %v5460_v9  ;;  %v1426_v19 = vadd.f32 %v1362_v42, %v1188_v4  ;;  %v5475_v18 = vand.u32 4294901760, %v5455_v12  ;;  %vm327_vm11 = vcmp.eq.s32.totalorder %v222_v51, %v3861_v62  ;;  %vm569_vm12 = vcmp.eq.s32.totalorder %v222_v51, %v3871_v63 }
 0x139   : > { %7288 = vst [vmem:[#allocation69_spill] sm:$0xff] %v5464_v1  ;;  %7289 = vst [vmem:[#allocation70_spill] sm:$0xff] %v5472_v10  ;;  %vm809_vm0 = vcmp.eq.s32.totalorder %v222_v51, %v3953_v47  ;;  %v2449_v42 = vsub.f32 %v5453_v24, %v7044_v35  ;;  %v410_v17 = vsel %vm327_vm11, %v3875_v3, 0.0  ;;  %v652_v2 = vsel %vm569_vm12, %v3907_v29, 0.0 }
 0x13a   : > { %7290 = vst [vmem:[#allocation71_spill] sm:$0xff] %v5475_v18  ;;  %v1657_v26 = vadd.f32 %v1593_v6, %v1426_v19  ;;  %2208 = vmatprep.subr.mxu0 %v5475_v18  ;;  %v716_v27 = vadd.f32 %v652_v2, %v410_v17  ;;  %v892_v4 = vsel %vm809_vm0, %v3942_v39, 0.0  ;;  %vm1040_vm8 = vcmp.eq.s32.totalorder %v222_v51, %v3956_v49 }
 0x13b   : > { %vm1278_vm13 = vcmp.eq.s32.totalorder %v222_v51, %v4015_v61  ;;  %v2450_v45 = vand.u32 4294901760, %v2449_v42  ;;  %v1123_v6 = vsel %vm1040_vm8, %v3959_v50, 0.0  ;;  %vm1509_vm14 = vcmp.eq.s32.totalorder %v222_v51, %v4018_v36 }
 0x13c   : > { %v1892_v23 = vadd.f32 %v1828_v20, %v1657_v26  ;;  %v1361_v19 = vsel %vm1278_vm13, %v3969_v25, 0.0  ;;  %v956_v35 = vadd.f32 %v892_v4, %v716_v27  ;;  %vm1744_vm15 = vcmp.eq.s32.totalorder %v222_v51, %v4048_v53 }
 0x13d   : > { %vm1975_vm1 = vcmp.eq.s32.totalorder %v222_v51, %v4051_v58  ;;  %2451 = vmatpush1.msra.mxu1 %v2450_v45  ;;  %v1592_v2 = vsel %vm1509_vm14, %v3988_v7, 0.0  ;;  %v1827_v16 = vsel %vm1744_vm15, %v4009_v56, 0.0  ;;  %v7051_v42 = vand.u32 4294901760, %v5460_v9 }
 0x13e   : > { %v5494_v17 = vadd.f32 %v2059_v8, %v1892_v23  ;;  %v2058_v20 = vsel %vm1975_vm1, %v4054_v13, 0.0  ;;  %v1187_v26 = vadd.f32 %v1123_v6, %v956_v35  ;;  %vm326_vm2 = vcmp.eq.s32.totalorder %v222_v51, %v4023_v34 }
 0x13f   : > { %vm568_vm3 = vcmp.eq.s32.totalorder %v222_v51, %v4058_v54  ;;  %v409_v23 = vsel %vm326_vm2, %v4035_v38, 0.0  ;;  %vm808_vm5 = vcmp.eq.s32.totalorder %v222_v51, %v4078_v28  ;;  %v2455_v35 = vsub.f32 %v5460_v9, %v7051_v42 }
 0x140   : > { %7291 = vst [vmem:[#allocation72_spill] sm:$0xff] %v5494_v17  ;;  %v5503_v27 = vand.u32 4294901760, %v5494_v17  ;;  %v651_v45 = vsel %vm568_vm3, %v4068_v48, 0.0  ;;  %v1425_v8 = vadd.f32 %v1361_v19, %v1187_v26  ;;  %v891_v6 = vsel %vm808_vm5, %v4084_v5, 0.0 }
 0x141   : > { %v715_v4 = vadd.f32 %v651_v45, %v409_v23  ;;  %vm1039_vm6 = vcmp.eq.s32.totalorder %v222_v51, %v4094_v33  ;;  %vm1277_vm4 = vcmp.eq.s32.totalorder %v222_v51, %v4106_v32  ;;  %vm1508_vm9 = vcmp.eq.s32.totalorder %v222_v51, %v4114_v37 }
 0x142   : > { %7292 = vst [vmem:[#allocation73_spill] sm:$0xff] %v5503_v27  ;;  %2210 = vmatpush2.msra.mxu0 %v5503_v27  ;;  %vm1743_vm10 = vcmp.eq.s32.totalorder %v222_v51, %v4140_v21  ;;  %v1656_v14 = vadd.f32 %v1592_v2, %v1425_v8  ;;  %v2456_v40 = vand.u32 4294901760, %v2455_v35  ;;  %v1122_v26 = vsel %vm1039_vm6, %v4103_v46, 0.0 }
 0x143   : > { %v955_v19 = vadd.f32 %v891_v6, %v715_v4  ;;  %v1360_v42 = vsel %vm1277_vm4, %v4111_v41, 0.0  ;;  %v1591_v23 = vsel %vm1508_vm9, %v4131_v55, 0.0  ;;  %v1826_v45 = vsel %vm1743_vm10, %v4148_v52, 0.0 }
 0x144   : > { %vm1974_vm7 = vcmp.eq.s32.totalorder %v222_v51, %v4151_v60  ;;  %v1891_v9 = vadd.f32 %v1827_v16, %v1656_v14  ;;  %2457 = vmatprep.subr.mxu1 %v2456_v40  ;;  %v7059_v17 = vand.u32 4294901760, %v5464_v1  ;;  %vm325_vm11 = vcmp.eq.s32.totalorder %v5468_v59, %v3861_v62 }
 0x145   : > { %v1186_v24 = vadd.f32 %v1122_v26, %v955_v19  ;;  %v2057_v0 = vsel %vm1974_vm7, %v4154_v22, 0.0  ;;  %vm567_vm12 = vcmp.eq.s32.totalorder %v5468_v59, %v3871_v63  ;;  %vm807_vm0 = vcmp.eq.s32.totalorder %v5468_v59, %v3953_v47 }
 0x146   : > { %vm1038_vm8 = vcmp.eq.s32.totalorder %v5468_v59, %v3956_v49  ;;  %v5532_v51 = vadd.f32 %v2058_v20, %v1891_v9  ;;  %v2461_v14 = vsub.f32 %v5464_v1, %v7059_v17  ;;  %v408_v16 = vsel %vm325_vm11, %v3875_v3, 0.0 }
 0x147   : > { %v1424_v40 = vadd.f32 %v1360_v42, %v1186_v24  ;;  %v650_v2 = vsel %vm567_vm12, %v3907_v29, 0.0  ;;  %v890_v8 = vsel %vm807_vm0, %v3942_v39, 0.0  ;;  %v1121_v35 = vsel %vm1038_vm8, %v3959_v50, 0.0 }
 0x148   : > { %vm1276_vm13 = vcmp.eq.s32.totalorder %v5468_v59, %v4015_v61  ;;  %v5544_v4 = vand.u32 4294901760, %v5532_v51  ;;  %v2462_v24 = vand.u32 4294901760, %v2461_v14  ;;  %v714_v20 = vadd.f32 %v650_v2, %v408_v16 }
 0x149   : > { %v1655_v9 = vadd.f32 %v1591_v23, %v1424_v40  ;;  %v1359_v42 = vsel %vm1276_vm13, %v3969_v25, 0.0  ;;  %vm1507_vm14 = vcmp.eq.s32.totalorder %v5468_v59, %v4018_v36  ;;  %vm1742_vm15 = vcmp.eq.s32.totalorder %v5468_v59, %v4048_v53 }
 0x14a   : > { %7293 = vst [vmem:[#allocation74_spill] sm:$0xff] %v5544_v4  ;;  %vm1973_vm1 = vcmp.eq.s32.totalorder %v5468_v59, %v4051_v58  ;;  %2212 = vmatprep.subr.mxu0 %v5544_v4  ;;  %2463 = vmatpush1.msra.mxu1 %v2462_v24  ;;  %v954_v19 = vadd.f32 %v890_v8, %v714_v20  ;;  %v1590_v26 = vsel %vm1507_vm14, %v3988_v7, 0.0  ;;  %v1825_v23 = vsel %vm1742_vm15, %v4009_v56, 0.0 }
 0x14b   : > { %v1890_v6 = vadd.f32 %v1826_v45, %v1655_v9  ;;  %v2056_v40 = vsel %vm1973_vm1, %v4054_v13, 0.0  ;;  %v7060_v14 = vand.u32 4294901760, %v5472_v10  ;;  %vm324_vm2 = vcmp.eq.s32.totalorder %v5468_v59, %v4023_v34 }
 0x14c   : > { %vm566_vm3 = vcmp.eq.s32.totalorder %v5468_v59, %v4058_v54  ;;  %v1185_v2 = vadd.f32 %v1121_v35, %v954_v19  ;;  %v407_v45 = vsel %vm324_vm2, %v4035_v38, 0.0  ;;  %vm806_vm5 = vcmp.eq.s32.totalorder %v5468_v59, %v4078_v28 }
 0x14d   : > { %v5562_v16 = vadd.f32 %v2057_v0, %v1890_v6  ;;  %v649_v8 = vsel %vm566_vm3, %v4068_v48, 0.0  ;;  %v2467_v9 = vsub.f32 %v5472_v10, %v7060_v14  ;;  %vm1037_vm6 = vcmp.eq.s32.totalorder %v5468_v59, %v4094_v33 }
 0x14e   : > { %v713_v24 = vadd.f32 %v649_v8, %v407_v45  ;;  %v1423_v0 = vadd.f32 %v1359_v42, %v1185_v2  ;;  %v889_v35 = vsel %vm806_vm5, %v4084_v5, 0.0  ;;  %v1120_v6 = vsel %vm1037_vm6, %v4103_v46, 0.0 }
 0x14f   : > { %v5574_v20 = vand.u32 4294901760, %v5562_v16  ;;  %v2468_v19 = vand.u32 4294901760, %v2467_v9  ;;  %vm1275_vm4 = vcmp.eq.s32.totalorder %v5468_v59, %v4106_v32  ;;  %vm1506_vm9 = vcmp.eq.s32.totalorder %v5468_v59, %v4114_v37 }
 0x150   : > { %v953_v17 = vadd.f32 %v889_v35, %v713_v24  ;;  %v1654_v45 = vadd.f32 %v1590_v26, %v1423_v0  ;;  %v1358_v8 = vsel %vm1275_vm4, %v4111_v41, 0.0  ;;  %v1589_v14 = vsel %vm1506_vm9, %v4131_v55, 0.0 }
 0x151   : > { %7294 = vst [vmem:[#allocation75_spill] sm:$0xff] %v5574_v20  ;;  %2214 = vmatpush2.msra.mxu0 %v5574_v20  ;;  %vm1741_vm10 = vcmp.eq.s32.totalorder %v5468_v59, %v4140_v21  ;;  %2469 = vmatprep.subr.mxu1 %v2468_v19  ;;  %vm1972_vm7 = vcmp.eq.s32.totalorder %v5468_v59, %v4151_v60  ;;  %v220_v0 = vadd.s32 216, %v7248_v15  ;;  %v5606_v59 = vadd.s32 208, %v7248_v15 }
 0x152   : > { %v1184_v42 = vadd.f32 %v1120_v6, %v953_v17  ;;  %v1824_v2 = vsel %vm1741_vm10, %v4148_v52, 0.0  ;;  %v5592_v9 = vsub.f32 %v5339_v31, %v5351_v11  ;;  %v1889_v24 = vadd.f32 %v1825_v23, %v1654_v45 }
 0x153   : > { %v2055_v26 = vsel %vm1972_vm7, %v4154_v22, 0.0  ;;  %v5598_v35 = vsub.f32 %v5385_v43, %v5397_v44  ;;  %v5603_v6 = vsub.f32 %v5424_v30, %v5435_v57  ;;  %vm323_vm11 = vcmp.eq.s32.totalorder %v220_v0, %v3861_v62 }
 0x154   : > { %7295 = vst [vmem:[#allocation76_spill] sm:$0xff] %v5592_v9  ;;  %v1422_v19 = vadd.f32 %v1358_v8, %v1184_v42  ;;  %v7063_v17 = vand.u32 4294901760, %v5592_v9  ;;  %v5608_v31 = vadd.f32 %v2056_v40, %v1889_v24  ;;  %vm565_vm12 = vcmp.eq.s32.totalorder %v220_v0, %v3871_v63 }
 0x155   : > { %7296 = vst [vmem:[#allocation77_spill] sm:$0xff] %v5598_v35  ;;  %7297 = vst [vmem:[#allocation78_spill] sm:$0xff] %v5603_v6  ;;  %vm805_vm0 = vcmp.eq.s32.totalorder %v220_v0, %v3953_v47  ;;  %v406_v45 = vsel %vm323_vm11, %v3875_v3, 0.0  ;;  %v648_v30 = vsel %vm565_vm12, %v3907_v29, 0.0  ;;  %vm1036_vm8 = vcmp.eq.s32.totalorder %v220_v0, %v3956_v49 }
 0x156   : > { %v1653_v43 = vadd.f32 %v1589_v14, %v1422_v19  ;;  %v2473_v23 = vsub.f32 %v5592_v9, %v7063_v17  ;;  %v5619_v8 = vand.u32 4294901760, %v5608_v31  ;;  %v712_v40 = vadd.f32 %v648_v30, %v406_v45 }
 0x157   : > { %v888_v42 = vsel %vm805_vm0, %v3942_v39, 0.0  ;;  %v1119_v14 = vsel %vm1036_vm8, %v3959_v50, 0.0  ;;  %vm1274_vm13 = vcmp.eq.s32.totalorder %v220_v0, %v4015_v61  ;;  %vm1505_vm14 = vcmp.eq.s32.totalorder %v220_v0, %v4018_v36 }
 0x158   : > { %7298 = vst [vmem:[#allocation79_spill] sm:$0xff] %v5619_v8  ;;  %v1888_v24 = vadd.f32 %v1824_v2, %v1653_v43  ;;  %v2474_v57 = vand.u32 4294901760, %v2473_v23  ;;  %2216 = vmatprep.subr.mxu0 %v5619_v8  ;;  %v952_v19 = vadd.f32 %v888_v42, %v712_v40  ;;  %v1357_v17 = vsel %vm1274_vm13, %v3969_v25, 0.0 }
 0x159   : > { %vm1740_vm15 = vcmp.eq.s32.totalorder %v220_v0, %v4048_v53  ;;  %v1588_v30 = vsel %vm1505_vm14, %v3988_v7, 0.0  ;;  %vm1971_vm1 = vcmp.eq.s32.totalorder %v220_v0, %v4051_v58  ;;  %v7070_v40 = vand.u32 4294901760, %v5598_v35 }
 0x15a   : > { %v5629_v45 = vadd.f32 %v2055_v26, %v1888_v24  ;;  %2475 = vmatpush1.msra.mxu1 %v2474_v57  ;;  %v1823_v2 = vsel %vm1740_vm15, %v4009_v56, 0.0  ;;  %v1183_v43 = vadd.f32 %v1119_v14, %v952_v19  ;;  %v2054_v23 = vsel %vm1971_vm1, %v4054_v13, 0.0 }
 0x15b   : > { %vm322_vm2 = vcmp.eq.s32.totalorder %v220_v0, %v4023_v34  ;;  %vm564_vm3 = vcmp.eq.s32.totalorder %v220_v0, %v4058_v54  ;;  %vm804_vm5 = vcmp.eq.s32.totalorder %v220_v0, %v4078_v28  ;;  %v2479_v24 = vsub.f32 %v5598_v35, %v7070_v40 }
 0x15c   : > { %v5638_v42 = vand.u32 4294901760, %v5629_v45  ;;  %v405_v26 = vsel %vm322_vm2, %v4035_v38, 0.0  ;;  %v1421_v57 = vadd.f32 %v1357_v17, %v1183_v43  ;;  %v647_v14 = vsel %vm564_vm3, %v4068_v48, 0.0 }
 0x15d   : > { %v887_v19 = vsel %vm804_vm5, %v4084_v5, 0.0  ;;  %v711_v44 = vadd.f32 %v647_v14, %v405_v26  ;;  %vm1035_vm6 = vcmp.eq.s32.totalorder %v220_v0, %v4094_v33  ;;  %vm1273_vm4 = vcmp.eq.s32.totalorder %v220_v0, %v4106_v32 }
 0x15e   : > { %7299 = vst [vmem:[#allocation80_spill] sm:$0xff] %v5638_v42  ;;  %2218 = vmatpush2.msra.mxu0 %v5638_v42  ;;  %vm1504_vm9 = vcmp.eq.s32.totalorder %v220_v0, %v4114_v37  ;;  %v1652_v11 = vadd.f32 %v1588_v30, %v1421_v57  ;;  %v2480_v9 = vand.u32 4294901760, %v2479_v24  ;;  %v1118_v17 = vsel %vm1035_vm6, %v4103_v46, 0.0 }
 0x15f   : > { %v1356_v43 = vsel %vm1273_vm4, %v4111_v41, 0.0  ;;  %v951_v40 = vadd.f32 %v887_v19, %v711_v44  ;;  %v1587_v35 = vsel %vm1504_vm9, %v4131_v55, 0.0  ;;  %vm1739_vm10 = vcmp.eq.s32.totalorder %v220_v0, %v4140_v21 }
 0x160   : > { %vm1970_vm7 = vcmp.eq.s32.totalorder %v220_v0, %v4151_v60  ;;  %v1887_v26 = vadd.f32 %v1823_v2, %v1652_v11  ;;  %2481 = vmatprep.subr.mxu1 %v2480_v9  ;;  %v1822_v14 = vsel %vm1739_vm10, %v4148_v52, 0.0  ;;  %v7075_v30 = vand.u32 4294901760, %v5603_v6 }
 0x161   : > { %v2053_v10 = vsel %vm1970_vm7, %v4154_v22, 0.0  ;;  %v1182_v57 = vadd.f32 %v1118_v17, %v951_v40  ;;  %vm321_vm11 = vcmp.eq.s32.totalorder %v5606_v59, %v3861_v62  ;;  %vm563_vm12 = vcmp.eq.s32.totalorder %v5606_v59, %v3871_v63 }
 0x162   : > { %vm803_vm0 = vcmp.eq.s32.totalorder %v5606_v59, %v3953_v47  ;;  %v5666_v44 = vadd.f32 %v2054_v23, %v1887_v26  ;;  %v2485_v11 = vsub.f32 %v5603_v6, %v7075_v30  ;;  %v404_v9 = vsel %vm321_vm11, %v3875_v3, 0.0 }
 0x163   : > { %v646_v0 = vsel %vm563_vm12, %v3907_v29, 0.0  ;;  %v1420_v2 = vadd.f32 %v1356_v43, %v1182_v57  ;;  %v886_v24 = vsel %vm803_vm0, %v3942_v39, 0.0  ;;  %vm1034_vm8 = vcmp.eq.s32.totalorder %v5606_v59, %v3956_v49 }
 0x164   : > { %v710_v40 = vadd.f32 %v646_v0, %v404_v9  ;;  %v5677_v19 = vand.u32 4294901760, %v5666_v44  ;;  %v2486_v23 = vand.u32 4294901760, %v2485_v11  ;;  %v1117_v17 = vsel %vm1034_vm8, %v3959_v50, 0.0 }
 0x165   : > { %vm1272_vm13 = vcmp.eq.s32.totalorder %v5606_v59, %v4015_v61  ;;  %v1651_v26 = vadd.f32 %v1587_v35, %v1420_v2  ;;  %vm1503_vm14 = vcmp.eq.s32.totalorder %v5606_v59, %v4018_v36  ;;  %vm1738_vm15 = vcmp.eq.s32.totalorder %v5606_v59, %v4048_v53 }
 0x166   : > { %7300 = vst [vmem:[#allocation81_spill] sm:$0xff] %v5677_v19  ;;  %v950_v30 = vadd.f32 %v886_v24, %v710_v40  ;;  %v1355_v6 = vsel %vm1272_vm13, %v3969_v25, 0.0  ;;  %2220 = vmatprep.subr.mxu0 %v5677_v19  ;;  %2487 = vmatpush2.msra.mxu1 %v2486_v23  ;;  %v1586_v43 = vsel %vm1503_vm14, %v3988_v7, 0.0  ;;  %vm1969_vm1 = vcmp.eq.s32.totalorder %v5606_v59, %v4051_v58 }
 0x167   : > { %v5693_v35 = vsub.f32 %v5455_v12, %v5475_v18  ;;  %v1886_v57 = vadd.f32 %v1822_v14, %v1651_v26  ;;  %v1821_v9 = vsel %vm1738_vm15, %v4009_v56, 0.0  ;;  %v2052_v0 = vsel %vm1969_vm1, %v4054_v13, 0.0 }
 0x168   : > { %v1181_v11 = vadd.f32 %v1117_v17, %v950_v30  ;;  %vm320_vm2 = vcmp.eq.s32.totalorder %v5606_v59, %v4023_v34  ;;  %vm562_vm3 = vcmp.eq.s32.totalorder %v5606_v59, %v4058_v54  ;;  %vm802_vm5 = vcmp.eq.s32.totalorder %v5606_v59, %v4078_v28 }
 0x169   : > { %7301 = vst [vmem:[#allocation82_spill] sm:$0xff] %v5693_v35  ;;  %v7080_v2 = vand.u32 4294901760, %v5693_v35  ;;  %v5704_v40 = vadd.f32 %v2053_v10, %v1886_v57  ;;  %v403_v14 = vsel %vm320_vm2, %v4035_v38, 0.0  ;;  %v645_v30 = vsel %vm562_vm3, %v4068_v48, 0.0 }
 0x16a   : > { %v1419_v12 = vadd.f32 %v1355_v6, %v1181_v11  ;;  %v709_v23 = vadd.f32 %v645_v30, %v403_v14  ;;  %v885_v17 = vsel %vm802_vm5, %v4084_v5, 0.0  ;;  %vm1033_vm6 = vcmp.eq.s32.totalorder %v5606_v59, %v4094_v33 }
 0x16b   : > { %v2491_v24 = vsub.f32 %v5693_v35, %v7080_v2  ;;  %v5715_v26 = vand.u32 4294901760, %v5704_v40  ;;  %v1116_v6 = vsel %vm1033_vm6, %v4103_v46, 0.0  ;;  %vm1271_vm4 = vcmp.eq.s32.totalorder %v5606_v59, %v4106_v32 }
 0x16c   : > { %v1650_v10 = vadd.f32 %v1586_v43, %v1419_v12  ;;  %v949_v11 = vadd.f32 %v885_v17, %v709_v23  ;;  %v1354_v18 = vsel %vm1271_vm4, %v4111_v41, 0.0  ;;  %vm1502_vm9 = vcmp.eq.s32.totalorder %v5606_v59, %v4114_v37  ;;  %v7303_v23 = vld [vmem:[#allocation72_spill] sm:$0xff] }
 0x16d   : > { %7302 = vst [vmem:[#allocation83_spill] sm:$0xff] %v5715_v26  ;;  %v2492_v57 = vand.u32 4294901760, %v2491_v24  ;;  %2222 = vmatpush2.msra.mxu0 %v5715_v26  ;;  %v1585_v30 = vsel %vm1502_vm9, %v4131_v55, 0.0  ;;  %vm1737_vm10 = vcmp.eq.s32.totalorder %v5606_v59, %v4140_v21  ;;  %vm1968_vm7 = vcmp.eq.s32.totalorder %v5606_v59, %v4151_v60 }
 0x16e   : > { %v1885_v14 = vadd.f32 %v1821_v9, %v1650_v10  ;;  %v1180_v43 = vadd.f32 %v1116_v6, %v949_v11  ;;  %v1820_v12 = vsel %vm1737_vm10, %v4148_v52, 0.0  ;;  %v2051_v24 = vsel %vm1968_vm7, %v4154_v22, 0.0 }
 0x16f   : > { %2493 = vmatprep.subr.mxu1 %v2492_v57  ;;  %v5733_v17 = vsub.f32 %v7303_v23, %v5503_v27  ;;  %v218_v9 = vadd.s32 200, %v7248_v15  ;;  %v5740_v10 = vsub.f32 %v5532_v51, %v5544_v4  ;;  %v5744_v59 = vsub.f32 %v5562_v16, %v5574_v20 }
 0x170   : > { %v5735_v2 = vadd.f32 %v2052_v0, %v1885_v14  ;;  %v1418_v6 = vadd.f32 %v1354_v18, %v1180_v43  ;;  %v5748_v11 = vadd.s32 192, %v7248_v15  ;;  %v5752_v0 = vsub.f32 %v5608_v31, %v5619_v8 }
 0x171   : > { %7304 = vst [vmem:[#allocation72_spill] sm:$0xff] %v5733_v17  ;;  %7305 = vst [vmem:[#allocation84_spill] sm:$0xff] %v5740_v10  ;;  %v7085_v57 = vand.u32 4294901760, %v5733_v17  ;;  %vm319_vm11 = vcmp.eq.s32.totalorder %v218_v9, %v3861_v62  ;;  %vm561_vm12 = vcmp.eq.s32.totalorder %v218_v9, %v3871_v63  ;;  %vm801_vm0 = vcmp.eq.s32.totalorder %v218_v9, %v3953_v47 }
 0x172   : > { %7306 = vst [vmem:[#allocation85_spill] sm:$0xff] %v5744_v59  ;;  %7307 = vst [vmem:[#allocation86_spill] sm:$0xff] %v5752_v0  ;;  %v5755_v14 = vand.u32 4294901760, %v5735_v2  ;;  %v1649_v51 = vadd.f32 %v1585_v30, %v1418_v6  ;;  %v402_v16 = vsel %vm319_vm11, %v3875_v3, 0.0  ;;  %v644_v43 = vsel %vm561_vm12, %v3907_v29, 0.0 }
 0x173   : > { %v2497_v18 = vsub.f32 %v5733_v17, %v7085_v57  ;;  %v708_v31 = vadd.f32 %v644_v43, %v402_v16  ;;  %v884_v23 = vsel %vm801_vm0, %v3942_v39, 0.0  ;;  %vm1032_vm8 = vcmp.eq.s32.totalorder %v218_v9, %v3956_v49 }
 0x174   : > { %7308 = vst [vmem:[#allocation87_spill] sm:$0xff] %v5755_v14  ;;  %2224 = vmatprep.subr.mxu0 %v5755_v14  ;;  %vm1270_vm13 = vcmp.eq.s32.totalorder %v218_v9, %v4015_v61  ;;  %v1884_v8 = vadd.f32 %v1820_v12, %v1649_v51  ;;  %v1115_v30 = vsel %vm1032_vm8, %v3959_v50, 0.0  ;;  %vm1501_vm14 = vcmp.eq.s32.totalorder %v218_v9, %v4018_v36 }
 0x175   : > { %v2498_v20 = vand.u32 4294901760, %v2497_v18  ;;  %v1353_v6 = vsel %vm1270_vm13, %v3969_v25, 0.0  ;;  %v948_v57 = vadd.f32 %v884_v23, %v708_v31  ;;  %vm1736_vm15 = vcmp.eq.s32.totalorder %v218_v9, %v4048_v53 }
 0x176   : > { %vm1967_vm1 = vcmp.eq.s32.totalorder %v218_v9, %v4051_v58  ;;  %v5774_v16 = vadd.f32 %v2051_v24, %v1884_v8  ;;  %v1584_v43 = vsel %vm1501_vm14, %v3988_v7, 0.0  ;;  %v1819_v4 = vsel %vm1736_vm15, %v4009_v56, 0.0 }
 0x177   : > { %2499 = vmatpush2.msra.mxu1 %v2498_v20  ;;  %v2050_v12 = vsel %vm1967_vm1, %v4054_v13, 0.0  ;;  %v1179_v51 = vadd.f32 %v1115_v30, %v948_v57  ;;  %v7092_v18 = vand.u32 4294901760, %v5740_v10  ;;  %vm318_vm2 = vcmp.eq.s32.totalorder %v218_v9, %v4023_v34 }
 0x178   : > { %7309 = vst [vmem:[#allocation88_spill] sm:$0xff] %v5774_v16  ;;  %vm560_vm3 = vcmp.eq.s32.totalorder %v218_v9, %v4058_v54  ;;  %v5783_v31 = vand.u32 4294901760, %v5774_v16  ;;  %v401_v8 = vsel %vm318_vm2, %v4035_v38, 0.0  ;;  %vm800_vm5 = vcmp.eq.s32.totalorder %v218_v9, %v4078_v28 }
 0x179   : > { %v643_v20 = vsel %vm560_vm3, %v4068_v48, 0.0  ;;  %v1417_v24 = vadd.f32 %v1353_v6, %v1179_v51  ;;  %v2503_v57 = vsub.f32 %v5740_v10, %v7092_v18  ;;  %v883_v30 = vsel %vm800_vm5, %v4084_v5, 0.0 }
 0x17a   : > { %7310 = vst [vmem:[#allocation89_spill] sm:$0xff] %v5783_v31  ;;  %v707_v23 = vadd.f32 %v643_v20, %v401_v8  ;;  %2226 = vmatpush2.msra.mxu0 %v5783_v31  ;;  %vm1031_vm6 = vcmp.eq.s32.totalorder %v218_v9, %v4094_v33  ;;  %vm1269_vm4 = vcmp.eq.s32.totalorder %v218_v9, %v4106_v32  ;;  %v7100_v16 = vand.u32 4294901760, %v5744_v59 }
 0x17b   : > { %vm1500_vm9 = vcmp.eq.s32.totalorder %v218_v9, %v4114_v37  ;;  %vm1735_vm10 = vcmp.eq.s32.totalorder %v218_v9, %v4140_v21  ;;  %v1648_v27 = vadd.f32 %v1584_v43, %v1417_v24  ;;  %v2504_v17 = vand.u32 4294901760, %v2503_v57 }
 0x17c   : > { %v947_v6 = vadd.f32 %v883_v30, %v707_v23  ;;  %v1114_v51 = vsel %vm1031_vm6, %v4103_v46, 0.0  ;;  %v1352_v18 = vsel %vm1269_vm4, %v4111_v41, 0.0  ;;  %v1583_v8 = vsel %vm1500_vm9, %v4131_v55, 0.0 }
 0x17d   : > { %v1818_v20 = vsel %vm1735_vm10, %v4148_v52, 0.0  ;;  %vm1966_vm7 = vcmp.eq.s32.totalorder %v218_v9, %v4151_v60  ;;  %v1883_v10 = vadd.f32 %v1819_v4, %v1648_v27  ;;  %2505 = vmatprep.subr.mxu1 %v2504_v17  ;;  %vm317_vm11 = vcmp.eq.s32.totalorder %v5748_v11, %v3861_v62 }
 0x17e   : > { %v1178_v35 = vadd.f32 %v1114_v51, %v947_v6  ;;  %v2049_v1 = vsel %vm1966_vm7, %v4154_v22, 0.0  ;;  %vm559_vm12 = vcmp.eq.s32.totalorder %v5748_v11, %v3871_v63  ;;  %vm799_vm0 = vcmp.eq.s32.totalorder %v5748_v11, %v3953_v47 }
 0x17f   : > { %vm1030_vm8 = vcmp.eq.s32.totalorder %v5748_v11, %v3956_v49  ;;  %v5812_v9 = vadd.f32 %v2050_v12, %v1883_v10  ;;  %v2509_v4 = vsub.f32 %v5744_v59, %v7100_v16  ;;  %v400_v17 = vsel %vm317_vm11, %v3875_v3, 0.0 }
 0x180   : > { %v1416_v27 = vadd.f32 %v1352_v18, %v1178_v35  ;;  %v642_v43 = vsel %vm559_vm12, %v3907_v29, 0.0  ;;  %v882_v24 = vsel %vm799_vm0, %v3942_v39, 0.0  ;;  %v1113_v57 = vsel %vm1030_vm8, %v3959_v50, 0.0 }
 0x181   : > { %vm1268_vm13 = vcmp.eq.s32.totalorder %v5748_v11, %v4015_v61  ;;  %v5824_v23 = vand.u32 4294901760, %v5812_v9  ;;  %v2510_v35 = vand.u32 4294901760, %v2509_v4  ;;  %v706_v12 = vadd.f32 %v642_v43, %v400_v17 }
 0x182   : > { %v1647_v10 = vadd.f32 %v1583_v8, %v1416_v27  ;;  %v1351_v18 = vsel %vm1268_vm13, %v3969_v25, 0.0  ;;  %vm1499_vm14 = vcmp.eq.s32.totalorder %v5748_v11, %v4018_v36  ;;  %vm1734_vm15 = vcmp.eq.s32.totalorder %v5748_v11, %v4048_v53 }
 0x183   : > { %7311 = vst [vmem:[#allocation90_spill] sm:$0xff] %v5824_v23  ;;  %vm1965_vm1 = vcmp.eq.s32.totalorder %v5748_v11, %v4051_v58  ;;  %2228 = vmatprep.subr.mxu0 %v5824_v23  ;;  %2511 = vmatpush2.msra.mxu1 %v2510_v35  ;;  %v946_v6 = vadd.f32 %v882_v24, %v706_v12  ;;  %v1582_v51 = vsel %vm1499_vm14, %v3988_v7, 0.0  ;;  %v1817_v8 = vsel %vm1734_vm15, %v4009_v56, 0.0 }
 0x184   : > { %v1882_v30 = vadd.f32 %v1818_v20, %v1647_v10  ;;  %v2048_v27 = vsel %vm1965_vm1, %v4054_v13, 0.0  ;;  %v7101_v4 = vand.u32 4294901760, %v5752_v0  ;;  %vm316_vm2 = vcmp.eq.s32.totalorder %v5748_v11, %v4023_v34 }
 0x185   : > { %vm558_vm3 = vcmp.eq.s32.totalorder %v5748_v11, %v4058_v54  ;;  %v1177_v43 = vadd.f32 %v1113_v57, %v946_v6  ;;  %v399_v20 = vsel %vm316_vm2, %v4035_v38, 0.0  ;;  %vm798_vm5 = vcmp.eq.s32.totalorder %v5748_v11, %v4078_v28 }
 0x186   : > { %v5842_v17 = vadd.f32 %v2049_v1, %v1882_v30  ;;  %v641_v24 = vsel %vm558_vm3, %v4068_v48, 0.0  ;;  %v2515_v10 = vsub.f32 %v5752_v0, %v7101_v4  ;;  %vm1029_vm6 = vcmp.eq.s32.totalorder %v5748_v11, %v4094_v33 }
 0x187   : > { %v705_v35 = vadd.f32 %v641_v24, %v399_v20  ;;  %v1415_v1 = vadd.f32 %v1351_v18, %v1177_v43  ;;  %v881_v57 = vsel %vm798_vm5, %v4084_v5, 0.0  ;;  %v1112_v30 = vsel %vm1029_vm6, %v4103_v46, 0.0 }
 0x188   : > { %v5854_v12 = vand.u32 4294901760, %v5842_v17  ;;  %v2516_v6 = vand.u32 4294901760, %v2515_v10  ;;  %vm1267_vm4 = vcmp.eq.s32.totalorder %v5748_v11, %v4106_v32  ;;  %vm1498_vm9 = vcmp.eq.s32.totalorder %v5748_v11, %v4114_v37 }
 0x189   : > { %v945_v16 = vadd.f32 %v881_v57, %v705_v35  ;;  %v1646_v20 = vadd.f32 %v1582_v51, %v1415_v1  ;;  %v1350_v24 = vsel %vm1267_vm4, %v4111_v41, 0.0  ;;  %v1581_v4 = vsel %vm1498_vm9, %v4131_v55, 0.0 }
 0x18a   : > { %7312 = vst [vmem:[#allocation91_spill] sm:$0xff] %v5854_v12  ;;  %2230 = vmatpush2.msra.mxu0 %v5854_v12  ;;  %vm1733_vm10 = vcmp.eq.s32.totalorder %v5748_v11, %v4140_v21  ;;  %2517 = vmatprep.subr.mxu1 %v2516_v6  ;;  %vm1964_vm7 = vcmp.eq.s32.totalorder %v5748_v11, %v4151_v60  ;;  %v216_v1 = vadd.s32 184, %v7248_v15  ;;  %v5886_v11 = vadd.s32 176, %v7248_v15 }
 0x18b   : > { %v1176_v18 = vadd.f32 %v1112_v30, %v945_v16  ;;  %v1816_v43 = vsel %vm1733_vm10, %v4148_v52, 0.0  ;;  %v5872_v10 = vsub.f32 %v5629_v45, %v5638_v42  ;;  %v1881_v35 = vadd.f32 %v1817_v8, %v1646_v20 }
 0x18c   : > { %v2047_v51 = vsel %vm1964_vm7, %v4154_v22, 0.0  ;;  %v5878_v57 = vsub.f32 %v5666_v44, %v5677_v19  ;;  %v5883_v30 = vsub.f32 %v5704_v40, %v5715_v26  ;;  %vm315_vm11 = vcmp.eq.s32.totalorder %v216_v1, %v3861_v62 }
 0x18d   : > { %7313 = vst [vmem:[#allocation92_spill] sm:$0xff] %v5872_v10  ;;  %v1414_v6 = vadd.f32 %v1350_v24, %v1176_v18  ;;  %v7104_v16 = vand.u32 4294901760, %v5872_v10  ;;  %v5888_v45 = vadd.f32 %v2048_v27, %v1881_v35  ;;  %vm557_vm12 = vcmp.eq.s32.totalorder %v216_v1, %v3871_v63 }
 0x18e   : > { %7314 = vst [vmem:[#allocation93_spill] sm:$0xff] %v5878_v57  ;;  %7315 = vst [vmem:[#allocation94_spill] sm:$0xff] %v5883_v30  ;;  %vm797_vm0 = vcmp.eq.s32.totalorder %v216_v1, %v3953_v47  ;;  %v398_v20 = vsel %vm315_vm11, %v3875_v3, 0.0  ;;  %v640_v40 = vsel %vm557_vm12, %v3907_v29, 0.0  ;;  %vm1028_vm8 = vcmp.eq.s32.totalorder %v216_v1, %v3956_v49 }
 0x18f   : > { %v1645_v44 = vadd.f32 %v1581_v4, %v1414_v6  ;;  %v2521_v8 = vsub.f32 %v5872_v10, %v7104_v16  ;;  %v5899_v24 = vand.u32 4294901760, %v5888_v45  ;;  %v704_v27 = vadd.f32 %v640_v40, %v398_v20 }
 0x190   : > { %v880_v18 = vsel %vm797_vm0, %v3942_v39, 0.0  ;;  %v1111_v4 = vsel %vm1028_vm8, %v3959_v50, 0.0  ;;  %vm1266_vm13 = vcmp.eq.s32.totalorder %v216_v1, %v4015_v61  ;;  %vm1497_vm14 = vcmp.eq.s32.totalorder %v216_v1, %v4018_v36 }
 0x191   : > { %7316 = vst [vmem:[#allocation95_spill] sm:$0xff] %v5899_v24  ;;  %v1880_v35 = vadd.f32 %v1816_v43, %v1645_v44  ;;  %v2522_v26 = vand.u32 4294901760, %v2521_v8  ;;  %2232 = vmatprep.subr.mxu0 %v5899_v24  ;;  %v944_v6 = vadd.f32 %v880_v18, %v704_v27  ;;  %v1349_v16 = vsel %vm1266_vm13, %v3969_v25, 0.0 }
 0x192   : > { %vm1732_vm15 = vcmp.eq.s32.totalorder %v216_v1, %v4048_v53  ;;  %v1580_v40 = vsel %vm1497_vm14, %v3988_v7, 0.0  ;;  %vm1963_vm1 = vcmp.eq.s32.totalorder %v216_v1, %v4051_v58  ;;  %v7111_v27 = vand.u32 4294901760, %v5878_v57 }
 0x193   : > { %v5909_v20 = vadd.f32 %v2047_v51, %v1880_v35  ;;  %2523 = vmatpush2.msra.mxu1 %v2522_v26  ;;  %v1815_v43 = vsel %vm1732_vm15, %v4009_v56, 0.0  ;;  %v1175_v44 = vadd.f32 %v1111_v4, %v944_v6  ;;  %v2046_v8 = vsel %vm1963_vm1, %v4054_v13, 0.0 }
 0x194   : > { %vm314_vm2 = vcmp.eq.s32.totalorder %v216_v1, %v4023_v34  ;;  %vm556_vm3 = vcmp.eq.s32.totalorder %v216_v1, %v4058_v54  ;;  %vm796_vm5 = vcmp.eq.s32.totalorder %v216_v1, %v4078_v28  ;;  %v2527_v35 = vsub.f32 %v5878_v57, %v7111_v27 }
 0x195   : > { %v5918_v18 = vand.u32 4294901760, %v5909_v20  ;;  %v397_v51 = vsel %vm314_vm2, %v4035_v38, 0.0  ;;  %v1413_v26 = vadd.f32 %v1349_v16, %v1175_v44  ;;  %v639_v4 = vsel %vm556_vm3, %v4068_v48, 0.0 }
 0x196   : > { %v879_v6 = vsel %vm796_vm5, %v4084_v5, 0.0  ;;  %v703_v19 = vadd.f32 %v639_v4, %v397_v51  ;;  %vm1027_vm6 = vcmp.eq.s32.totalorder %v216_v1, %v4094_v33  ;;  %vm1265_vm4 = vcmp.eq.s32.totalorder %v216_v1, %v4106_v32 }
 0x197   : > { %7317 = vst [vmem:[#allocation96_spill] sm:$0xff] %v5918_v18  ;;  %2234 = vmatpush2.msra.mxu0 %v5918_v18  ;;  %vm1496_vm9 = vcmp.eq.s32.totalorder %v216_v1, %v4114_v37  ;;  %v1644_v42 = vadd.f32 %v1580_v40, %v1413_v26  ;;  %v2528_v10 = vand.u32 4294901760, %v2527_v35  ;;  %v1110_v16 = vsel %vm1027_vm6, %v4103_v46, 0.0 }
 0x198   : > { %v1348_v44 = vsel %vm1265_vm4, %v4111_v41, 0.0  ;;  %v943_v27 = vadd.f32 %v879_v6, %v703_v19  ;;  %v1579_v57 = vsel %vm1496_vm9, %v4131_v55, 0.0  ;;  %vm1731_vm10 = vcmp.eq.s32.totalorder %v216_v1, %v4140_v21 }
 0x199   : > { %vm1962_vm7 = vcmp.eq.s32.totalorder %v216_v1, %v4151_v60  ;;  %v1879_v51 = vadd.f32 %v1815_v43, %v1644_v42  ;;  %2529 = vmatprep.subr.mxu1 %v2528_v10  ;;  %v1814_v4 = vsel %vm1731_vm10, %v4148_v52, 0.0  ;;  %v7116_v40 = vand.u32 4294901760, %v5883_v30 }
 0x19a   : > { %v2045_v0 = vsel %vm1962_vm7, %v4154_v22, 0.0  ;;  %v1174_v26 = vadd.f32 %v1110_v16, %v943_v27  ;;  %vm313_vm11 = vcmp.eq.s32.totalorder %v5886_v11, %v3861_v62  ;;  %vm555_vm12 = vcmp.eq.s32.totalorder %v5886_v11, %v3871_v63 }
 0x19b   : > { %vm795_vm0 = vcmp.eq.s32.totalorder %v5886_v11, %v3953_v47  ;;  %v5946_v19 = vadd.f32 %v2046_v8, %v1879_v51  ;;  %v2533_v42 = vsub.f32 %v5883_v30, %v7116_v40  ;;  %v396_v10 = vsel %vm313_vm11, %v3875_v3, 0.0 }
 0x19c   : > { %v638_v1 = vsel %vm555_vm12, %v3907_v29, 0.0  ;;  %v1412_v43 = vadd.f32 %v1348_v44, %v1174_v26  ;;  %v878_v35 = vsel %vm795_vm0, %v3942_v39, 0.0  ;;  %vm1026_vm8 = vcmp.eq.s32.totalorder %v5886_v11, %v3956_v49 }
 0x19d   : > { %v702_v27 = vadd.f32 %v638_v1, %v396_v10  ;;  %v5957_v6 = vand.u32 4294901760, %v5946_v19  ;;  %v2534_v8 = vand.u32 4294901760, %v2533_v42  ;;  %v1109_v16 = vsel %vm1026_vm8, %v3959_v50, 0.0 }
 0x19e   : > { %vm1264_vm13 = vcmp.eq.s32.totalorder %v5886_v11, %v4015_v61  ;;  %v1643_v51 = vadd.f32 %v1579_v57, %v1412_v43  ;;  %vm1495_vm14 = vcmp.eq.s32.totalorder %v5886_v11, %v4018_v36  ;;  %vm1730_vm15 = vcmp.eq.s32.totalorder %v5886_v11, %v4048_v53 }
 0x19f   : > { %7318 = vst [vmem:[#allocation97_spill] sm:$0xff] %v5957_v6  ;;  %v942_v40 = vadd.f32 %v878_v35, %v702_v27  ;;  %v1347_v30 = vsel %vm1264_vm13, %v3969_v25, 0.0  ;;  %2236 = vmatprep.subr.mxu0 %v5957_v6  ;;  %2535 = vmatpush2.msra.mxu1 %v2534_v8  ;;  %v1578_v44 = vsel %vm1495_vm14, %v3988_v7, 0.0  ;;  %vm1961_vm1 = vcmp.eq.s32.totalorder %v5886_v11, %v4051_v58 }
 0x1a0   : > { %v5973_v57 = vsub.f32 %v5735_v2, %v5755_v14  ;;  %v1878_v26 = vadd.f32 %v1814_v4, %v1643_v51  ;;  %v1813_v10 = vsel %vm1730_vm15, %v4009_v56, 0.0  ;;  %v2044_v1 = vsel %vm1961_vm1, %v4054_v13, 0.0 }
 0x1a1   : > { %v1173_v42 = vadd.f32 %v1109_v16, %v942_v40  ;;  %vm312_vm2 = vcmp.eq.s32.totalorder %v5886_v11, %v4023_v34  ;;  %vm554_vm3 = vcmp.eq.s32.totalorder %v5886_v11, %v4058_v54  ;;  %vm794_vm5 = vcmp.eq.s32.totalorder %v5886_v11, %v4078_v28 }
 0x1a2   : > { %7319 = vst [vmem:[#allocation98_spill] sm:$0xff] %v5973_v57  ;;  %v7121_v43 = vand.u32 4294901760, %v5973_v57  ;;  %v5984_v27 = vadd.f32 %v2045_v0, %v1878_v26  ;;  %v395_v4 = vsel %vm312_vm2, %v4035_v38, 0.0  ;;  %v637_v40 = vsel %vm554_vm3, %v4068_v48, 0.0 }
 0x1a3   : > { %v1411_v2 = vadd.f32 %v1347_v30, %v1173_v42  ;;  %v701_v8 = vadd.f32 %v637_v40, %v395_v4  ;;  %v877_v16 = vsel %vm794_vm5, %v4084_v5, 0.0  ;;  %vm1025_vm6 = vcmp.eq.s32.totalorder %v5886_v11, %v4094_v33 }
 0x1a4   : > { %v2539_v35 = vsub.f32 %v5973_v57, %v7121_v43  ;;  %v5995_v51 = vand.u32 4294901760, %v5984_v27  ;;  %v1108_v30 = vsel %vm1025_vm6, %v4103_v46, 0.0  ;;  %vm1263_vm4 = vcmp.eq.s32.totalorder %v5886_v11, %v4106_v32 }
 0x1a5   : > { %v1642_v0 = vadd.f32 %v1578_v44, %v1411_v2  ;;  %v941_v42 = vadd.f32 %v877_v16, %v701_v8  ;;  %v1346_v14 = vsel %vm1263_vm4, %v4111_v41, 0.0  ;;  %vm1494_vm9 = vcmp.eq.s32.totalorder %v5886_v11, %v4114_v37  ;;  %v7321_v8 = vld [vmem:[#allocation88_spill] sm:$0xff] }
 0x1a6   : > { %7320 = vst [vmem:[#allocation99_spill] sm:$0xff] %v5995_v51  ;;  %v2540_v26 = vand.u32 4294901760, %v2539_v35  ;;  %2238 = vmatpush2.msra.mxu0 %v5995_v51  ;;  %v1577_v40 = vsel %vm1494_vm9, %v4131_v55, 0.0  ;;  %vm1729_vm10 = vcmp.eq.s32.totalorder %v5886_v11, %v4140_v21  ;;  %vm1960_vm7 = vcmp.eq.s32.totalorder %v5886_v11, %v4151_v60 }
 0x1a7   : > { %v1877_v4 = vadd.f32 %v1813_v10, %v1642_v0  ;;  %v1172_v44 = vadd.f32 %v1108_v30, %v941_v42  ;;  %v1812_v2 = vsel %vm1729_vm10, %v4148_v52, 0.0  ;;  %v2043_v35 = vsel %vm1960_vm7, %v4154_v22, 0.0 }
 0x1a8   : > { %2541 = vmatprep.subr.mxu1 %v2540_v26  ;;  %v6013_v16 = vsub.f32 %v7321_v8, %v5783_v31  ;;  %v214_v10 = vadd.s32 168, %v7248_v15  ;;  %v6020_v0 = vsub.f32 %v5812_v9, %v5824_v23  ;;  %v6024_v11 = vsub.f32 %v5842_v17, %v5854_v12 }
 0x1a9   : > { %v6015_v43 = vadd.f32 %v2044_v1, %v1877_v4  ;;  %v1410_v30 = vadd.f32 %v1346_v14, %v1172_v44  ;;  %v6028_v42 = vadd.s32 160, %v7248_v15  ;;  %v6032_v1 = vsub.f32 %v5888_v45, %v5899_v24 }
 0x1aa   : > { %7322 = vst [vmem:[#allocation88_spill] sm:$0xff] %v6013_v16  ;;  %7323 = vst [vmem:[#allocation100_spill] sm:$0xff] %v6020_v0  ;;  %v7126_v26 = vand.u32 4294901760, %v6013_v16  ;;  %vm311_vm11 = vcmp.eq.s32.totalorder %v214_v10, %v3861_v62  ;;  %vm553_vm12 = vcmp.eq.s32.totalorder %v214_v10, %v3871_v63  ;;  %vm793_vm0 = vcmp.eq.s32.totalorder %v214_v10, %v3953_v47 }
 0x1ab   : > { %7324 = vst [vmem:[#allocation101_spill] sm:$0xff] %v6024_v11  ;;  %7325 = vst [vmem:[#allocation102_spill] sm:$0xff] %v6032_v1  ;;  %v6035_v4 = vand.u32 4294901760, %v6015_v43  ;;  %v1641_v9 = vadd.f32 %v1577_v40, %v1410_v30  ;;  %v394_v17 = vsel %vm311_vm11, %v3875_v3, 0.0  ;;  %v636_v44 = vsel %vm553_vm12, %v3907_v29, 0.0 }
 0x1ac   : > { %v2545_v14 = vsub.f32 %v6013_v16, %v7126_v26  ;;  %v700_v45 = vadd.f32 %v636_v44, %v394_v17  ;;  %v876_v8 = vsel %vm793_vm0, %v3942_v39, 0.0  ;;  %vm1024_vm8 = vcmp.eq.s32.totalorder %v214_v10, %v3956_v49 }
 0x1ad   : > { %7326 = vst [vmem:[#allocation103_spill] sm:$0xff] %v6035_v4  ;;  %2240 = vmatprep.subr.mxu0 %v6035_v4  ;;  %vm1262_vm13 = vcmp.eq.s32.totalorder %v214_v10, %v4015_v61  ;;  %v1876_v24 = vadd.f32 %v1812_v2, %v1641_v9  ;;  %v1107_v40 = vsel %vm1024_vm8, %v3959_v50, 0.0  ;;  %vm1493_vm14 = vcmp.eq.s32.totalorder %v214_v10, %v4018_v36 }
 0x1ae   : > { %v2546_v12 = vand.u32 4294901760, %v2545_v14  ;;  %v1345_v30 = vsel %vm1262_vm13, %v3969_v25, 0.0  ;;  %v940_v26 = vadd.f32 %v876_v8, %v700_v45  ;;  %vm1728_vm15 = vcmp.eq.s32.totalorder %v214_v10, %v4048_v53 }
 0x1af   : > { %vm1959_vm1 = vcmp.eq.s32.totalorder %v214_v10, %v4051_v58  ;;  %v6054_v17 = vadd.f32 %v2043_v35, %v1876_v24  ;;  %v1576_v44 = vsel %vm1493_vm14, %v3988_v7, 0.0  ;;  %v1811_v23 = vsel %vm1728_vm15, %v4009_v56, 0.0 }
 0x1b0   : > { %2547 = vmatpush2.msra.mxu1 %v2546_v12  ;;  %v2042_v2 = vsel %vm1959_vm1, %v4054_v13, 0.0  ;;  %v1171_v9 = vadd.f32 %v1107_v40, %v940_v26  ;;  %v7133_v14 = vand.u32 4294901760, %v6020_v0  ;;  %vm310_vm2 = vcmp.eq.s32.totalorder %v214_v10, %v4023_v34 }
 0x1b1   : > { %7327 = vst [vmem:[#allocation104_spill] sm:$0xff] %v6054_v17  ;;  %vm552_vm3 = vcmp.eq.s32.totalorder %v214_v10, %v4058_v54  ;;  %v6063_v45 = vand.u32 4294901760, %v6054_v17  ;;  %v393_v24 = vsel %vm310_vm2, %v4035_v38, 0.0  ;;  %vm792_vm5 = vcmp.eq.s32.totalorder %v214_v10, %v4078_v28 }
 0x1b2   : > { %v635_v12 = vsel %vm552_vm3, %v4068_v48, 0.0  ;;  %v1409_v35 = vadd.f32 %v1345_v30, %v1171_v9  ;;  %v2551_v26 = vsub.f32 %v6020_v0, %v7133_v14  ;;  %v875_v40 = vsel %vm792_vm5, %v4084_v5, 0.0 }
 0x1b3   : > { %7328 = vst [vmem:[#allocation105_spill] sm:$0xff] %v6063_v45  ;;  %v699_v8 = vadd.f32 %v635_v12, %v393_v24  ;;  %2242 = vmatpush2.msra.mxu0 %v6063_v45  ;;  %vm1023_vm6 = vcmp.eq.s32.totalorder %v214_v10, %v4094_v33  ;;  %vm1261_vm4 = vcmp.eq.s32.totalorder %v214_v10, %v4106_v32  ;;  %v7141_v17 = vand.u32 4294901760, %v6024_v11 }
 0x1b4   : > { %vm1492_vm9 = vcmp.eq.s32.totalorder %v214_v10, %v4114_v37  ;;  %vm1727_vm10 = vcmp.eq.s32.totalorder %v214_v10, %v4140_v21  ;;  %v1640_v31 = vadd.f32 %v1576_v44, %v1409_v35  ;;  %v2552_v16 = vand.u32 4294901760, %v2551_v26 }
 0x1b5   : > { %v939_v30 = vadd.f32 %v875_v40, %v699_v8  ;;  %v1106_v9 = vsel %vm1023_vm6, %v4103_v46, 0.0  ;;  %v1344_v14 = vsel %vm1261_vm4, %v4111_v41, 0.0  ;;  %v1575_v24 = vsel %vm1492_vm9, %v4131_v55, 0.0 }
 0x1b6   : > { %v1810_v12 = vsel %vm1727_vm10, %v4148_v52, 0.0  ;;  %vm1958_vm7 = vcmp.eq.s32.totalorder %v214_v10, %v4151_v60  ;;  %v1875_v0 = vadd.f32 %v1811_v23, %v1640_v31  ;;  %2553 = vmatprep.subr.mxu1 %v2552_v16  ;;  %vm309_vm11 = vcmp.eq.s32.totalorder %v6028_v42, %v3861_v62 }
 0x1b7   : > { %v1170_v57 = vadd.f32 %v1106_v9, %v939_v30  ;;  %v2041_v59 = vsel %vm1958_vm7, %v4154_v22, 0.0  ;;  %vm551_vm12 = vcmp.eq.s32.totalorder %v6028_v42, %v3871_v63  ;;  %vm791_vm0 = vcmp.eq.s32.totalorder %v6028_v42, %v3953_v47 }
 0x1b8   : > { %vm1022_vm8 = vcmp.eq.s32.totalorder %v6028_v42, %v3956_v49  ;;  %v6092_v10 = vadd.f32 %v2042_v2, %v1875_v0  ;;  %v2557_v23 = vsub.f32 %v6024_v11, %v7141_v17  ;;  %v392_v16 = vsel %vm309_vm11, %v3875_v3, 0.0 }
 0x1b9   : > { %v1408_v31 = vadd.f32 %v1344_v14, %v1170_v57  ;;  %v634_v44 = vsel %vm551_vm12, %v3907_v29, 0.0  ;;  %v874_v35 = vsel %vm791_vm0, %v3942_v39, 0.0  ;;  %v1105_v26 = vsel %vm1022_vm8, %v3959_v50, 0.0 }
 0x1ba   : > { %vm1260_vm13 = vcmp.eq.s32.totalorder %v6028_v42, %v4015_v61  ;;  %v6104_v8 = vand.u32 4294901760, %v6092_v10  ;;  %v2558_v57 = vand.u32 4294901760, %v2557_v23  ;;  %v698_v2 = vadd.f32 %v634_v44, %v392_v16 }
 0x1bb   : > { %v1639_v0 = vadd.f32 %v1575_v24, %v1408_v31  ;;  %v1343_v14 = vsel %vm1260_vm13, %v3969_v25, 0.0  ;;  %vm1491_vm14 = vcmp.eq.s32.totalorder %v6028_v42, %v4018_v36  ;;  %vm1726_vm15 = vcmp.eq.s32.totalorder %v6028_v42, %v4048_v53 }
 0x1bc   : > { %7329 = vst [vmem:[#allocation106_spill] sm:$0xff] %v6104_v8  ;;  %vm1957_vm1 = vcmp.eq.s32.totalorder %v6028_v42, %v4051_v58  ;;  %2244 = vmatprep.subr.mxu0 %v6104_v8  ;;  %2559 = vmatpush2.msra.mxu1 %v2558_v57  ;;  %v938_v30 = vadd.f32 %v874_v35, %v698_v2  ;;  %v1574_v9 = vsel %vm1491_vm14, %v3988_v7, 0.0  ;;  %v1809_v24 = vsel %vm1726_vm15, %v4009_v56, 0.0 }
 0x1bd   : > { %v1874_v40 = vadd.f32 %v1810_v12, %v1639_v0  ;;  %v2040_v31 = vsel %vm1957_vm1, %v4054_v13, 0.0  ;;  %v7142_v23 = vand.u32 4294901760, %v6032_v1  ;;  %vm308_vm2 = vcmp.eq.s32.totalorder %v6028_v42, %v4023_v34 }
 0x1be   : > { %vm550_vm3 = vcmp.eq.s32.totalorder %v6028_v42, %v4058_v54  ;;  %v1169_v44 = vadd.f32 %v1105_v26, %v938_v30  ;;  %v391_v12 = vsel %vm308_vm2, %v4035_v38, 0.0  ;;  %vm790_vm5 = vcmp.eq.s32.totalorder %v6028_v42, %v4078_v28 }
 0x1bf   : > { %v6122_v16 = vadd.f32 %v2041_v59, %v1874_v40  ;;  %v633_v35 = vsel %vm550_vm3, %v4068_v48, 0.0  ;;  %v2563_v0 = vsub.f32 %v6032_v1, %v7142_v23  ;;  %vm1021_vm6 = vcmp.eq.s32.totalorder %v6028_v42, %v4094_v33 }
 0x1c0   : > { %v697_v57 = vadd.f32 %v633_v35, %v391_v12  ;;  %v1407_v59 = vadd.f32 %v1343_v14, %v1169_v44  ;;  %v873_v26 = vsel %vm790_vm5, %v4084_v5, 0.0  ;;  %v1104_v40 = vsel %vm1021_vm6, %v4103_v46, 0.0 }
 0x1c1   : > { %v6134_v2 = vand.u32 4294901760, %v6122_v16  ;;  %v2564_v30 = vand.u32 4294901760, %v2563_v0  ;;  %vm1259_vm4 = vcmp.eq.s32.totalorder %v6028_v42, %v4106_v32  ;;  %vm1490_vm9 = vcmp.eq.s32.totalorder %v6028_v42, %v4114_v37 }
 0x1c2   : > { %v937_v17 = vadd.f32 %v873_v26, %v697_v57  ;;  %v1638_v12 = vadd.f32 %v1574_v9, %v1407_v59  ;;  %v1342_v35 = vsel %vm1259_vm4, %v4111_v41, 0.0  ;;  %v1573_v23 = vsel %vm1490_vm9, %v4131_v55, 0.0 }
 0x1c3   : > { %7330 = vst [vmem:[#allocation107_spill] sm:$0xff] %v6134_v2  ;;  %2246 = vmatpush2.msra.mxu0 %v6134_v2  ;;  %vm1725_vm10 = vcmp.eq.s32.totalorder %v6028_v42, %v4140_v21  ;;  %2565 = vmatprep.subr.mxu1 %v2564_v30  ;;  %vm1956_vm7 = vcmp.eq.s32.totalorder %v6028_v42, %v4151_v60  ;;  %v212_v59 = vadd.s32 152, %v7248_v15  ;;  %v6166_v42 = vadd.s32 144, %v7248_v15 }
 0x1c4   : > { %v1168_v14 = vadd.f32 %v1104_v40, %v937_v17  ;;  %v1808_v44 = vsel %vm1725_vm10, %v4148_v52, 0.0  ;;  %v6152_v0 = vsub.f32 %v5909_v20, %v5918_v18  ;;  %v1873_v57 = vadd.f32 %v1809_v24, %v1638_v12 }
 0x1c5   : > { %v2039_v9 = vsel %vm1956_vm7, %v4154_v22, 0.0  ;;  %v6158_v26 = vsub.f32 %v5946_v19, %v5957_v6  ;;  %v6163_v40 = vsub.f32 %v5984_v27, %v5995_v51  ;;  %vm307_vm11 = vcmp.eq.s32.totalorder %v212_v59, %v3861_v62 }
 0x1c6   : > { %7331 = vst [vmem:[#allocation108_spill] sm:$0xff] %v6152_v0  ;;  %v1406_v30 = vadd.f32 %v1342_v35, %v1168_v14  ;;  %v7145_v17 = vand.u32 4294901760, %v6152_v0  ;;  %v6168_v20 = vadd.f32 %v2040_v31, %v1873_v57  ;;  %vm549_vm12 = vcmp.eq.s32.totalorder %v212_v59, %v3871_v63 }
 0x1c7   : > { %7332 = vst [vmem:[#allocation109_spill] sm:$0xff] %v6158_v26  ;;  %7333 = vst [vmem:[#allocation110_spill] sm:$0xff] %v6163_v40  ;;  %vm789_vm0 = vcmp.eq.s32.totalorder %v212_v59, %v3953_v47  ;;  %v390_v12 = vsel %vm307_vm11, %v3875_v3, 0.0  ;;  %v632_v27 = vsel %vm549_vm12, %v3907_v29, 0.0  ;;  %vm1020_vm8 = vcmp.eq.s32.totalorder %v212_v59, %v3956_v49 }
 0x1c8   : > { %v1637_v19 = vadd.f32 %v1573_v23, %v1406_v30  ;;  %v2569_v24 = vsub.f32 %v6152_v0, %v7145_v17  ;;  %v6179_v35 = vand.u32 4294901760, %v6168_v20  ;;  %v696_v31 = vadd.f32 %v632_v27, %v390_v12 }
 0x1c9   : > { %v872_v14 = vsel %vm789_vm0, %v3942_v39, 0.0  ;;  %v1103_v23 = vsel %vm1020_vm8, %v3959_v50, 0.0  ;;  %vm1258_vm13 = vcmp.eq.s32.totalorder %v212_v59, %v4015_v61  ;;  %vm1489_vm14 = vcmp.eq.s32.totalorder %v212_v59, %v4018_v36 }
 0x1ca   : > { %7334 = vst [vmem:[#allocation111_spill] sm:$0xff] %v6179_v35  ;;  %v1872_v57 = vadd.f32 %v1808_v44, %v1637_v19  ;;  %v2570_v51 = vand.u32 4294901760, %v2569_v24  ;;  %2248 = vmatprep.subr.mxu0 %v6179_v35  ;;  %v936_v30 = vadd.f32 %v872_v14, %v696_v31  ;;  %v1341_v17 = vsel %vm1258_vm13, %v3969_v25, 0.0 }
 0x1cb   : > { %vm1724_vm15 = vcmp.eq.s32.totalorder %v212_v59, %v4048_v53  ;;  %v1572_v27 = vsel %vm1489_vm14, %v3988_v7, 0.0  ;;  %vm1955_vm1 = vcmp.eq.s32.totalorder %v212_v59, %v4051_v58  ;;  %v7152_v31 = vand.u32 4294901760, %v6158_v26 }
 0x1cc   : > { %v6189_v12 = vadd.f32 %v2039_v9, %v1872_v57  ;;  %2571 = vmatpush2.msra.mxu1 %v2570_v51  ;;  %v1807_v44 = vsel %vm1724_vm15, %v4009_v56, 0.0  ;;  %v1167_v19 = vadd.f32 %v1103_v23, %v936_v30  ;;  %v2038_v24 = vsel %vm1955_vm1, %v4054_v13, 0.0 }
 0x1cd   : > { %vm306_vm2 = vcmp.eq.s32.totalorder %v212_v59, %v4023_v34  ;;  %vm548_vm3 = vcmp.eq.s32.totalorder %v212_v59, %v4058_v54  ;;  %vm788_vm5 = vcmp.eq.s32.totalorder %v212_v59, %v4078_v28  ;;  %v2575_v57 = vsub.f32 %v6158_v26, %v7152_v31 }
 0x1ce   : > { %v6198_v14 = vand.u32 4294901760, %v6189_v12  ;;  %v389_v9 = vsel %vm306_vm2, %v4035_v38, 0.0  ;;  %v1405_v51 = vadd.f32 %v1341_v17, %v1167_v19  ;;  %v631_v23 = vsel %vm548_vm3, %v4068_v48, 0.0 }
 0x1cf   : > { %v871_v30 = vsel %vm788_vm5, %v4084_v5, 0.0  ;;  %v695_v6 = vadd.f32 %v631_v23, %v389_v9  ;;  %vm1019_vm6 = vcmp.eq.s32.totalorder %v212_v59, %v4094_v33  ;;  %vm1257_vm4 = vcmp.eq.s32.totalorder %v212_v59, %v4106_v32 }
 0x1d0   : > { %7335 = vst [vmem:[#allocation112_spill] sm:$0xff] %v6198_v14  ;;  %2250 = vmatpush2.msra.mxu0 %v6198_v14  ;;  %vm1488_vm9 = vcmp.eq.s32.totalorder %v212_v59, %v4114_v37  ;;  %v1636_v18 = vadd.f32 %v1572_v27, %v1405_v51  ;;  %v2576_v0 = vand.u32 4294901760, %v2575_v57  ;;  %v1102_v17 = vsel %vm1019_vm6, %v4103_v46, 0.0 }
 0x1d1   : > { %v1340_v19 = vsel %vm1257_vm4, %v4111_v41, 0.0  ;;  %v935_v31 = vadd.f32 %v871_v30, %v695_v6  ;;  %v1571_v26 = vsel %vm1488_vm9, %v4131_v55, 0.0  ;;  %vm1723_vm10 = vcmp.eq.s32.totalorder %v212_v59, %v4140_v21 }
 0x1d2   : > { %vm1954_vm7 = vcmp.eq.s32.totalorder %v212_v59, %v4151_v60  ;;  %v1871_v9 = vadd.f32 %v1807_v44, %v1636_v18  ;;  %2577 = vmatprep.subr.mxu1 %v2576_v0  ;;  %v1806_v23 = vsel %vm1723_vm10, %v4148_v52, 0.0  ;;  %v7157_v27 = vand.u32 4294901760, %v6163_v40 }
 0x1d3   : > { %v2037_v1 = vsel %vm1954_vm7, %v4154_v22, 0.0  ;;  %v1166_v51 = vadd.f32 %v1102_v17, %v935_v31  ;;  %vm305_vm11 = vcmp.eq.s32.totalorder %v6166_v42, %v3861_v62  ;;  %vm547_vm12 = vcmp.eq.s32.totalorder %v6166_v42, %v3871_v63 }
 0x1d4   : > { %vm787_vm0 = vcmp.eq.s32.totalorder %v6166_v42, %v3953_v47  ;;  %v6226_v6 = vadd.f32 %v2038_v24, %v1871_v9  ;;  %v2581_v18 = vsub.f32 %v6163_v40, %v7157_v27  ;;  %v388_v0 = vsel %vm305_vm11, %v3875_v3, 0.0 }
 0x1d5   : > { %v630_v59 = vsel %vm547_vm12, %v3907_v29, 0.0  ;;  %v1404_v44 = vadd.f32 %v1340_v19, %v1166_v51  ;;  %v870_v57 = vsel %vm787_vm0, %v3942_v39, 0.0  ;;  %vm1018_vm8 = vcmp.eq.s32.totalorder %v6166_v42, %v3956_v49 }
 0x1d6   : > { %v694_v31 = vadd.f32 %v630_v59, %v388_v0  ;;  %v6237_v30 = vand.u32 4294901760, %v6226_v6  ;;  %v2582_v24 = vand.u32 4294901760, %v2581_v18  ;;  %v1101_v17 = vsel %vm1018_vm8, %v3959_v50, 0.0 }
 0x1d7   : > { %vm1256_vm13 = vcmp.eq.s32.totalorder %v6166_v42, %v4015_v61  ;;  %v1635_v9 = vadd.f32 %v1571_v26, %v1404_v44  ;;  %vm1487_vm14 = vcmp.eq.s32.totalorder %v6166_v42, %v4018_v36  ;;  %vm1722_vm15 = vcmp.eq.s32.totalorder %v6166_v42, %v4048_v53 }
 0x1d8   : > { %7336 = vst [vmem:[#allocation113_spill] sm:$0xff] %v6237_v30  ;;  %v934_v27 = vadd.f32 %v870_v57, %v694_v31  ;;  %v1339_v40 = vsel %vm1256_vm13, %v3969_v25, 0.0  ;;  %2252 = vmatprep.subr.mxu0 %v6237_v30  ;;  %2583 = vmatpush2.msra.mxu1 %v2582_v24  ;;  %v1570_v19 = vsel %vm1487_vm14, %v3988_v7, 0.0  ;;  %vm1953_vm1 = vcmp.eq.s32.totalorder %v6166_v42, %v4051_v58 }
 0x1d9   : > { %v6253_v26 = vsub.f32 %v6015_v43, %v6035_v4  ;;  %v1870_v51 = vadd.f32 %v1806_v23, %v1635_v9  ;;  %v1805_v0 = vsel %vm1722_vm15, %v4009_v56, 0.0  ;;  %v2036_v59 = vsel %vm1953_vm1, %v4054_v13, 0.0 }
 0x1da   : > { %v1165_v18 = vadd.f32 %v1101_v17, %v934_v27  ;;  %vm304_vm2 = vcmp.eq.s32.totalorder %v6166_v42, %v4023_v34  ;;  %vm546_vm3 = vcmp.eq.s32.totalorder %v6166_v42, %v4058_v54  ;;  %vm786_vm5 = vcmp.eq.s32.totalorder %v6166_v42, %v4078_v28 }
 0x1db   : > { %7337 = vst [vmem:[#allocation114_spill] sm:$0xff] %v6253_v26  ;;  %v7162_v44 = vand.u32 4294901760, %v6253_v26  ;;  %v6264_v31 = vadd.f32 %v2037_v1, %v1870_v51  ;;  %v387_v23 = vsel %vm304_vm2, %v4035_v38, 0.0  ;;  %v629_v27 = vsel %vm546_vm3, %v4068_v48, 0.0 }
 0x1dc   : > { %v1403_v43 = vadd.f32 %v1339_v40, %v1165_v18  ;;  %v693_v24 = vadd.f32 %v629_v27, %v387_v23  ;;  %v869_v17 = vsel %vm786_vm5, %v4084_v5, 0.0  ;;  %vm1017_vm6 = vcmp.eq.s32.totalorder %v6166_v42, %v4094_v33 }
 0x1dd   : > { %v2587_v57 = vsub.f32 %v6253_v26, %v7162_v44  ;;  %v6275_v9 = vand.u32 4294901760, %v6264_v31  ;;  %v1100_v40 = vsel %vm1017_vm6, %v4103_v46, 0.0  ;;  %vm1255_vm4 = vcmp.eq.s32.totalorder %v6166_v42, %v4106_v32 }
 0x1de   : > { %v1634_v1 = vadd.f32 %v1570_v19, %v1403_v43  ;;  %v933_v18 = vadd.f32 %v869_v17, %v693_v24  ;;  %v1338_v4 = vsel %vm1255_vm4, %v4111_v41, 0.0  ;;  %vm1486_vm9 = vcmp.eq.s32.totalorder %v6166_v42, %v4114_v37  ;;  %v7339_v24 = vld [vmem:[#allocation104_spill] sm:$0xff] }
 0x1df   : > { %7338 = vst [vmem:[#allocation115_spill] sm:$0xff] %v6275_v9  ;;  %v2588_v51 = vand.u32 4294901760, %v2587_v57  ;;  %2254 = vmatpush2.msra.mxu0 %v6275_v9  ;;  %v1569_v27 = vsel %vm1486_vm9, %v4131_v55, 0.0  ;;  %vm1721_vm10 = vcmp.eq.s32.totalorder %v6166_v42, %v4140_v21  ;;  %vm1952_vm7 = vcmp.eq.s32.totalorder %v6166_v42, %v4151_v60 }
 0x1e0   : > { %v1869_v23 = vadd.f32 %v1805_v0, %v1634_v1  ;;  %v1164_v19 = vadd.f32 %v1100_v40, %v933_v18  ;;  %v1804_v43 = vsel %vm1721_vm10, %v4148_v52, 0.0  ;;  %v2035_v57 = vsel %vm1952_vm7, %v4154_v22, 0.0 }
 0x1e1   : > { %2589 = vmatprep.subr.mxu1 %v2588_v51  ;;  %v6293_v17 = vsub.f32 %v7339_v24, %v6063_v45  ;;  %v210_v0 = vadd.s32 136, %v7248_v15  ;;  %v6300_v1 = vsub.f32 %v6092_v10, %v6104_v8  ;;  %v6304_v42 = vsub.f32 %v6122_v16, %v6134_v2 }
 0x1e2   : > { %v6295_v44 = vadd.f32 %v2036_v59, %v1869_v23  ;;  %v1402_v40 = vadd.f32 %v1338_v4, %v1164_v19  ;;  %v6308_v18 = vadd.s32 128, %v7248_v15  ;;  %v6312_v59 = vsub.f32 %v6168_v20, %v6179_v35 }
 0x1e3   : > { %7340 = vst [vmem:[#allocation104_spill] sm:$0xff] %v6293_v17  ;;  %7341 = vst [vmem:[#allocation116_spill] sm:$0xff] %v6300_v1  ;;  %v7167_v51 = vand.u32 4294901760, %v6293_v17  ;;  %vm303_vm11 = vcmp.eq.s32.totalorder %v210_v0, %v3861_v62  ;;  %vm545_vm12 = vcmp.eq.s32.totalorder %v210_v0, %v3871_v63  ;;  %vm785_vm0 = vcmp.eq.s32.totalorder %v210_v0, %v3953_v47 }
 0x1e4   : > { %v6315_v23 = vand.u32 4294901760, %v6295_v44  ;;  %v1633_v10 = vadd.f32 %v1569_v27, %v1402_v40  ;;  %v386_v16 = vsel %vm303_vm11, %v3875_v3, 0.0  ;;  %v628_v19 = vsel %vm545_vm12, %v3907_v29, 0.0 }
 0x1e5   : > { %v2593_v4 = vsub.f32 %v6293_v17, %v7167_v51  ;;  %v692_v20 = vadd.f32 %v628_v19, %v386_v16  ;;  %v868_v24 = vsel %vm785_vm0, %v3942_v39, 0.0  ;;  %vm1016_vm8 = vcmp.eq.s32.totalorder %v210_v0, %v3956_v49 }
 0x1e6   : > { %2256 = vmatprep.subr.mxu0 %v6315_v23  ;;  %vm1254_vm13 = vcmp.eq.s32.totalorder %v210_v0, %v4015_v61  ;;  %v1868_v35 = vadd.f32 %v1804_v43, %v1633_v10  ;;  %v1099_v27 = vsel %vm1016_vm8, %v3959_v50, 0.0  ;;  %vm1485_vm14 = vcmp.eq.s32.totalorder %v210_v0, %v4018_v36 }
 0x1e7   : > { %v2594_v2 = vand.u32 4294901760, %v2593_v4  ;;  %v1337_v40 = vsel %vm1254_vm13, %v3969_v25, 0.0  ;;  %v932_v51 = vadd.f32 %v868_v24, %v692_v20  ;;  %vm1720_vm15 = vcmp.eq.s32.totalorder %v210_v0, %v4048_v53 }
 0x1e8   : > { %vm1951_vm1 = vcmp.eq.s32.totalorder %v210_v0, %v4051_v58  ;;  %v6334_v16 = vadd.f32 %v2035_v57, %v1868_v35  ;;  %v1568_v19 = vsel %vm1485_vm14, %v3988_v7, 0.0  ;;  %v1803_v8 = vsel %vm1720_vm15, %v4009_v56, 0.0 }
 0x1e9   : > { %2595 = vmatpush2.msra.mxu1 %v2594_v2  ;;  %v2034_v43 = vsel %vm1951_vm1, %v4054_v13, 0.0  ;;  %v1163_v10 = vadd.f32 %v1099_v27, %v932_v51  ;;  %v7174_v4 = vand.u32 4294901760, %v6300_v1  ;;  %vm302_vm2 = vcmp.eq.s32.totalorder %v210_v0, %v4023_v34 }
 0x1ea   : > { %7342 = vst [vmem:[#allocation117_spill] sm:$0xff] %v6334_v16  ;;  %vm544_vm3 = vcmp.eq.s32.totalorder %v210_v0, %v4058_v54  ;;  %v6343_v20 = vand.u32 4294901760, %v6334_v16  ;;  %v385_v35 = vsel %vm302_vm2, %v4035_v38, 0.0  ;;  %vm784_vm5 = vcmp.eq.s32.totalorder %v210_v0, %v4078_v28 }
 0x1eb   : > { %v627_v2 = vsel %vm544_vm3, %v4068_v48, 0.0  ;;  %v1401_v57 = vadd.f32 %v1337_v40, %v1163_v10  ;;  %v2599_v51 = vsub.f32 %v6300_v1, %v7174_v4  ;;  %v867_v27 = vsel %vm784_vm5, %v4084_v5, 0.0 }
 0x1ec   : > { %v691_v24 = vadd.f32 %v627_v2, %v385_v35  ;;  %2258 = vmatpush2.msra.mxu0 %v6343_v20  ;;  %vm1015_vm6 = vcmp.eq.s32.totalorder %v210_v0, %v4094_v33  ;;  %vm1253_vm4 = vcmp.eq.s32.totalorder %v210_v0, %v4106_v32  ;;  %vm1484_vm9 = vcmp.eq.s32.totalorder %v210_v0, %v4114_v37 }
 0x1ed   : > { %vm1719_vm10 = vcmp.eq.s32.totalorder %v210_v0, %v4140_v21  ;;  %v1632_v45 = vadd.f32 %v1568_v19, %v1401_v57  ;;  %v2600_v17 = vand.u32 4294901760, %v2599_v51  ;;  %v1098_v10 = vsel %vm1015_vm6, %v4103_v46, 0.0 }
 0x1ee   : > { %v931_v40 = vadd.f32 %v867_v27, %v691_v24  ;;  %v1336_v4 = vsel %vm1253_vm4, %v4111_v41, 0.0  ;;  %v1567_v35 = vsel %vm1484_vm9, %v4131_v55, 0.0  ;;  %v1802_v2 = vsel %vm1719_vm10, %v4148_v52, 0.0 }
 0x1ef   : > { %vm1950_vm7 = vcmp.eq.s32.totalorder %v210_v0, %v4151_v60  ;;  %v1867_v1 = vadd.f32 %v1803_v8, %v1632_v45  ;;  %2601 = vmatprep.subr.mxu1 %v2600_v17  ;;  %v7192_v16 = vand.u32 4294901760, %v6304_v42  ;;  %vm301_vm11 = vcmp.eq.s32.totalorder %v6308_v18, %v3861_v62 }
 0x1f0   : > { %v1162_v26 = vadd.f32 %v1098_v10, %v931_v40  ;;  %v2033_v11 = vsel %vm1950_vm7, %v4154_v22, 0.0  ;;  %vm543_vm12 = vcmp.eq.s32.totalorder %v6308_v18, %v3871_v63  ;;  %vm783_vm0 = vcmp.eq.s32.totalorder %v6308_v18, %v3953_v47 }
 0x1f1   : > { %vm1014_vm8 = vcmp.eq.s32.totalorder %v6308_v18, %v3956_v49  ;;  %v6372_v0 = vadd.f32 %v2034_v43, %v1867_v1  ;;  %v2605_v8 = vsub.f32 %v6304_v42, %v7192_v16  ;;  %v384_v17 = vsel %vm301_vm11, %v3875_v3, 0.0  ;;  %v7382_v16 = vld [vmem:[#allocation54_spill] sm:$0xff] }
 0x1f2   : > { %v1400_v45 = vadd.f32 %v1336_v4, %v1162_v26  ;;  %v626_v62 = vsel %vm543_vm12, %v3907_v29, 0.0  ;;  %v866_v19 = vsel %vm783_vm0, %v3942_v39, 0.0  ;;  %v1097_v63 = vsel %vm1014_vm8, %v3959_v50, 0.0 }
 0x1f3   : > { %vm1252_vm13 = vcmp.eq.s32.totalorder %v6308_v18, %v4015_v61  ;;  %v6384_v47 = vand.u32 4294901760, %v6372_v0  ;;  %v2606_v26 = vand.u32 4294901760, %v2605_v8  ;;  %v690_v1 = vadd.f32 %v626_v62, %v384_v17 }
 0x1f4   : > { %v1631_v49 = vadd.f32 %v1567_v35, %v1400_v45  ;;  %v1335_v43 = vsel %vm1252_vm13, %v3969_v25, 0.0  ;;  %vm1483_vm14 = vcmp.eq.s32.totalorder %v6308_v18, %v4018_v36  ;;  %vm1718_vm15 = vcmp.eq.s32.totalorder %v6308_v18, %v4048_v53 }
 0x1f5   : > { %vm1949_vm1 = vcmp.eq.s32.totalorder %v6308_v18, %v4051_v58  ;;  %2260 = vmatprep.subr.mxu0 %v6384_v47  ;;  %2607 = vmatpush2.msra.mxu1 %v2606_v26  ;;  %v930_v29 = vadd.f32 %v866_v19, %v690_v1  ;;  %v1566_v39 = vsel %vm1483_vm14, %v3988_v7, 0.0  ;;  %v1801_v50 = vsel %vm1718_vm15, %v4009_v56, 0.0 }
 0x1f6   : > { %v1866_v3 = vadd.f32 %v1802_v2, %v1631_v49  ;;  %v2032_v25 = vsel %vm1949_vm1, %v4054_v13, 0.0  ;;  %v7191_v61 = vand.u32 4294901760, %v6312_v59  ;;  %vm300_vm2 = vcmp.eq.s32.totalorder %v6308_v18, %v4023_v34 }
 0x1f7   : > { %vm542_vm3 = vcmp.eq.s32.totalorder %v6308_v18, %v4058_v54  ;;  %v1161_v53 = vadd.f32 %v1097_v63, %v930_v29  ;;  %v383_v58 = vsel %vm300_vm2, %v4035_v38, 0.0  ;;  %vm782_vm5 = vcmp.eq.s32.totalorder %v6308_v18, %v4078_v28 }
 0x1f8   : > { %v6403_v36 = vadd.f32 %v2033_v11, %v1866_v3  ;;  %v625_v7 = vsel %vm542_vm3, %v4068_v48, 0.0  ;;  %v2611_v56 = vsub.f32 %v6312_v59, %v7191_v61  ;;  %vm1013_vm6 = vcmp.eq.s32.totalorder %v6308_v18, %v4094_v33  ;;  %v7381_v61 = vld [vmem:[#allocation7_spill] sm:$0xff] }
 0x1f9   : > { %v689_v13 = vadd.f32 %v625_v7, %v383_v58  ;;  %v1399_v54 = vadd.f32 %v1335_v43, %v1161_v53  ;;  %v865_v11 = vsel %vm782_vm5, %v4084_v5, 0.0  ;;  %v1096_v38 = vsel %vm1013_vm6, %v4103_v46, 0.0  ;;  %v7345_v43 = vld [vmem:[#allocation117_spill] sm:$0xff] }
 0x1fa   : > { %v6415_v34 = vand.u32 4294901760, %v6403_v36  ;;  %v2612_v48 = vand.u32 4294901760, %v2611_v56  ;;  %vm1251_vm4 = vcmp.eq.s32.totalorder %v6308_v18, %v4106_v32  ;;  %vm1482_vm9 = vcmp.eq.s32.totalorder %v6308_v18, %v4114_v37  ;;  %v2127_v37 = vld [vmem:[%s180_s7] sm:$0x3] }
 0x1fb   : > { %v929_v4 = vadd.f32 %v865_v11, %v689_v13  ;;  %v1630_v28 = vadd.f32 %v1566_v39, %v1399_v54  ;;  %v1334_v33 = vsel %vm1251_vm4, %v4111_v41, 0.0  ;;  %v1565_v5 = vsel %vm1482_vm9, %v4131_v55, 0.0 }
 0x1fc   : > { %2262 = vmatpush2.msra.mxu0 %v6415_v34  ;;  %vm1717_vm10 = vcmp.eq.s32.totalorder %v6308_v18, %v4140_v21  ;;  %2613 = vmatprep.subr.mxu1 %v2612_v48  ;;  %vm1948_vm7 = vcmp.eq.s32.totalorder %v6308_v18, %v4151_v60  ;;  %v6436_v32 = vsub.f32 %v6189_v12, %v6198_v14  ;;  %v2131_v55 = vsub.s32 0, %v7248_v15 }
 0x1fd   : > { %v1160_v46 = vadd.f32 %v1096_v38, %v929_v4  ;;  %v1800_v57 = vsel %vm1717_vm10, %v4148_v52, 0.0  ;;  %v1865_v51 = vadd.f32 %v1801_v50, %v1630_v28  ;;  %v2031_v41 = vsel %vm1948_vm7, %v4154_v22, 0.0 }
 0x1fe   : > { %v2135_v24 = vsub.s32 1, %v7248_v15  ;;  %v7190_v27 = vand.u32 4294901760, %v6436_v32  ;;  %v6444_v52 = vsub.f32 %v6226_v6, %v6237_v30  ;;  %v6448_v60 = vsub.f32 %v6264_v31, %v6275_v9  ;;  %v7385_v15 = vld [vmem:[#allocation33_spill] sm:$0xff] }
 0x1ff   : > { %v1398_v21 = vadd.f32 %v1334_v33, %v1160_v46  ;;  %v2096_v12 = vadd.f32 %v2032_v25, %v1865_v51  ;;  %v2132_v18 = vrot.slane %v2127_v37, %v2131_v55  ;;  %v6452_v22 = vsub.f32 %v6295_v44, %v6315_v23 }
 0x200   : > { %v2136_v40 = vrot.slane %v2127_v37, %v2135_v24  ;;  %v2617_v35 = vsub.f32 %v6436_v32, %v7190_v27  ;;  %v7189_v2 = vand.u32 4294901760, %v6444_v52  ;;  %v7188_v6 = vand.u32 4294901760, %v6448_v60  ;;  %v7380_v27 = vld [vmem:[#allocation53_spill] sm:$0xff] }
 0x201   : > { %v1629_v10 = vadd.f32 %v1565_v5, %v1398_v21  ;;  %v6459_v45 = vand.u32 4294901760, %v2096_v12  ;;  %v6463_v8 = vand.u32 4294901760, %v2132_v18  ;;  %v7187_v17 = vand.u32 4294901760, %v6452_v22 }
 0x202   : > { %v6461_v31 = vand.u32 4294901760, %v2136_v40  ;;  %v2618_v44 = vand.u32 4294901760, %v2617_v35  ;;  %v2623_v19 = vsub.f32 %v6444_v52, %v7189_v2  ;;  %v2629_v63 = vsub.f32 %v6448_v60, %v7188_v6  ;;  %v7348_v35 = vld [vmem:[#allocation19_spill] sm:$0xff]  ;;  %v7378_v6 = vld [vmem:[#allocation52_spill] sm:$0xff] }
 0x203   : > { %7344 = vst [vmem:[#allocation119_spill] sm:$0xff] %v6463_v8  ;;  %v1864_v62 = vadd.f32 %v1800_v57, %v1629_v10  ;;  %2264 = vmatprep.subr.mxu0 %v6459_v45  ;;  %v6477_v26 = vsub.f32 %v2132_v18, %v6463_v8  ;;  %v2635_v1 = vsub.f32 %v6452_v22, %v7187_v17  ;;  %v7346_v57 = vld [vmem:[#allocation15_spill] sm:$0xff]  ;;  %v7347_v10 = vld [vmem:[#allocation17_spill] sm:$0xff]  ;;  %v7377_v17 = vld [vmem:[#allocation26_spill] sm:$0xff] }
 0x204   : > { %7343 = vst [vmem:[#allocation118_spill] sm:$0xff] %v6461_v31  ;;  %v6474_v49 = vsub.f32 %v2136_v40, %v6461_v31  ;;  %v6484_v3 = vsub.f32 %v7345_v43, %v6343_v20  ;;  %2619 = vmatpush2.msra.mxu1 %v2618_v44  ;;  %v2624_v39 = vand.u32 4294901760, %v2623_v19  ;;  %v2630_v50 = vand.u32 4294901760, %v2629_v63  ;;  %2669 = vmatprep.mubr.f32.mxu1 %v6461_v31  ;;  %v7349_v44 = vld [vmem:[#allocation21_spill] sm:$0xff]  ;;  %v7350_v19 = vld [vmem:[#allocation23_spill] sm:$0xff]  ;;  %v7353_v43 = vld [vmem:[#allocation6_spill] sm:$0xff] }
 0x205   : > { %v2095_v29 = vadd.f32 %v2031_v41, %v1864_v62  ;;  %v6488_v25 = vsub.f32 %v6372_v0, %v6384_v47  ;;  %v7193_v58 = vand.u32 4294901760, %v6477_v26  ;;  %v2636_v7 = vand.u32 4294901760, %v2635_v1  ;;  %v7351_v63 = vld [vmem:[#allocation25_spill] sm:$0xff]  ;;  %v7379_v2 = vld [vmem:[#allocation27_spill] sm:$0xff] }
 0x206   : > { %v7194_v53 = vand.u32 4294901760, %v6474_v49  ;;  %v7186_v56 = vand.u32 4294901760, %v6484_v3  ;;  %2625 = vmatprep.subr.mxu1 %v2624_v39  ;;  %v6499_v11 = vsub.f32 %v6403_v36, %v6415_v34  ;;  %v6502_v0 = vsub.f32 %v2096_v12, %v6459_v45  ;;  %v7352_v1 = vld [vmem:[#allocation13_spill] sm:$0xff]  ;;  %v7355_v39 = vld [vmem:[#allocation8_spill] sm:$0xff]  ;;  %v7387_v31 = vld [vmem:[#allocation35_spill] sm:$0xff] }
 0x207   : > { %v6494_v13 = vand.u32 4294901760, %v2095_v29  ;;  %v7185_v54 = vand.u32 4294901760, %v6488_v25  ;;  %v2276_v48 = vsub.f32 %v6477_v26, %v7193_v58  ;;  %2631 = vmatpush2.msra.mxu1 %v2630_v50  ;;  %v7356_v50 = vld [vmem:[#allocation29_spill] sm:$0xff]  ;;  %v7383_v58 = vld [vmem:[#allocation30_spill] sm:$0xff] }
 0x208   : > { %v2270_v38 = vsub.f32 %v6474_v49, %v7194_v53  ;;  %v2641_v4 = vsub.f32 %v6484_v3, %v7186_v56  ;;  %2637 = vmatprep.subr.mxu1 %v2636_v7  ;;  %v7184_v28 = vand.u32 4294901760, %v6499_v11  ;;  %v7183_v33 = vand.u32 4294901760, %v6502_v0  ;;  %v7357_v7 = vld [vmem:[#allocation9_spill] sm:$0xff]  ;;  %v7376_v56 = vld [vmem:[#allocation50_spill] sm:$0xff] }
 0x209   : > { %2266 = vmatpush2.msra.mxu0 %v6494_v13  ;;  %v2647_v36 = vsub.f32 %v6488_v25, %v7185_v54  ;;  %v6520_v5 = vsub.f32 %v2095_v29, %v6494_v13  ;;  %v2277_v37 = vand.u32 4294901760, %v2276_v48  ;;  %v7354_v29 = vld [vmem:[#allocation28_spill] sm:$0xff]  ;;  %v7359_v48 = vld [vmem:[#allocation10_spill] sm:$0xff] }
 0x20a   : > { %v2271_v46 = vand.u32 4294901760, %v2270_v38  ;;  %2679 = vmatprep.subr.mxu0 %v7346_v57  ;;  %v2642_v51 = vand.u32 4294901760, %v2641_v4  ;;  %v2653_v55 = vsub.f32 %v6499_v11, %v7184_v28  ;;  %v2659_v24 = vsub.f32 %v6502_v0, %v7183_v33  ;;  %v7358_v38 = vld [vmem:[#allocation31_spill] sm:$0xff]  ;;  %v7360_v4 = vld [vmem:[#allocation32_spill] sm:$0xff]  ;;  %v7373_v33 = vld [vmem:[#allocation22_spill] sm:$0xff] }
 0x20b   : > { %v2648_v41 = vand.u32 4294901760, %v2647_v36  ;;  %v7182_v21 = vand.u32 4294901760, %v6520_v5  ;;  %v7361_v36 = vld [vmem:[#allocation11_spill] sm:$0xff]  ;;  %v7374_v28 = vld [vmem:[#allocation45_spill] sm:$0xff]  ;;  %v7375_v54 = vld [vmem:[#allocation24_spill] sm:$0xff] }
 0x20c   : > { %2272 = vmatprep.mubr.f32.mxu0 %v2271_v46  ;;  %2643 = vmatpush2.msra.mxu1 %v2642_v51  ;;  %v2654_v12 = vand.u32 4294901760, %v2653_v55  ;;  %v2660_v18 = vand.u32 4294901760, %v2659_v24  ;;  %v7362_v46 = vld [vmem:[#allocation34_spill] sm:$0xff]  ;;  %v7364_v51 = vld [vmem:[#allocation36_spill] sm:$0xff]  ;;  %v7366_v55 = vld [vmem:[#allocation37_spill] sm:$0xff] }
 0x20d   : > { %2278 = vmatmul.mubr.f32.vlgmr.msra.gmra.mxu0 %v2277_v37  ;;  %2649 = vmatprep.subr.mxu1 %v2648_v41  ;;  %v2665_v40 = vsub.f32 %v6520_v5, %v7182_v21  ;;  %v7363_v37 = vld [vmem:[#allocation12_spill] sm:$0xff]  ;;  %v7365_v41 = vld [vmem:[#allocation14_spill] sm:$0xff] }
 0x20e   : > { %2682 = vmatpush1.msra.mxu0 %v7347_v10  ;;  %2871 = vmatprep.mubr.f32.mxu0 %v6474_v49  ;;  %v7367_v24 = vld [vmem:[#allocation16_spill] sm:$0xff]  ;;  %v7384_v53 = vld [vmem:[#allocation58_spill] sm:$0xff] }
 0x20f   : > { %2685 = vmatprep.subr.mxu0 %v7348_v35  ;;  %2655 = vmatpush2.msra.mxu1 %v2654_v12  ;;  %v2666_v62 = vand.u32 4294901760, %v2665_v40  ;;  %v7368_v12 = vld [vmem:[#allocation41_spill] sm:$0xff]  ;;  %v7370_v40 = vld [vmem:[#allocation43_spill] sm:$0xff]  ;;  %v7372_v21 = vld [vmem:[#allocation44_spill] sm:$0xff] }
 0x210   : > { %2688 = vmatpush1.msra.mxu0 %v7349_v44  ;;  %2661 = vmatprep.subr.mxu1 %v2660_v18  ;;  %v7369_v18 = vld [vmem:[#allocation18_spill] sm:$0xff] }
 0x211   : > { %2691 = vmatprep.subr.mxu0 %v7350_v19  ;;  %2667 = vmatpush2.msra.mxu1 %v2666_v62  ;;  %v7371_v62 = vld [vmem:[#allocation20_spill] sm:$0xff] }
 0x212   : > { %2694 = vmatpush1.msra.mxu0 %v7351_v63  ;;  %2671 = vmatmul.mubr.f32.vlgmr.msra.gmra.mxu1 %v6463_v8  ;;  %v7386_v8 = vld [vmem:[#allocation47_spill] sm:$0xff] }
 0x213   : > { %2697 = vmatprep.subr.mxu0 %v7352_v1  ;;  %2881 = vmatprep.subr.mxu1 %v7353_v43 }
 0x214   : > { %2700 = vmatpush1.msra.mxu0 %v7354_v29  ;;  %2883 = vmatpush1.msra.mxu1 %v7355_v39 }
 0x215   : > { %2703 = vmatprep.subr.mxu0 %v7356_v50  ;;  %2885 = vmatprep.subr.mxu1 %v7357_v7 }
 0x216   : > { %2706 = vmatpush1.msra.mxu0 %v7358_v38  ;;  %2887 = vmatpush1.msra.mxu1 %v7359_v48 }
 0x217   : > { %2709 = vmatprep.subr.mxu0 %v7360_v4  ;;  %2889 = vmatprep.subr.mxu1 %v7361_v36 }
 0x218   : > { %2712 = vmatpush1.msra.mxu0 %v7362_v46  ;;  %2891 = vmatpush1.msra.mxu1 %v7363_v37 }
 0x219   : > { %2715 = vmatprep.subr.mxu0 %v7364_v51  ;;  %2893 = vmatprep.subr.mxu1 %v7365_v41 }
 0x21a   : > { %2718 = vmatpush1.msra.mxu0 %v7366_v55  ;;  %2895 = vmatpush1.msra.mxu1 %v7367_v24 }
 0x21b   : > { %2721 = vmatprep.subr.mxu0 %v7368_v12  ;;  %2897 = vmatprep.subr.mxu1 %v7369_v18 }
 0x21c   : > { %2724 = vmatpush1.msra.mxu0 %v7370_v40  ;;  %2899 = vmatpush1.msra.mxu1 %v7371_v62 }
 0x21d   : > { %2727 = vmatprep.subr.mxu0 %v7372_v21  ;;  %2901 = vmatprep.subr.mxu1 %v7373_v33 }
 0x21e   : > { %2730 = vmatpush1.msra.mxu0 %v7374_v28  ;;  %2903 = vmatpush1.msra.mxu1 %v7375_v54  ;;  %v7389_v54 = vld [vmem:[#allocation38_spill] sm:$0xff] }
 0x21f   : > { %2733 = vmatprep.subr.mxu0 %v7376_v56  ;;  %2905 = vmatprep.subr.mxu1 %v7377_v17  ;;  %v7388_v17 = vld [vmem:[#allocation60_spill] sm:$0xff] }
 0x220   : > { %2736 = vmatpush1.msra.mxu0 %v7378_v6  ;;  %2907 = vmatpush1.msra.mxu1 %v7379_v2  ;;  %v7390_v2 = vld [vmem:[#allocation61_spill] sm:$0xff] }
 0x221   : > { %2739 = vmatprep.subr.mxu0 %v7380_v27  ;;  %2909 = vmatprep.subr.mxu1 %v7381_v61  ;;  %v7391_v27 = vld [vmem:[#allocation39_spill] sm:$0xff]  ;;  %v7392_v61 = vld [vmem:[#allocation65_spill] sm:$0xff] }
 0x222   : > { %2742 = vmatpush1.msra.mxu0 %v7382_v16  ;;  %2911 = vmatpush1.msra.mxu1 %v7383_v58  ;;  %v7393_v16 = vld [vmem:[#allocation40_spill] sm:$0xff]  ;;  %v7394_v58 = vld [vmem:[#allocation67_spill] sm:$0xff] }
 0x223   : > { %2745 = vmatprep.subr.mxu0 %v7384_v53  ;;  %2913 = vmatprep.subr.mxu1 %v7385_v15  ;;  %v7395_v53 = vld [vmem:[#allocation42_spill] sm:$0xff]  ;;  %v7396_v15 = vld [vmem:[#allocation68_spill] sm:$0xff] }
 0x224   : > { %2748 = vmatpush1.msra.mxu0 %v7386_v8  ;;  %2915 = vmatpush1.msra.mxu1 %v7387_v31  ;;  %v7397_v8 = vld [vmem:[#allocation46_spill] sm:$0xff]  ;;  %v7398_v31 = vld [vmem:[#allocation69_spill] sm:$0xff] }
 0x225   : > { %2751 = vmatprep.subr.mxu0 %v7388_v17  ;;  %2917 = vmatprep.subr.mxu1 %v7389_v54  ;;  %v7399_v17 = vld [vmem:[#allocation48_spill] sm:$0xff]  ;;  %v7400_v54 = vld [vmem:[#allocation70_spill] sm:$0xff] }
 0x226   : > { %2754 = vmatpush1.msra.mxu0 %v7390_v2  ;;  %2919 = vmatpush1.msra.mxu1 %v7391_v27  ;;  %v7401_v2 = vld [vmem:[#allocation49_spill] sm:$0xff]  ;;  %v7402_v27 = vld [vmem:[#allocation76_spill] sm:$0xff] }
 0x227   : > { %2757 = vmatprep.subr.mxu0 %v7392_v61  ;;  %2921 = vmatprep.subr.mxu1 %v7393_v16  ;;  %v7403_v61 = vld [vmem:[#allocation51_spill] sm:$0xff]  ;;  %v7404_v16 = vld [vmem:[#allocation77_spill] sm:$0xff] }
 0x228   : > { %2760 = vmatpush1.msra.mxu0 %v7394_v58  ;;  %2923 = vmatpush1.msra.mxu1 %v7395_v53  ;;  %v7405_v58 = vld [vmem:[#allocation55_spill] sm:$0xff]  ;;  %v7406_v53 = vld [vmem:[#allocation78_spill] sm:$0xff] }
 0x229   : > { %2763 = vmatprep.subr.mxu0 %v7396_v15  ;;  %2925 = vmatprep.subr.mxu1 %v7397_v8  ;;  %v7407_v15 = vld [vmem:[#allocation56_spill] sm:$0xff]  ;;  %v7408_v8 = vld [vmem:[#allocation82_spill] sm:$0xff] }
 0x22a   : > { %2766 = vmatpush1.msra.mxu0 %v7398_v31  ;;  %2927 = vmatpush1.msra.mxu1 %v7399_v17  ;;  %v7409_v31 = vld [vmem:[#allocation57_spill] sm:$0xff]  ;;  %v7410_v17 = vld [vmem:[#allocation72_spill] sm:$0xff] }
 0x22b   : > { %2769 = vmatprep.subr.mxu0 %v7400_v54  ;;  %2929 = vmatprep.subr.mxu1 %v7401_v2  ;;  %v7411_v54 = vld [vmem:[#allocation59_spill] sm:$0xff]  ;;  %v7412_v2 = vld [vmem:[#allocation84_spill] sm:$0xff] }
 0x22c   : > { %2772 = vmatpush1.msra.mxu0 %v7402_v27  ;;  %2931 = vmatpush1.msra.mxu1 %v7403_v61  ;;  %v7413_v27 = vld [vmem:[#allocation62_spill] sm:$0xff]  ;;  %v7414_v61 = vld [vmem:[#allocation85_spill] sm:$0xff] }
 0x22d   : > { %2775 = vmatprep.subr.mxu0 %v7404_v16  ;;  %2933 = vmatprep.subr.mxu1 %v7405_v58  ;;  %v7415_v16 = vld [vmem:[#allocation63_spill] sm:$0xff]  ;;  %v7416_v58 = vld [vmem:[#allocation86_spill] sm:$0xff] }
 0x22e   : > { %2778 = vmatpush2.msra.mxu0 %v7406_v53  ;;  %2935 = vmatpush1.msra.mxu1 %v7407_v15  ;;  %v7417_v53 = vld [vmem:[#allocation64_spill] sm:$0xff] }
 0x22f   : > { %2781 = vmatprep.subr.mxu0 %v7408_v8  ;;  %2937 = vmatprep.subr.mxu1 %v7409_v31  ;;  %v7418_v15 = vld [vmem:[#allocation92_spill] sm:$0xff]  ;;  %v7419_v8 = vld [vmem:[#allocation66_spill] sm:$0xff]  ;;  %v7420_v31 = vld [vmem:[#allocation93_spill] sm:$0xff] }
 0x230   : > { %2784 = vmatpush2.msra.mxu0 %v7410_v17  ;;  %2939 = vmatpush1.msra.mxu1 %v7411_v54  ;;  %v7421_v17 = vld [vmem:[#allocation71_spill] sm:$0xff]  ;;  %v7422_v54 = vld [vmem:[#allocation94_spill] sm:$0xff] }
 0x231   : > { %2787 = vmatprep.subr.mxu0 %v7412_v2  ;;  %2941 = vmatprep.subr.mxu1 %v7413_v27  ;;  %v7423_v2 = vld [vmem:[#allocation73_spill] sm:$0xff]  ;;  %v7424_v27 = vld [vmem:[#allocation98_spill] sm:$0xff] }
 0x232   : > { %2790 = vmatpush2.msra.mxu0 %v7414_v61  ;;  %2943 = vmatpush1.msra.mxu1 %v7415_v16  ;;  %v7425_v61 = vld [vmem:[#allocation74_spill] sm:$0xff]  ;;  %v7426_v16 = vld [vmem:[#allocation88_spill] sm:$0xff] }
 0x233   : > { %2793 = vmatprep.subr.mxu0 %v7416_v58  ;;  %2945 = vmatprep.subr.mxu1 %v7417_v53  ;;  %v7427_v58 = vld [vmem:[#allocation75_spill] sm:$0xff]  ;;  %v7428_v53 = vld [vmem:[#allocation100_spill] sm:$0xff] }
 0x234   : > { %2796 = vmatpush2.msra.mxu0 %v7418_v15  ;;  %2947 = vmatpush2.msra.mxu1 %v7419_v8  ;;  %v7429_v15 = vld [vmem:[#allocation79_spill] sm:$0xff]  ;;  %v7430_v8 = vld [vmem:[#allocation101_spill] sm:$0xff] }
 0x235   : > { %2799 = vmatprep.subr.mxu0 %v7420_v31  ;;  %2949 = vmatprep.subr.mxu1 %v7421_v17  ;;  %v7431_v31 = vld [vmem:[#allocation80_spill] sm:$0xff]  ;;  %v7432_v17 = vld [vmem:[#allocation102_spill] sm:$0xff] }
 0x236   : > { %2802 = vmatpush2.msra.mxu0 %v7422_v54  ;;  %2951 = vmatpush2.msra.mxu1 %v7423_v2  ;;  %v7433_v54 = vld [vmem:[#allocation81_spill] sm:$0xff]  ;;  %v7434_v2 = vld [vmem:[#allocation108_spill] sm:$0xff] }
 0x237   : > { %2805 = vmatprep.subr.mxu0 %v7424_v27  ;;  %2953 = vmatprep.subr.mxu1 %v7425_v61  ;;  %v7435_v27 = vld [vmem:[#allocation83_spill] sm:$0xff]  ;;  %v7436_v61 = vld [vmem:[#allocation109_spill] sm:$0xff] }
 0x238   : > { %2808 = vmatpush2.msra.mxu0 %v7426_v16  ;;  %2955 = vmatpush2.msra.mxu1 %v7427_v58  ;;  %v7437_v16 = vld [vmem:[#allocation87_spill] sm:$0xff]  ;;  %v7438_v58 = vld [vmem:[#allocation110_spill] sm:$0xff] }
 0x239   : > { %2811 = vmatprep.subr.mxu0 %v7428_v53  ;;  %2957 = vmatprep.subr.mxu1 %v7429_v15  ;;  %v7439_v53 = vld [vmem:[#allocation89_spill] sm:$0xff]  ;;  %v7440_v15 = vld [vmem:[#allocation114_spill] sm:$0xff] }
 0x23a   : > { %2814 = vmatpush2.msra.mxu0 %v7430_v8  ;;  %2959 = vmatpush2.msra.mxu1 %v7431_v31  ;;  %v7441_v8 = vld [vmem:[#allocation90_spill] sm:$0xff]  ;;  %v7442_v31 = vld [vmem:[#allocation104_spill] sm:$0xff] }
 0x23b   : > { %2817 = vmatprep.subr.mxu0 %v7432_v17  ;;  %2961 = vmatprep.subr.mxu1 %v7433_v54  ;;  %v7443_v17 = vld [vmem:[#allocation91_spill] sm:$0xff]  ;;  %v7444_v54 = vld [vmem:[#allocation116_spill] sm:$0xff] }
 0x23c   : > { %2820 = vmatpush2.msra.mxu0 %v7434_v2  ;;  %2963 = vmatpush2.msra.mxu1 %v7435_v27  ;;  %v7445_v2 = vld [vmem:[#allocation95_spill] sm:$0xff]  ;;  %v7446_v27 = vld [vmem:[#allocation96_spill] sm:$0xff] }
 0x23d   : > { %2823 = vmatprep.subr.mxu0 %v7436_v61  ;;  %2965 = vmatprep.subr.mxu1 %v7437_v16  ;;  %v7447_v16 = vld [vmem:[#allocation97_spill] sm:$0xff] }
 0x23e   : > { %2826 = vmatpush2.msra.mxu0 %v7438_v58  ;;  %2967 = vmatpush2.msra.mxu1 %v7439_v53  ;;  %v7448_v53 = vld [vmem:[#allocation99_spill] sm:$0xff] }
 0x23f   : > { %2829 = vmatprep.subr.mxu0 %v7440_v15  ;;  %2969 = vmatprep.subr.mxu1 %v7441_v8  ;;  %v7449_v8 = vld [vmem:[#allocation103_spill] sm:$0xff] }
 0x240   : > { %2832 = vmatpush2.msra.mxu0 %v7442_v31  ;;  %2971 = vmatpush2.msra.mxu1 %v7443_v17  ;;  %v7450_v17 = vld [vmem:[#allocation105_spill] sm:$0xff] }
 0x241   : > { %2835 = vmatprep.subr.mxu0 %v7444_v54  ;;  %2973 = vmatprep.subr.mxu1 %v7445_v2  ;;  %v7451_v2 = vld [vmem:[#allocation106_spill] sm:$0xff] }
 0x242   : > { %2838 = vmatpush2.msra.mxu0 %v6304_v42  ;;  %2975 = vmatpush2.msra.mxu1 %v7446_v27  ;;  %v7452_v27 = vld [vmem:[#allocation107_spill] sm:$0xff] }
 0x243   : > { %2841 = vmatprep.subr.mxu0 %v6312_v59  ;;  %2977 = vmatprep.subr.mxu1 %v7447_v16  ;;  %v7453_v16 = vld [vmem:[#allocation111_spill] sm:$0xff] }
 0x244   : > { %2844 = vmatpush2.msra.mxu0 %v6436_v32  ;;  %2979 = vmatpush2.msra.mxu1 %v7448_v53 }
 0x245   : > { %2847 = vmatprep.subr.mxu0 %v6444_v52  ;;  %2981 = vmatprep.subr.mxu1 %v7449_v8 }
 0x246   : > { %2850 = vmatpush2.msra.mxu0 %v6448_v60  ;;  %2983 = vmatpush2.msra.mxu1 %v7450_v17 }
 0x247   : > { %2853 = vmatprep.subr.mxu0 %v6452_v22  ;;  %2985 = vmatprep.subr.mxu1 %v7451_v2  ;;  %v7455_v2 = vand.u32 4294901760, %v7347_v10  ;;  %v7465_v10 = vand.u32 4294901760, %v7358_v38  ;;  %v7479_v38 = vld [vmem:[#allocation26_spill] sm:$0xff] }
 0x248   : > { %2856 = vmatpush2.msra.mxu0 %v6484_v3  ;;  %2987 = vmatpush2.msra.mxu1 %v7452_v27  ;;  %v7454_v27 = vand.u32 4294901760, %v7346_v57  ;;  %v7464_v57 = vand.u32 4294901760, %v7356_v50  ;;  %v7476_v50 = vld [vmem:[#allocation24_spill] sm:$0xff] }
 0x249   : > { %2859 = vmatprep.subr.mxu0 %v6488_v25  ;;  %2989 = vmatprep.subr.mxu1 %v7453_v16 }
 0x24a   : > { %2862 = vmatpush2.msra.mxu0 %v6499_v11  ;;  %2991 = vmatpush2.msra.mxu1 %v6198_v14  ;;  %v7456_v14 = vand.u32 4294901760, %v7348_v35  ;;  %v7466_v35 = vand.u32 4294901760, %v7360_v4  ;;  %v7482_v4 = vld [vmem:[#allocation27_spill] sm:$0xff] }
 0x24b   : > { %2865 = vmatprep.subr.mxu0 %v6502_v0  ;;  %2993 = vmatprep.subr.mxu1 %v6237_v30  ;;  %v7457_v30 = vand.u32 4294901760, %v7349_v44  ;;  %v7469_v44 = vand.u32 4294901760, %v7366_v55  ;;  %v7491_v55 = vld [vmem:[#allocation33_spill] sm:$0xff] }
 0x24c   : > { %2868 = vmatpush2.msra.mxu0 %v6520_v5  ;;  %2995 = vmatpush2.msra.mxu1 %v6275_v9  ;;  %v7458_v9 = vand.u32 4294901760, %v7350_v19  ;;  %v7470_v19 = vand.u32 4294901760, %v7368_v12 }
 0x24d   : > { %2874 = vmatmul.mubr.f32.vlgmr.msra.gmra.mxu0 %v6477_v26  ;;  %3024 = vmatprep.subr.mxu0 %v7454_v27  ;;  %v7459_v27 = vand.u32 4294901760, %v7351_v63  ;;  %v7471_v63 = vand.u32 4294901760, %v7370_v40  ;;  %v7495_v40 = vld [vmem:[#allocation65_spill] sm:$0xff] }
 0x24e   : > { %3028 = vmatpush1.msra.mxu0 %v7455_v2  ;;  %2997 = vmatprep.subr.mxu1 %v6315_v23  ;;  %v7460_v2 = vand.u32 4294901760, %v7352_v1  ;;  %v7472_v1 = vand.u32 4294901760, %v7372_v21 }
 0x24f   : > { %3032 = vmatprep.subr.mxu0 %v7456_v14  ;;  %2999 = vmatpush2.msra.mxu1 %v6343_v20  ;;  %v7461_v14 = vand.u32 4294901760, %v6474_v49  ;;  %v7467_v49 = vand.u32 4294901760, %v7362_v46  ;;  %v7485_v46 = vld [vmem:[#allocation7_spill] sm:$0xff] }
 0x250   : > { %3036 = vmatpush1.msra.mxu0 %v7457_v30  ;;  %3001 = vmatprep.subr.mxu1 %v6384_v47  ;;  %v7462_v30 = vand.u32 4294901760, %v7354_v29  ;;  %v7474_v29 = vand.u32 4294901760, %v7376_v56 }
 0x251   : > { %3040 = vmatprep.subr.mxu0 %v7458_v9  ;;  %3003 = vmatpush2.msra.mxu1 %v6415_v34  ;;  %v7463_v9 = vand.u32 4294901760, %v6477_v26  ;;  %v7468_v26 = vand.u32 4294901760, %v7364_v51  ;;  %v7489_v51 = vld [vmem:[#allocation60_spill] sm:$0xff] }
 0x252   : > { %3044 = vmatpush1.msra.mxu0 %v7459_v27  ;;  %3005 = vmatprep.subr.mxu1 %v6459_v45  ;;  %v7497_v27 = vld [vmem:[#allocation38_spill] sm:$0xff] }
 0x253   : > { %3048 = vmatprep.subr.mxu0 %v7460_v2  ;;  %3007 = vmatpush2.msra.mxu1 %v6494_v13  ;;  %v7498_v2 = vld [vmem:[#allocation67_spill] sm:$0xff] }
 0x254   : > { %3011 = vmatprep.mubr.f32.mxu1 %v7461_v14  ;;  %3052 = vmatpush1.msra.mxu0 %v7462_v30  ;;  %v7499_v14 = vand.u32 4294901760, %v7498_v2  ;;  %v7500_v30 = vld [vmem:[#allocation39_spill] sm:$0xff] }
 0x255   : > { %3015 = vmatmul.mubr.f32.vlgmr.msra.gmra.mxu1 %v7463_v9  ;;  %3056 = vmatprep.subr.mxu0 %v7464_v57  ;;  %v7501_v9 = vld [vmem:[#allocation68_spill] sm:$0xff]  ;;  %v7536_v2 = vld [vmem:[#allocation63_spill] sm:$0xff] }
 0x256   : > { %3287 = vmatprep.subr.mxu1 %v7353_v43  ;;  %3060 = vmatpush1.msra.mxu0 %v7465_v10  ;;  %v7473_v43 = vand.u32 4294901760, %v7374_v28  ;;  %v7502_v57 = vand.u32 4294901760, %v7501_v9  ;;  %v7503_v10 = vld [vmem:[#allocation40_spill] sm:$0xff] }
 0x257   : > { %3289 = vmatpush1.msra.mxu1 %v7355_v39  ;;  %3064 = vmatprep.subr.mxu0 %v7466_v35  ;;  %v7475_v39 = vand.u32 4294901760, %v7378_v6  ;;  %v7504_v35 = vld [vmem:[#allocation69_spill] sm:$0xff]  ;;  %v7539_v9 = vld [vmem:[#allocation64_spill] sm:$0xff] }
 0x258   : > { %3291 = vmatprep.subr.mxu1 %v7357_v7  ;;  %3068 = vmatpush1.msra.mxu0 %v7467_v49  ;;  %v7477_v7 = vld [vmem:[#allocation53_spill] sm:$0xff]  ;;  %v7505_v49 = vand.u32 4294901760, %v7504_v35  ;;  %v7542_v35 = vld [vmem:[#allocation66_spill] sm:$0xff] }
 0x259   : > { %3293 = vmatpush1.msra.mxu1 %v7359_v48  ;;  %3072 = vmatprep.subr.mxu0 %v7468_v26  ;;  %v7478_v21 = vand.u32 4294901760, %v7477_v7  ;;  %v7480_v48 = vld [vmem:[#allocation54_spill] sm:$0xff]  ;;  %v7515_v7 = vld [vmem:[#allocation49_spill] sm:$0xff] }
 0x25a   : > { %3295 = vmatprep.subr.mxu1 %v7361_v36  ;;  %3076 = vmatpush1.msra.mxu0 %v7469_v44  ;;  %v7481_v28 = vand.u32 4294901760, %v7480_v48  ;;  %v7483_v36 = vld [vmem:[#allocation58_spill] sm:$0xff]  ;;  %v7518_v48 = vld [vmem:[#allocation51_spill] sm:$0xff] }
 0x25b   : > { %3297 = vmatpush1.msra.mxu1 %v7363_v37  ;;  %3080 = vmatprep.subr.mxu0 %v7470_v19  ;;  %v7484_v56 = vand.u32 4294901760, %v7483_v36  ;;  %v7488_v37 = vld [vmem:[#allocation30_spill] sm:$0xff]  ;;  %v7521_v36 = vld [vmem:[#allocation55_spill] sm:$0xff] }
 0x25c   : > { %3299 = vmatprep.subr.mxu1 %v7365_v41  ;;  %3084 = vmatpush1.msra.mxu0 %v7471_v63  ;;  %v7490_v41 = vand.u32 4294901760, %v7489_v51  ;;  %v7506_v26 = vld [vmem:[#allocation42_spill] sm:$0xff]  ;;  %v7527_v51 = vld [vmem:[#allocation57_spill] sm:$0xff] }
 0x25d   : > { %3301 = vmatpush1.msra.mxu1 %v7367_v24  ;;  %3088 = vmatprep.subr.mxu0 %v7472_v1  ;;  %v7492_v24 = vld [vmem:[#allocation61_spill] sm:$0xff]  ;;  %v7507_v44 = vld [vmem:[#allocation70_spill] sm:$0xff]  ;;  %v7510_v1 = vld [vmem:[#allocation76_spill] sm:$0xff] }
 0x25e   : > { %3303 = vmatprep.subr.mxu1 %v7369_v18  ;;  %3092 = vmatpush1.msra.mxu0 %v7473_v43  ;;  %v7493_v12 = vand.u32 4294901760, %v7492_v24  ;;  %v7494_v18 = vld [vmem:[#allocation35_spill] sm:$0xff]  ;;  %v7508_v19 = vand.u32 4294901760, %v7507_v44  ;;  %v7509_v63 = vld [vmem:[#allocation46_spill] sm:$0xff]  ;;  %v7511_v43 = vand.u32 4294901760, %v7510_v1  ;;  %v7548_v1 = vld [vmem:[#allocation73_spill] sm:$0xff] }
 0x25f   : > { %3305 = vmatpush1.msra.mxu1 %v7371_v62  ;;  %3096 = vmatprep.subr.mxu0 %v7474_v29  ;;  %v7496_v62 = vand.u32 4294901760, %v7495_v40  ;;  %v7512_v29 = vld [vmem:[#allocation48_spill] sm:$0xff]  ;;  %v7530_v24 = vld [vmem:[#allocation59_spill] sm:$0xff]  ;;  %v7533_v40 = vld [vmem:[#allocation62_spill] sm:$0xff] }
 0x260   : > { %3307 = vmatprep.subr.mxu1 %v7373_v33  ;;  %3100 = vmatpush1.msra.mxu0 %v7475_v39  ;;  %v7486_v33 = vld [vmem:[#allocation47_spill] sm:$0xff]  ;;  %v7513_v39 = vld [vmem:[#allocation77_spill] sm:$0xff] }
 0x261   : > { %3309 = vmatpush1.msra.mxu1 %v7476_v50  ;;  %3104 = vmatprep.subr.mxu0 %v7478_v21  ;;  %v7487_v6 = vand.u32 4294901760, %v7486_v33  ;;  %v7514_v50 = vand.u32 4294901760, %v7513_v39  ;;  %v7516_v21 = vld [vmem:[#allocation78_spill] sm:$0xff]  ;;  %v7524_v33 = vld [vmem:[#allocation56_spill] sm:$0xff]  ;;  %v7545_v44 = vld [vmem:[#allocation71_spill] sm:$0xff] }
 0x262   : > { %3311 = vmatprep.subr.mxu1 %v7479_v38  ;;  %3108 = vmatpush1.msra.mxu0 %v7481_v28  ;;  %v7517_v38 = vand.u32 4294901760, %v7516_v21  ;;  %v7519_v28 = vld [vmem:[#allocation82_spill] sm:$0xff]  ;;  %v7554_v21 = vld [vmem:[#allocation75_spill] sm:$0xff] }
 0x263   : > { %3313 = vmatpush1.msra.mxu1 %v7482_v4  ;;  %3112 = vmatprep.subr.mxu0 %v7484_v56  ;;  %v7520_v4 = vand.u32 4294901760, %v7519_v28  ;;  %v7522_v56 = vld [vmem:[#allocation72_spill] sm:$0xff]  ;;  %v7551_v39 = vld [vmem:[#allocation74_spill] sm:$0xff]  ;;  %v7557_v28 = vld [vmem:[#allocation79_spill] sm:$0xff] }
 0x264   : > { %3315 = vmatprep.subr.mxu1 %v7485_v46  ;;  %3116 = vmatpush1.msra.mxu0 %v7487_v6  ;;  %v7523_v46 = vand.u32 4294901760, %v7522_v56  ;;  %v7525_v6 = vld [vmem:[#allocation84_spill] sm:$0xff] }
 0x265   : > { %3317 = vmatpush1.msra.mxu1 %v7488_v37  ;;  %3120 = vmatprep.subr.mxu0 %v7490_v41  ;;  %v7526_v37 = vand.u32 4294901760, %v7525_v6  ;;  %v7528_v41 = vld [vmem:[#allocation85_spill] sm:$0xff]  ;;  %v7560_v56 = vld [vmem:[#allocation80_spill] sm:$0xff]  ;;  %v7563_v6 = vand.u32 4294901760, %v7438_v58  ;;  %v7571_v58 = vand.u32 4294901760, %v6304_v42  ;;  %v7579_v42 = vand.u32 4294901760, %v6448_v60 }
 0x266   : > { %3319 = vmatprep.subr.mxu1 %v7491_v55  ;;  %3124 = vmatpush1.msra.mxu0 %v7493_v12  ;;  %v7529_v55 = vand.u32 4294901760, %v7528_v41  ;;  %v7531_v12 = vld [vmem:[#allocation86_spill] sm:$0xff]  ;;  %v7566_v41 = vld [vmem:[#allocation87_spill] sm:$0xff]  ;;  %v7584_v60 = vand.u32 4294901760, %v6499_v11 }
 0x267   : > { %3321 = vmatpush1.msra.mxu1 %v7494_v18  ;;  %3128 = vmatprep.subr.mxu0 %v7496_v62  ;;  %v7532_v18 = vand.u32 4294901760, %v7531_v12  ;;  %v7534_v62 = vld [vmem:[#allocation92_spill] sm:$0xff]  ;;  %v7570_v12 = vld [vmem:[#allocation90_spill] sm:$0xff]  ;;  %v7592_v11 = vld [vmem:[#allocation115_spill] sm:$0xff] }
 0x268   : > { %3323 = vmatprep.subr.mxu1 %v7497_v27  ;;  %3132 = vmatpush1.msra.mxu0 %v7499_v14  ;;  %v7535_v27 = vand.u32 4294901760, %v7534_v62  ;;  %v7537_v14 = vld [vmem:[#allocation93_spill] sm:$0xff]  ;;  %v7576_v62 = vld [vmem:[#allocation96_spill] sm:$0xff] }
 0x269   : > { %3325 = vmatpush1.msra.mxu1 %v7500_v30  ;;  %3136 = vmatprep.subr.mxu0 %v7502_v57  ;;  %v7538_v30 = vand.u32 4294901760, %v7537_v14  ;;  %v7540_v57 = vld [vmem:[#allocation94_spill] sm:$0xff]  ;;  %v7585_v14 = vld [vmem:[#allocation107_spill] sm:$0xff] }
 0x26a   : > { %3327 = vmatprep.subr.mxu1 %v7503_v10  ;;  %3140 = vmatpush1.msra.mxu0 %v7505_v49  ;;  %v7541_v10 = vand.u32 4294901760, %v7540_v57  ;;  %v7543_v49 = vld [vmem:[#allocation98_spill] sm:$0xff] }
 0x26b   : > { %3329 = vmatpush1.msra.mxu1 %v7506_v26  ;;  %3144 = vmatprep.subr.mxu0 %v7508_v19  ;;  %v7544_v26 = vand.u32 4294901760, %v7543_v49  ;;  %v7546_v19 = vld [vmem:[#allocation88_spill] sm:$0xff] }
 0x26c   : > { %3331 = vmatprep.subr.mxu1 %v7509_v63  ;;  %3148 = vmatpush1.msra.mxu0 %v7511_v43  ;;  %v7547_v63 = vand.u32 4294901760, %v7546_v19  ;;  %v7549_v43 = vld [vmem:[#allocation100_spill] sm:$0xff] }
 0x26d   : > { %3333 = vmatpush1.msra.mxu1 %v7512_v29  ;;  %3152 = vmatprep.subr.mxu0 %v7514_v50  ;;  %v7550_v29 = vand.u32 4294901760, %v7549_v43  ;;  %v7552_v50 = vld [vmem:[#allocation101_spill] sm:$0xff] }
 0x26e   : > { %3335 = vmatprep.subr.mxu1 %v7515_v7  ;;  %3156 = vmatpush2.msra.mxu0 %v7517_v38  ;;  %v7553_v7 = vand.u32 4294901760, %v7552_v50  ;;  %v7555_v38 = vld [vmem:[#allocation102_spill] sm:$0xff] }
 0x26f   : > { %3337 = vmatpush1.msra.mxu1 %v7518_v48  ;;  %3160 = vmatprep.subr.mxu0 %v7520_v4  ;;  %v7556_v48 = vand.u32 4294901760, %v7555_v38  ;;  %v7558_v4 = vld [vmem:[#allocation108_spill] sm:$0xff] }
 0x270   : > { %3339 = vmatprep.subr.mxu1 %v7521_v36  ;;  %3164 = vmatpush2.msra.mxu0 %v7523_v46  ;;  %v7559_v36 = vand.u32 4294901760, %v7558_v4  ;;  %v7561_v46 = vand.u32 4294901760, %v7436_v61  ;;  %v7569_v61 = vand.u32 4294901760, %v7444_v54  ;;  %v7577_v54 = vand.u32 4294901760, %v6444_v52 }
 0x271   : > { %3341 = vmatpush1.msra.mxu1 %v7524_v33  ;;  %3168 = vmatprep.subr.mxu0 %v7526_v37  ;;  %v7562_v33 = vld [vmem:[#allocation81_spill] sm:$0xff]  ;;  %v7564_v37 = vld [vmem:[#allocation83_spill] sm:$0xff]  ;;  %v7582_v52 = vand.u32 4294901760, %v6488_v25  ;;  %v7594_v4 = vlaneseq }
 0x272   : > { %3343 = vmatprep.subr.mxu1 %v7527_v51  ;;  %3172 = vmatpush2.msra.mxu0 %v7529_v55  ;;  %v7565_v51 = vand.u32 4294901760, %v7440_v15  ;;  %v7567_v55 = vand.u32 4294901760, %v7442_v31  ;;  %v7573_v15 = vand.u32 4294901760, %v6312_v59  ;;  %v7575_v31 = vand.u32 4294901760, %v6436_v32  ;;  %v7590_v25 = vld [vmem:[#allocation119_spill] sm:$0xff] }
 0x273   : > { %3345 = vmatpush1.msra.mxu1 %v7530_v24  ;;  %3176 = vmatprep.subr.mxu0 %v7532_v18  ;;  %v7568_v24 = vld [vmem:[#allocation89_spill] sm:$0xff]  ;;  %v7572_v18 = vld [vmem:[#allocation91_spill] sm:$0xff]  ;;  %v7580_v59 = vand.u32 4294901760, %v6452_v22  ;;  %v7581_v32 = vand.u32 4294901760, %v6484_v3  ;;  %v7586_v22 = vand.u32 4294901760, %v6502_v0  ;;  %v7588_v3 = vld [vmem:[#allocation118_spill] sm:$0xff] }
 0x274   : > { %3347 = vmatprep.subr.mxu1 %v7533_v40  ;;  %3180 = vmatpush2.msra.mxu0 %v7535_v27  ;;  %v7574_v40 = vld [vmem:[#allocation95_spill] sm:$0xff]  ;;  %v7578_v27 = vld [vmem:[#allocation97_spill] sm:$0xff]  ;;  %vm3443_vm11 = vcmp.lt.s32.totalorder %v7594_v4, 256 }
 0x275   : > { %3349 = vmatpush1.msra.mxu1 %v7536_v2  ;;  %3184 = vmatprep.subr.mxu0 %v7538_v30  ;;  %v7583_v2 = vld [vmem:[#allocation106_spill] sm:$0xff] }
 0x276   : > { %3351 = vmatprep.subr.mxu1 %v7539_v9  ;;  %3188 = vmatpush2.msra.mxu0 %v7541_v10 }
 0x277   : > { %3353 = vmatpush2.msra.mxu1 %v7542_v35  ;;  %3192 = vmatprep.subr.mxu0 %v7544_v26 }
 0x278   : > { %3355 = vmatprep.subr.mxu1 %v7545_v44  ;;  %3196 = vmatpush2.msra.mxu0 %v7547_v63 }
 0x279   : > { %3357 = vmatpush2.msra.mxu1 %v7548_v1  ;;  %3200 = vmatprep.subr.mxu0 %v7550_v29 }
 0x27a   : > { %3359 = vmatprep.subr.mxu1 %v7551_v39  ;;  %3204 = vmatpush2.msra.mxu0 %v7553_v7 }
 0x27b   : > { %3361 = vmatpush2.msra.mxu1 %v7554_v21  ;;  %3208 = vmatprep.subr.mxu0 %v7556_v48  ;;  %v7593_v21 = vld [vmem:[#allocation5_spill] sm:$0xff] }
 0x27c   : > { %3363 = vmatprep.subr.mxu1 %v7557_v28  ;;  %3212 = vmatpush2.msra.mxu0 %v7559_v36 }
 0x27d   : > { %3365 = vmatpush2.msra.mxu1 %v7560_v56  ;;  %3216 = vmatprep.subr.mxu0 %v7561_v46 }
 0x27e   : > { %3367 = vmatprep.subr.mxu1 %v7562_v33  ;;  %3220 = vmatpush2.msra.mxu0 %v7563_v6 }
 0x27f   : > { %3369 = vmatpush2.msra.mxu1 %v7564_v37  ;;  %3224 = vmatprep.subr.mxu0 %v7565_v51 }
 0x280   : > { %3371 = vmatprep.subr.mxu1 %v7566_v41  ;;  %3228 = vmatpush2.msra.mxu0 %v7567_v55 }
 0x281   : > { %3373 = vmatpush2.msra.mxu1 %v7568_v24  ;;  %3232 = vmatprep.subr.mxu0 %v7569_v61 }
 0x282   : > { %3375 = vmatprep.subr.mxu1 %v7570_v12  ;;  %3236 = vmatpush2.msra.mxu0 %v7571_v58 }
 0x283   : > { %3377 = vmatpush2.msra.mxu1 %v7572_v18  ;;  %3240 = vmatprep.subr.mxu0 %v7573_v15 }
 0x284   : > { %3379 = vmatprep.subr.mxu1 %v7574_v40  ;;  %3244 = vmatpush2.msra.mxu0 %v7575_v31 }
 0x285   : > { %3381 = vmatpush2.msra.mxu1 %v7576_v62  ;;  %3248 = vmatprep.subr.mxu0 %v7577_v54 }
 0x286   : > { %3383 = vmatprep.subr.mxu1 %v7578_v27  ;;  %3252 = vmatpush2.msra.mxu0 %v7579_v42 }
 0x287   : > { %3385 = vmatpush2.msra.mxu1 %v7448_v53  ;;  %3256 = vmatprep.subr.mxu0 %v7580_v59  ;;  %v7591_v53 = vld [vmem:[#allocation113_spill] sm:$0xff] }
 0x288   : > { %3387 = vmatprep.subr.mxu1 %v7449_v8  ;;  %3260 = vmatpush2.msra.mxu0 %v7581_v32  ;;  %v7587_v8 = vand.u32 4294901760, %v6520_v5 }
 0x289   : > { %3389 = vmatpush2.msra.mxu1 %v7450_v17  ;;  %3264 = vmatprep.subr.mxu0 %v7582_v52  ;;  %v7589_v17 = vld [vmem:[#allocation112_spill] sm:$0xff] }
 0x28a   : > { %3391 = vmatprep.subr.mxu1 %v7583_v2  ;;  %3268 = vmatpush2.msra.mxu0 %v7584_v60 }
 0x28b   : > { %3393 = vmatpush2.msra.mxu1 %v7585_v14  ;;  %3272 = vmatprep.subr.mxu0 %v7586_v22 }
 0x28c   : > { %3395 = vmatprep.subr.mxu1 %v7453_v16  ;;  %3276 = vmatpush2.msra.mxu0 %v7587_v8 }
 0x28d   : > { %3278 = vmatprep.mubr.f32.mxu0 %v7588_v3  ;;  %3397 = vmatpush2.msra.mxu1 %v7589_v17 }
 0x28e   : > { %3280 = vmatmul.mubr.f32.vlgmr.msra.gmra.mxu0 %v7590_v25  ;;  %3399 = vmatprep.subr.mxu1 %v7591_v53 }
 0x28f   : > { %3401 = vmatpush2.msra.mxu1 %v7592_v11  ;;  %3415 = vmatprep.mubr.f32.mxu1 %v7588_v3 }
 0x290   : > { %3403 = vmatprep.subr.mxu1 %v6315_v23 }
 0x291   : > { %3405 = vmatpush2.msra.mxu1 %v6343_v20 }
 0x292   : > { %3407 = vmatprep.subr.mxu1 %v6384_v47  ;;  %v3653_v47 = vmov 1966171168  }
 0x293   : > { %3409 = vmatpush2.msra.mxu1 %v6415_v34  ;;  %v3427_v49 = vunpack.c.l.s4 %v3653_v47 }
 0x294   : > { %3411 = vmatprep.subr.mxu1 %v6459_v45 }
 0x295   : > { %3413 = vmatpush2.msra.mxu1 %v6494_v13  ;;  %v3428_v63 = vunpack.c.0.s8 %v3427_v49 }
 0x296   : > { %3417 = vmatmul.mubr.f32.vlgmr.msra.gmra.mxu1 %v7590_v25 }
 0x297   : > { %v3431_v38 = vsub.s32 %v3428_v63, %v7593_v21 }
 0x2cd   : > { %v2279_v16 = vpop.f32.mrf.mxu0 }
 0x2cf   : > { %v2281_v0 = vpop.f32.mrf.mxu0 }
 0x2d2   : > { %v2672_v5 = vpop.f32.mrf.mxu1 }
 0x2d3   : > { %v2673_v20 = vadd.f32 %v2672_v5, %v2279_v16 }
 0x2d4   : > { %v2674_v9 = vpop.f32.mrf.mxu1 }
 0x2d5   : > { %v2675_v35 = vadd.f32 %v2674_v9, %v2281_v0 }
 0x30d   : > { %v2875_v30 = vpop.f32.mrf.mxu0 }
 0x30e   : > { %v2876_v26 = vadd.f32 %v2875_v30, %v2673_v20 }
 0x30f   : > { %v2877_v57 = vpop.f32.mrf.mxu0 }
 0x310   : > { %v2878_v45 = vadd.f32 %v2877_v57, %v2675_v35 }
 0x315   : > { %v3016_v23 = vpop.f32.mrf.mxu1 }
 0x316   : > { %v3017_v44 = vadd.f32 %v3016_v23, %v2876_v26 }
 0x317   : > { %v3018_v34 = vpop.f32.mrf.mxu1 }
 0x318   : > { %v3019_v19 = vadd.f32 %v3018_v34, %v2878_v45 }
 0x34e   : > { %v3281_v10 = vpop.f32.mrf.mxu0 }
 0x34f   : > { %v3282_v43 = vadd.f32 %v3281_v10, %v3017_v44 }
 0x350   : > { %v3283_v13 = vpop.f32.mrf.mxu0 }
 0x351   : > { %v3284_v29 = vadd.f32 %v3283_v13, %v3019_v19 }
 0x356   : > { %v3418_v1 = vpop.f32.mrf.mxu1 }
 0x357   : > { %v3419_v50 = vadd.f32 %v3418_v1, %v3282_v43 }
 0x358   : > { %v3420_v39 = vpop.f32.mrf.mxu1 }
 0x359   : > { %v3421_v7 = vadd.f32 %v3420_v39, %v3284_v29 }
 0x35b   : > { %v3425_v48 = vcombine.low %v3419_v50, %v3421_v7 }
 0x35d   : > { %v3432_v28 = vrot.slane %v3425_v48, %v3431_v38 }
 0x35f   : > { %v3439_v36 = vrot.slane %v3432_v28, %v3431_v38 }
 0x361   : > { %3445 = vst.msk [vmem:[%s176_s11] sm:$0x3] %vm3443_vm11, %v3439_v36 }
 0x362   : > { %3603 = shalt.err (!%p3600_p3)
}
 0x363   : > { %s3604_s29 = scalar_lea.hbm %s3459_s24, 32  ;;  %s3608_s5 = scalar_lea.hbm %s6902_s3, 64 }
 0x364   : > { %p3605_p4 = scmp.ne.s32.totalorder %s3459_s24, %s3604_s29  ;;  %p3609_p9 = scmp.lt.s32.totalorder %s3459_s24, %s6902_s3 }
 0x365   : > { %p3610_p10 = scmp.lt.s32.totalorder %s3608_s5, %s3604_s29 }
 0x366   : > { %p3606_p7 = pnand %p3605_p4, %p3713_p5 }
 0x367   : > { %p3611_p11 = por %p3610_p10, %p3609_p9 }
 0x368   : > { %p3607_p8 = pneg %p3606_p7 }
 0x36a   : > { %p3612_p12 = pnand %p3611_p11, %p3607_p8 }
 0x36c   : > { %3615 = shalt.err (!%p3612_p12)
}
 0x36d   : > { %3549 = dma.vmem_to_hbm [thread:$0]  (%p3713_p5), %s3462_s17, 32, %s3459_s24, %s3447_s25  }
 0x36e PF: > { %p3555_p13 = scmp.ge.s32.totalorder %s3650_s15, 2  ;;  %s3473_s8 = sand.u32 1, %s3638_s12  }
 0x36f   : > { %s3474_s9 = scalar_lea.sflag [#allocation3], %s3473_s8 }
 0x370   : > { %p3552_p0 = pnand %p3555_p13, %p3717_p6 }
 0x372   : > { %p3553_p1 = pneg %p3552_p0 }
 0x374   : > { %3633 = dma.done.wait (%p3553_p1), %s3474_s9, 32  }
 0x375   : > { %3635 = vsyncadd (%p3553_p1), %s3474_s9, 4294967264  ;;  %p13_p2 = scmp.ge.s32.totalorder %s3700_s18, 4   ;;  %s7595_s12 = smov %s3642_s13 }
 0x376   : > { %s7596_s13 = smov %s3646_s14  ;;  %s7597_s14 = smov %s3711_s21 }
 0x377   : > { %s7598_s15 = smov %s3700_s18  ;;  %15 = sbr.rel (!%p13_p2) target bundleno = 3 (0x3), region = 70 }
 0x37c   :  { %3479 = vsyncpa [#allocation3], 1 }
 0x37d   :  { %3481 = vsyncpa [#allocation3 + $0x1], 1 }

</bundles_post_ra>
